<compile_context>
chip_gen: v5e
topology: v5e:2x2
jax: 0.10.0
libtpu: 0.0.40
codegen_flags: <defaults>
</compile_context>

<pallas_src>
from functools import partial

import jax
import jax.numpy as jnp
from jax.experimental import pallas as pl
from jax.experimental.pallas import tpu as pltpu

_NEG_INF = float("-inf")
_CARRY_LANES = 128  # top-k carry width (one lane-aligned vreg row)


def _round_up(x, m):
    return (x + m - 1) // m * m


def _normalize_rows(x):
    x = x.astype(jnp.float32)
    ss = jnp.sum(x * x, axis=1, keepdims=True)
    # rsqrt + multiply; guard only protects against pathological zero rows.
    return x * jax.lax.rsqrt(jnp.maximum(ss, 1e-30))


def _merge_topk(carry_ref, sc, knn):
    """carry_ref <- top-knn (duplicates kept) of union(carry_ref, sc), per row.

    Each pass commits the current row maximum and removes exactly ONE
    occurrence of it (preferring the carry side), so exact ties are retained
    the same way torch.topk retains them.
    """
    tn, tm = sc.shape
    lanes_c = jax.lax.broadcasted_iota(jnp.int32, (tn, _CARRY_LANES), 1)
    lanes_s = jax.lax.broadcasted_iota(jnp.int32, (tn, tm), 1)

    c = carry_ref[...]
    new_c = jnp.full((tn, _CARRY_LANES), _NEG_INF, jnp.float32)
    for t in range(knn):
        cmax = jnp.max(c, axis=1, keepdims=True)               # (tn, 1)
        smax = jnp.max(sc, axis=1, keepdims=True)               # (tn, 1)
        row_max = jnp.maximum(cmax, smax)
        new_c = jnp.where(lanes_c == t, row_max, new_c)

        take_c = cmax >= smax                                   # (tn, 1) bool
        # First occurrence of row_max on each side.
        c_first = jnp.min(jnp.where(c == row_max, lanes_c, _CARRY_LANES),
                          axis=1, keepdims=True)
        s_first = jnp.min(jnp.where(sc == row_max, lanes_s, tm),
                          axis=1, keepdims=True)
        # Remove exactly one occurrence (carry side preferred).
        c = jnp.where(take_c & (lanes_c == c_first), _NEG_INF, c)
        sc = jnp.where(jnp.logical_not(take_c) & (lanes_s == s_first),
                       _NEG_INF, sc)
    carry_ref[...] = new_c


def rcsls_kernel(x_ref, b_ref, zt_ref, zs_ref, out_ref, c0_ref, c1_ref,
                 *, knn, m_total, needs_mask):
    j = pl.program_id(1)
    last_j = pl.num_programs(1) - 1
    tm = zt_ref.shape[1]

    # ---- per-N-tile init (first M step) --------------------------------
    @pl.when(j == 0)
    def _init():
        neg = jnp.full(c0_ref.shape, _NEG_INF, jnp.float32)
        c0_ref[...] = neg
        c1_ref[...] = neg

    # ---- per-(N, M)-tile work ------------------------------------------
    # Canonical (tn, d) x (d, tm) MXU matmuls; Z was pre-normalized and
    # pre-transposed in the wrapper.
    dims = (((1,), (0,)), ((), ()))
    sc0 = jax.lax.dot_general(x_ref[...], zt_ref[...], dims,
                              preferred_element_type=jnp.float32)
    sc1 = jax.lax.dot_general(b_ref[...], zs_ref[...], dims,
                              preferred_element_type=jnp.float32)

    if needs_mask:
        # 0 / -inf bias row over the lane (M) axis; only emitted when M was
        # padded.  Broadcast add keeps the per-step cost to one VPU add.
        col = jax.lax.broadcasted_iota(jnp.int32, (1, tm), 1) + j * tm
        bias = jnp.where(col < m_total, 0.0, _NEG_INF).astype(jnp.float32)
        sc0 = sc0 + bias
        sc1 = sc1 + bias

    _merge_topk(c0_ref, sc0, knn)
    _merge_topk(c1_ref, sc1, knn)

    # ---- per-N-tile finalize (last M step) ------------------------------
    @pl.when(j == last_j)
    def _finalize():
        lane = jax.lax.broadcasted_iota(jnp.int32, c0_ref.shape, 1)
        keep = lane < knn
        v0 = c0_ref[...]
        v1 = c1_ref[...]
        s0 = jnp.sum(jnp.where(keep & (v0 != _NEG_INF), v0, 0.0))
        s1 = jnp.sum(jnp.where(keep & (v1 != _NEG_INF), v1, 0.0))
        out_ref[...] = jnp.zeros(out_ref.shape, jnp.float32) + (s0 + s1)


def rcsls_loss(X_trans, Y_tgt, Z_src, Z_tgt, back_emb, knn=10,
               tile_n=1024, tile_m=1024, use_bf16_matmul=False):
    N, d = X_trans.shape
    M = Z_src.shape[0]
    assert Y_tgt.shape == (N, d) and back_emb.shape == (N, d)
    assert Z_tgt.shape == (M, d) and Z_src.shape == (M, d)
    assert 1 <= knn <= _CARRY_LANES and M >= knn
    # NOTE: the torch module hard-codes topk(10); for knn <= 10 this matches.

    # ---- one-time XLA prep: normalize, fold f, transpose Z ---------------
    xh = _normalize_rows(X_trans)
    yh = _normalize_rows(Y_tgt)
    bh = _normalize_rows(back_emb)
    zsh = _normalize_rows(Z_src)
    zth = _normalize_rows(Z_tgt)
    f = 2.0 * jnp.sum(xh * yh)

    tn = min(_round_up(tile_n, 8), _round_up(N, 8))       # sublane-aligned
    tm = min(_round_up(tile_m, 128), _round_up(M, 128))   # lane-aligned
    n_pad = _round_up(N, tn)
    m_pad = _round_up(M, tm)
    needs_mask = (m_pad != M)

    in_dtype = jnp.bfloat16 if use_bf16_matmul else jnp.float32

    def prep_rows(a, target):
        extra = target - a.shape[0]
        if extra:
            a = jnp.pad(a, ((0, extra), (0, 0)))
        return a.astype(in_dtype)

    Xp = prep_rows(xh, n_pad)            # (n_pad, d)
    Bp = prep_rows(bh, n_pad)            # (n_pad, d)
    ZtT = prep_rows(zth, m_pad).T        # (d, m_pad)
    ZsT = prep_rows(zsh, m_pad).T        # (d, m_pad)

    gi, gj = n_pad // tn, m_pad // tm

    n_spec = pl.BlockSpec((tn, d), lambda i, j: (i, 0))
    # On v5e, if the (d, tm) Z fetch shows exposed DMA latency, consider
    # pipeline_mode=pl.Buffered(3) on m_spec (keep default 2 on v7x).
    m_spec = pl.BlockSpec((d, tm), lambda i, j: (0, j))

    partials = pl.pallas_call(
        partial(rcsls_kernel, knn=knn, m_total=M, needs_mask=needs_mask),
        out_shape=jax.ShapeDtypeStruct((gi, 8, 128), jnp.float32),
        grid_spec=pltpu.PrefetchScalarGridSpec(
            num_scalar_prefetch=0,
            grid=(gi, gj),
            in_specs=[n_spec, n_spec, m_spec, m_spec],
            out_specs=pl.BlockSpec((1, 8, 128), lambda i, j: (i, 0, 0)),
            scratch_shapes=[
                pltpu.VMEM((tn, _CARRY_LANES), jnp.float32),  # top-k carry 0
                pltpu.VMEM((tn, _CARRY_LANES), jnp.float32),  # top-k carry 1
            ],
        ),
        compiler_params=pltpu.CompilerParams(
            dimension_semantics=("parallel", "arbitrary"),
            vmem_limit_bytes=48 * 1024 * 1024,
        ),
    )(Xp, Bp, ZtT, ZsT)

    # Padded N rows are exact-zero vectors: their top-k values are all 0 and
    # they contribute exactly 0 to the per-tile partials.
    topk_sum = jnp.sum(partials[:, 0, 0])
    return -(f - topk_sum / knn) / N


def rcsls_loss_ref(X_trans, Y_tgt, Z_src, Z_tgt, back_emb, knn=10):
    """Pure-JAX reference for sanity checking."""
    def norm(x):
        return x / jnp.linalg.norm(x, axis=1, keepdims=True)

    src, tgt = norm(X_trans), norm(Y_tgt)
    zs, zt, bk = norm(Z_src), norm(Z_tgt), norm(back_emb)
    f = 2.0 * jnp.sum(src * tgt)

    def getknn(sc, k):
        return jnp.sum(jax.lax.top_k(sc, k)[0]) / k

    f = f - getknn(src @ zt.T, knn) - getknn(bk @ zs.T, knn)
    return -f / X_trans.shape[0]


if __name__ == "__main__":
    key = jax.random.PRNGKey(0)
    kx, ky, kzs, kzt, kb = jax.random.split(key, 5)

    N, M, d = 40, 320, 128  # small shapes; d on the lane axis
    X_trans = jax.random.normal(kx, (N, d), dtype=jnp.float32)
    Y_tgt = jax.random.normal(ky, (N, d), dtype=jnp.float32)
    Z_src = jax.random.normal(kzs, (M, d), dtype=jnp.float32)
    Z_tgt = jax.random.normal(kzt, (M, d), dtype=jnp.float32)
    back_emb = jax.random.normal(kb, (N, d), dtype=jnp.float32)

    ref = rcsls_loss_ref(X_trans, Y_tgt, Z_src, Z_tgt, back_emb, knn=10)

    # 1) small tiles: exercises the (N-parallel, M-arbitrary) grid, the
    #    streaming top-k carry, and both N-row and M-column padding paths.
    out_tiled = rcsls_loss(X_trans, Y_tgt, Z_src, Z_tgt, back_emb, knn=10,
                           tile_n=16, tile_m=128)
    out_tiled = jax.block_until_ready(out_tiled)
    assert jnp.allclose(out_tiled, ref, rtol=1e-4, atol=1e-4), (out_tiled, ref)

    # 2) default tiles (clamped to the problem size): single-tile fast path.
    out_default = rcsls_loss(X_trans, Y_tgt, Z_src, Z_tgt, back_emb, knn=10)
    out_default = jax.block_until_ready(out_default)
    assert jnp.allclose(out_default, ref, rtol=1e-4, atol=1e-4), (out_default, ref)

    # 3) exact-tie test: duplicate vocabulary rows produce exactly tied
    #    scores; the merge must keep duplicates like torch.topk does.
    Z_tgt_dup = Z_tgt.at[1].set(Z_tgt[0])
    Z_src_dup = Z_src.at[5].set(Z_src[2])
    ref_dup = rcsls_loss_ref(X_trans, Y_tgt, Z_src_dup, Z_tgt_dup, back_emb, knn=10)
    out_dup = rcsls_loss(X_trans, Y_tgt, Z_src_dup, Z_tgt_dup, back_emb, knn=10,
                         tile_n=16, tile_m=128)
    out_dup = jax.block_until_ready(out_dup)
    assert jnp.allclose(out_dup, ref_dup, rtol=1e-4, atol=1e-4), (out_dup, ref_dup)

    print("KERNEL_OK")
</pallas_src>

<mosaic_0001>
module attributes {stable_mosaic.version = 11 : i64} {
  func.func @rcsls_kernel(%arg0: i32, %arg1: i32, %arg2: memref<16x128xf32, #tpu.memory_space<vmem>>, %arg3: memref<16x128xf32, #tpu.memory_space<vmem>>, %arg4: memref<128x128xf32, #tpu.memory_space<vmem>>, %arg5: memref<128x128xf32, #tpu.memory_space<vmem>>, %arg6: memref<1x8x128xf32, #tpu.memory_space<vmem>>, %arg7: memref<16x128xf32, #tpu.memory_space<vmem>>, %arg8: memref<16x128xf32, #tpu.memory_space<vmem>>) attributes {dimension_semantics = [#tpu.dimension_semantics<parallel>, #tpu.dimension_semantics<arbitrary>], iteration_bounds = array<i64: 3, 3>, scalar_prefetch = 0 : i64, scratch_operands = 2 : i64, tpu.core_type = #tpu.core_type<tc>, window_params = [{transform_indices = @transform_0, window_bounds = array<i64: 16, 128>}, {transform_indices = @transform_1, window_bounds = array<i64: 16, 128>}, {transform_indices = @transform_2, window_bounds = array<i64: 128, 128>}, {transform_indices = @transform_3, window_bounds = array<i64: 128, 128>}, {transform_indices = @transform_4, window_bounds = array<i64: 1, 8, 128>}]} {
    %c0_i32 = arith.constant 0 : i32
    %0 = arith.cmpi eq, %arg1, %c0_i32 : i32
    %1 = arith.extui %0 : i1 to i32
    %c0_i32_0 = arith.constant 0 : i32
    %2 = arith.cmpi ne, %1, %c0_i32_0 : i32
    scf.if %2 {
      %cst_200 = arith.constant 0xFF800000 : f32
      %703 = vector.broadcast %cst_200 : f32 to vector<16x128xf32>
      %c0_201 = arith.constant 0 : index
      %c0_202 = arith.constant 0 : index
      %704 = vector.load %arg7[%c0_201, %c0_202] : memref<16x128xf32, #tpu.memory_space<vmem>>, vector<16x128xf32>
      tpu.vector_store %arg7[%c0_201, %c0_202], %703 {strides = array<i32>} : memref<16x128xf32, #tpu.memory_space<vmem>>, vector<16x128xf32>,
      %c0_203 = arith.constant 0 : index
      %c0_204 = arith.constant 0 : index
      %705 = vector.load %arg8[%c0_203, %c0_204] : memref<16x128xf32, #tpu.memory_space<vmem>>, vector<16x128xf32>
      tpu.vector_store %arg8[%c0_203, %c0_204], %703 {strides = array<i32>} : memref<16x128xf32, #tpu.memory_space<vmem>>, vector<16x128xf32>,
    } else {
    }
    %c0 = arith.constant 0 : index
    %c0_1 = arith.constant 0 : index
    %3 = vector.load %arg2[%c0, %c0_1] : memref<16x128xf32, #tpu.memory_space<vmem>>, vector<16x128xf32>
    %c0_2 = arith.constant 0 : index
    %c0_3 = arith.constant 0 : index
    %4 = vector.load %arg4[%c0_2, %c0_3] : memref<128x128xf32, #tpu.memory_space<vmem>>, vector<128x128xf32>
    %cst = arith.constant dense<0.000000e+00> : vector<16x128xf32>
    %5 = tpu.matmul %3, %4, %cst {dimension_numbers = #tpu.dot_dimension_numbers<[1], [0], [0], [1], [0, 0, 1, 1], [], []>} : vector<16x128xf32>, vector<128x128xf32>, vector<16x128xf32> -> vector<16x128xf32>
    %c0_4 = arith.constant 0 : index
    %c0_5 = arith.constant 0 : index
    %6 = vector.load %arg3[%c0_4, %c0_5] : memref<16x128xf32, #tpu.memory_space<vmem>>, vector<16x128xf32>
    %c0_6 = arith.constant 0 : index
    %c0_7 = arith.constant 0 : index
    %7 = vector.load %arg5[%c0_6, %c0_7] : memref<128x128xf32, #tpu.memory_space<vmem>>, vector<128x128xf32>
    %cst_8 = arith.constant dense<0.000000e+00> : vector<16x128xf32>
    %8 = tpu.matmul %6, %7, %cst_8 {dimension_numbers = #tpu.dot_dimension_numbers<[1], [0], [0], [1], [0, 0, 1, 1], [], []>} : vector<16x128xf32>, vector<128x128xf32>, vector<16x128xf32> -> vector<16x128xf32>
    %9 = tpu.iota {dimensions = array<i32: 1>} : vector<1x128xi32>
    %c128_i32 = arith.constant 128 : i32
    %10 = arith.muli %arg1, %c128_i32 : i32
    %11 = vector.broadcast %10 : i32 to vector<1x128xi32>
    %12 = arith.addi %9, %11 : vector<1x128xi32>
    %c320_i32 = arith.constant 320 : i32
    %13 = vector.broadcast %c320_i32 : i32 to vector<1x128xi32>
    %14 = arith.cmpi slt, %12, %13 : vector<1x128xi32>
    %cst_9 = arith.constant 0.000000e+00 : f32
    %cst_10 = arith.constant 0xFF800000 : f32
    %15 = vector.broadcast %cst_9 : f32 to vector<1x128xf32>
    %16 = vector.broadcast %cst_10 : f32 to vector<1x128xf32>
    %17 = arith.select %14, %15, %16 : vector<1x128xi1>, vector<1x128xf32>
    %18 = vector.broadcast %17 : vector<1x128xf32> to vector<16x128xf32>
    %19 = arith.addf %5, %18 : vector<16x128xf32>
    %20 = vector.broadcast %17 : vector<1x128xf32> to vector<16x128xf32>
    %21 = arith.addf %8, %20 : vector<16x128xf32>
    %22 = tpu.iota {dimensions = array<i32: 1>} : vector<16x128xi32>
    %23 = tpu.iota {dimensions = array<i32: 1>} : vector<16x128xi32>
    %c0_11 = arith.constant 0 : index
    %c0_12 = arith.constant 0 : index
    %24 = vector.load %arg7[%c0_11, %c0_12] : memref<16x128xf32, #tpu.memory_space<vmem>>, vector<16x128xf32>
    %cst_13 = arith.constant 0xFF800000 : f32
    %25 = vector.broadcast %cst_13 : f32 to vector<16x128xf32>
    %cst_14 = arith.constant dense<0xFF800000> : vector<16xf32>
    %26 = vector.multi_reduction <maximumf>, %24, %cst_14 [1] : vector<16x128xf32> to vector<16xf32>
    %27 = vector.shape_cast %26 : vector<16xf32> to vector<16x1xf32>
    %cst_15 = arith.constant dense<0xFF800000> : vector<16xf32>
    %28 = vector.multi_reduction <maximumf>, %19, %cst_15 [1] : vector<16x128xf32> to vector<16xf32>
    %29 = vector.shape_cast %28 : vector<16xf32> to vector<16x1xf32>
    %30 = arith.maximumf %27, %29 : vector<16x1xf32>
    %c0_i32_16 = arith.constant 0 : i32
    %31 = vector.broadcast %c0_i32_16 : i32 to vector<16x128xi32>
    %32 = arith.cmpi eq, %22, %31 : vector<16x128xi32>
    %33 = vector.shape_cast %30 : vector<16x1xf32> to vector<16x1xf32>
    %34 = vector.broadcast %33 : vector<16x1xf32> to vector<16x128xf32>
    %35 = arith.select %32, %34, %25 : vector<16x128xi1>, vector<16x128xf32>
    %36 = arith.cmpf oge, %27, %29 : vector<16x1xf32>
    %37 = vector.broadcast %30 : vector<16x1xf32> to vector<16x128xf32>
    %38 = arith.cmpf oeq, %24, %37 : vector<16x128xf32>
    %c128_i32_17 = arith.constant 128 : i32
    %39 = vector.broadcast %c128_i32_17 : i32 to vector<16x128xi32>
    %40 = arith.select %38, %22, %39 : vector<16x128xi1>, vector<16x128xi32>
    %cst_18 = arith.constant dense<2147483647> : vector<16xi32>
    %41 = vector.multi_reduction <minsi>, %40, %cst_18 [1] : vector<16x128xi32> to vector<16xi32>
    %42 = vector.shape_cast %41 : vector<16xi32> to vector<16x1xi32>
    %43 = vector.broadcast %30 : vector<16x1xf32> to vector<16x128xf32>
    %44 = arith.cmpf oeq, %19, %43 : vector<16x128xf32>
    %c128_i32_19 = arith.constant 128 : i32
    %45 = vector.broadcast %c128_i32_19 : i32 to vector<16x128xi32>
    %46 = arith.select %44, %23, %45 : vector<16x128xi1>, vector<16x128xi32>
    %cst_20 = arith.constant dense<2147483647> : vector<16xi32>
    %47 = vector.multi_reduction <minsi>, %46, %cst_20 [1] : vector<16x128xi32> to vector<16xi32>
    %48 = vector.shape_cast %47 : vector<16xi32> to vector<16x1xi32>
    %49 = vector.broadcast %42 : vector<16x1xi32> to vector<16x128xi32>
    %50 = arith.cmpi eq, %22, %49 : vector<16x128xi32>
    %51 = vector.broadcast %36 : vector<16x1xi1> to vector<16x128xi1>
    %52 = arith.andi %51, %50 : vector<16x128xi1>
    %cst_21 = arith.constant 0xFF800000 : f32
    %53 = vector.broadcast %cst_21 : f32 to vector<16x128xf32>
    %54 = arith.select %52, %53, %24 : vector<16x128xi1>, vector<16x128xf32>
    %cst_22 = arith.constant dense<true> : vector<16x1xi1>
    %55 = arith.xori %36, %cst_22 : vector<16x1xi1>
    %56 = vector.broadcast %48 : vector<16x1xi32> to vector<16x128xi32>
    %57 = arith.cmpi eq, %23, %56 : vector<16x128xi32>
    %58 = vector.broadcast %55 : vector<16x1xi1> to vector<16x128xi1>
    %59 = arith.andi %58, %57 : vector<16x128xi1>
    %cst_23 = arith.constant 0xFF800000 : f32
    %60 = vector.broadcast %cst_23 : f32 to vector<16x128xf32>
    %61 = arith.select %59, %60, %19 : vector<16x128xi1>, vector<16x128xf32>
    %cst_24 = arith.constant dense<0xFF800000> : vector<16xf32>
    %62 = vector.multi_reduction <maximumf>, %54, %cst_24 [1] : vector<16x128xf32> to vector<16xf32>
    %63 = vector.shape_cast %62 : vector<16xf32> to vector<16x1xf32>
    %cst_25 = arith.constant dense<0xFF800000> : vector<16xf32>
    %64 = vector.multi_reduction <maximumf>, %61, %cst_25 [1] : vector<16x128xf32> to vector<16xf32>
    %65 = vector.shape_cast %64 : vector<16xf32> to vector<16x1xf32>
    %66 = arith.maximumf %63, %65 : vector<16x1xf32>
    %c1_i32 = arith.constant 1 : i32
    %67 = vector.broadcast %c1_i32 : i32 to vector<16x128xi32>
    %68 = arith.cmpi eq, %22, %67 : vector<16x128xi32>
    %69 = vector.shape_cast %66 : vector<16x1xf32> to vector<16x1xf32>
    %70 = vector.broadcast %69 : vector<16x1xf32> to vector<16x128xf32>
    %71 = arith.select %68, %70, %35 : vector<16x128xi1>, vector<16x128xf32>
    %72 = arith.cmpf oge, %63, %65 : vector<16x1xf32>
    %73 = vector.broadcast %66 : vector<16x1xf32> to vector<16x128xf32>
    %74 = arith.cmpf oeq, %54, %73 : vector<16x128xf32>
    %c128_i32_26 = arith.constant 128 : i32
    %75 = vector.broadcast %c128_i32_26 : i32 to vector<16x128xi32>
    %76 = arith.select %74, %22, %75 : vector<16x128xi1>, vector<16x128xi32>
    %cst_27 = arith.constant dense<2147483647> : vector<16xi32>
    %77 = vector.multi_reduction <minsi>, %76, %cst_27 [1] : vector<16x128xi32> to vector<16xi32>
    %78 = vector.shape_cast %77 : vector<16xi32> to vector<16x1xi32>
    %79 = vector.broadcast %66 : vector<16x1xf32> to vector<16x128xf32>
    %80 = arith.cmpf oeq, %61, %79 : vector<16x128xf32>
    %c128_i32_28 = arith.constant 128 : i32
    %81 = vector.broadcast %c128_i32_28 : i32 to vector<16x128xi32>
    %82 = arith.select %80, %23, %81 : vector<16x128xi1>, vector<16x128xi32>
    %cst_29 = arith.constant dense<2147483647> : vector<16xi32>
    %83 = vector.multi_reduction <minsi>, %82, %cst_29 [1] : vector<16x128xi32> to vector<16xi32>
    %84 = vector.shape_cast %83 : vector<16xi32> to vector<16x1xi32>
    %85 = vector.broadcast %78 : vector<16x1xi32> to vector<16x128xi32>
    %86 = arith.cmpi eq, %22, %85 : vector<16x128xi32>
    %87 = vector.broadcast %72 : vector<16x1xi1> to vector<16x128xi1>
    %88 = arith.andi %87, %86 : vector<16x128xi1>
    %cst_30 = arith.constant 0xFF800000 : f32
    %89 = vector.broadcast %cst_30 : f32 to vector<16x128xf32>
    %90 = arith.select %88, %89, %54 : vector<16x128xi1>, vector<16x128xf32>
    %cst_31 = arith.constant dense<true> : vector<16x1xi1>
    %91 = arith.xori %72, %cst_31 : vector<16x1xi1>
    %92 = vector.broadcast %84 : vector<16x1xi32> to vector<16x128xi32>
    %93 = arith.cmpi eq, %23, %92 : vector<16x128xi32>
    %94 = vector.broadcast %91 : vector<16x1xi1> to vector<16x128xi1>
    %95 = arith.andi %94, %93 : vector<16x128xi1>
    %cst_32 = arith.constant 0xFF800000 : f32
    %96 = vector.broadcast %cst_32 : f32 to vector<16x128xf32>
    %97 = arith.select %95, %96, %61 : vector<16x128xi1>, vector<16x128xf32>
    %cst_33 = arith.constant dense<0xFF800000> : vector<16xf32>
    %98 = vector.multi_reduction <maximumf>, %90, %cst_33 [1] : vector<16x128xf32> to vector<16xf32>
    %99 = vector.shape_cast %98 : vector<16xf32> to vector<16x1xf32>
    %cst_34 = arith.constant dense<0xFF800000> : vector<16xf32>
    %100 = vector.multi_reduction <maximumf>, %97, %cst_34 [1] : vector<16x128xf32> to vector<16xf32>
    %101 = vector.shape_cast %100 : vector<16xf32> to vector<16x1xf32>
    %102 = arith.maximumf %99, %101 : vector<16x1xf32>
    %c2_i32 = arith.constant 2 : i32
    %103 = vector.broadcast %c2_i32 : i32 to vector<16x128xi32>
    %104 = arith.cmpi eq, %22, %103 : vector<16x128xi32>
    %105 = vector.shape_cast %102 : vector<16x1xf32> to vector<16x1xf32>
    %106 = vector.broadcast %105 : vector<16x1xf32> to vector<16x128xf32>
    %107 = arith.select %104, %106, %71 : vector<16x128xi1>, vector<16x128xf32>
    %108 = arith.cmpf oge, %99, %101 : vector<16x1xf32>
    %109 = vector.broadcast %102 : vector<16x1xf32> to vector<16x128xf32>
    %110 = arith.cmpf oeq, %90, %109 : vector<16x128xf32>
    %c128_i32_35 = arith.constant 128 : i32
    %111 = vector.broadcast %c128_i32_35 : i32 to vector<16x128xi32>
    %112 = arith.select %110, %22, %111 : vector<16x128xi1>, vector<16x128xi32>
    %cst_36 = arith.constant dense<2147483647> : vector<16xi32>
    %113 = vector.multi_reduction <minsi>, %112, %cst_36 [1] : vector<16x128xi32> to vector<16xi32>
    %114 = vector.shape_cast %113 : vector<16xi32> to vector<16x1xi32>
    %115 = vector.broadcast %102 : vector<16x1xf32> to vector<16x128xf32>
    %116 = arith.cmpf oeq, %97, %115 : vector<16x128xf32>
    %c128_i32_37 = arith.constant 128 : i32
    %117 = vector.broadcast %c128_i32_37 : i32 to vector<16x128xi32>
    %118 = arith.select %116, %23, %117 : vector<16x128xi1>, vector<16x128xi32>
    %cst_38 = arith.constant dense<2147483647> : vector<16xi32>
    %119 = vector.multi_reduction <minsi>, %118, %cst_38 [1] : vector<16x128xi32> to vector<16xi32>
    %120 = vector.shape_cast %119 : vector<16xi32> to vector<16x1xi32>
    %121 = vector.broadcast %114 : vector<16x1xi32> to vector<16x128xi32>
    %122 = arith.cmpi eq, %22, %121 : vector<16x128xi32>
    %123 = vector.broadcast %108 : vector<16x1xi1> to vector<16x128xi1>
    %124 = arith.andi %123, %122 : vector<16x128xi1>
    %cst_39 = arith.constant 0xFF800000 : f32
    %125 = vector.broadcast %cst_39 : f32 to vector<16x128xf32>
    %126 = arith.select %124, %125, %90 : vector<16x128xi1>, vector<16x128xf32>
    %cst_40 = arith.constant dense<true> : vector<16x1xi1>
    %127 = arith.xori %108, %cst_40 : vector<16x1xi1>
    %128 = vector.broadcast %120 : vector<16x1xi32> to vector<16x128xi32>
    %129 = arith.cmpi eq, %23, %128 : vector<16x128xi32>
    %130 = vector.broadcast %127 : vector<16x1xi1> to vector<16x128xi1>
    %131 = arith.andi %130, %129 : vector<16x128xi1>
    %cst_41 = arith.constant 0xFF800000 : f32
    %132 = vector.broadcast %cst_41 : f32 to vector<16x128xf32>
    %133 = arith.select %131, %132, %97 : vector<16x128xi1>, vector<16x128xf32>
    %cst_42 = arith.constant dense<0xFF800000> : vector<16xf32>
    %134 = vector.multi_reduction <maximumf>, %126, %cst_42 [1] : vector<16x128xf32> to vector<16xf32>
    %135 = vector.shape_cast %134 : vector<16xf32> to vector<16x1xf32>
    %cst_43 = arith.constant dense<0xFF800000> : vector<16xf32>
    %136 = vector.multi_reduction <maximumf>, %133, %cst_43 [1] : vector<16x128xf32> to vector<16xf32>
    %137 = vector.shape_cast %136 : vector<16xf32> to vector<16x1xf32>
    %138 = arith.maximumf %135, %137 : vector<16x1xf32>
    %c3_i32 = arith.constant 3 : i32
    %139 = vector.broadcast %c3_i32 : i32 to vector<16x128xi32>
    %140 = arith.cmpi eq, %22, %139 : vector<16x128xi32>
    %141 = vector.shape_cast %138 : vector<16x1xf32> to vector<16x1xf32>
    %142 = vector.broadcast %141 : vector<16x1xf32> to vector<16x128xf32>
    %143 = arith.select %140, %142, %107 : vector<16x128xi1>, vector<16x128xf32>
    %144 = arith.cmpf oge, %135, %137 : vector<16x1xf32>
    %145 = vector.broadcast %138 : vector<16x1xf32> to vector<16x128xf32>
    %146 = arith.cmpf oeq, %126, %145 : vector<16x128xf32>
    %c128_i32_44 = arith.constant 128 : i32
    %147 = vector.broadcast %c128_i32_44 : i32 to vector<16x128xi32>
    %148 = arith.select %146, %22, %147 : vector<16x128xi1>, vector<16x128xi32>
    %cst_45 = arith.constant dense<2147483647> : vector<16xi32>
    %149 = vector.multi_reduction <minsi>, %148, %cst_45 [1] : vector<16x128xi32> to vector<16xi32>
    %150 = vector.shape_cast %149 : vector<16xi32> to vector<16x1xi32>
    %151 = vector.broadcast %138 : vector<16x1xf32> to vector<16x128xf32>
    %152 = arith.cmpf oeq, %133, %151 : vector<16x128xf32>
    %c128_i32_46 = arith.constant 128 : i32
    %153 = vector.broadcast %c128_i32_46 : i32 to vector<16x128xi32>
    %154 = arith.select %152, %23, %153 : vector<16x128xi1>, vector<16x128xi32>
    %cst_47 = arith.constant dense<2147483647> : vector<16xi32>
    %155 = vector.multi_reduction <minsi>, %154, %cst_47 [1] : vector<16x128xi32> to vector<16xi32>
    %156 = vector.shape_cast %155 : vector<16xi32> to vector<16x1xi32>
    %157 = vector.broadcast %150 : vector<16x1xi32> to vector<16x128xi32>
    %158 = arith.cmpi eq, %22, %157 : vector<16x128xi32>
    %159 = vector.broadcast %144 : vector<16x1xi1> to vector<16x128xi1>
    %160 = arith.andi %159, %158 : vector<16x128xi1>
    %cst_48 = arith.constant 0xFF800000 : f32
    %161 = vector.broadcast %cst_48 : f32 to vector<16x128xf32>
    %162 = arith.select %160, %161, %126 : vector<16x128xi1>, vector<16x128xf32>
    %cst_49 = arith.constant dense<true> : vector<16x1xi1>
    %163 = arith.xori %144, %cst_49 : vector<16x1xi1>
    %164 = vector.broadcast %156 : vector<16x1xi32> to vector<16x128xi32>
    %165 = arith.cmpi eq, %23, %164 : vector<16x128xi32>
    %166 = vector.broadcast %163 : vector<16x1xi1> to vector<16x128xi1>
    %167 = arith.andi %166, %165 : vector<16x128xi1>
    %cst_50 = arith.constant 0xFF800000 : f32
    %168 = vector.broadcast %cst_50 : f32 to vector<16x128xf32>
    %169 = arith.select %167, %168, %133 : vector<16x128xi1>, vector<16x128xf32>
    %cst_51 = arith.constant dense<0xFF800000> : vector<16xf32>
    %170 = vector.multi_reduction <maximumf>, %162, %cst_51 [1] : vector<16x128xf32> to vector<16xf32>
    %171 = vector.shape_cast %170 : vector<16xf32> to vector<16x1xf32>
    %cst_52 = arith.constant dense<0xFF800000> : vector<16xf32>
    %172 = vector.multi_reduction <maximumf>, %169, %cst_52 [1] : vector<16x128xf32> to vector<16xf32>
    %173 = vector.shape_cast %172 : vector<16xf32> to vector<16x1xf32>
    %174 = arith.maximumf %171, %173 : vector<16x1xf32>
    %c4_i32 = arith.constant 4 : i32
    %175 = vector.broadcast %c4_i32 : i32 to vector<16x128xi32>
    %176 = arith.cmpi eq, %22, %175 : vector<16x128xi32>
    %177 = vector.shape_cast %174 : vector<16x1xf32> to vector<16x1xf32>
    %178 = vector.broadcast %177 : vector<16x1xf32> to vector<16x128xf32>
    %179 = arith.select %176, %178, %143 : vector<16x128xi1>, vector<16x128xf32>
    %180 = arith.cmpf oge, %171, %173 : vector<16x1xf32>
    %181 = vector.broadcast %174 : vector<16x1xf32> to vector<16x128xf32>
    %182 = arith.cmpf oeq, %162, %181 : vector<16x128xf32>
    %c128_i32_53 = arith.constant 128 : i32
    %183 = vector.broadcast %c128_i32_53 : i32 to vector<16x128xi32>
    %184 = arith.select %182, %22, %183 : vector<16x128xi1>, vector<16x128xi32>
    %cst_54 = arith.constant dense<2147483647> : vector<16xi32>
    %185 = vector.multi_reduction <minsi>, %184, %cst_54 [1] : vector<16x128xi32> to vector<16xi32>
    %186 = vector.shape_cast %185 : vector<16xi32> to vector<16x1xi32>
    %187 = vector.broadcast %174 : vector<16x1xf32> to vector<16x128xf32>
    %188 = arith.cmpf oeq, %169, %187 : vector<16x128xf32>
    %c128_i32_55 = arith.constant 128 : i32
    %189 = vector.broadcast %c128_i32_55 : i32 to vector<16x128xi32>
    %190 = arith.select %188, %23, %189 : vector<16x128xi1>, vector<16x128xi32>
    %cst_56 = arith.constant dense<2147483647> : vector<16xi32>
    %191 = vector.multi_reduction <minsi>, %190, %cst_56 [1] : vector<16x128xi32> to vector<16xi32>
    %192 = vector.shape_cast %191 : vector<16xi32> to vector<16x1xi32>
    %193 = vector.broadcast %186 : vector<16x1xi32> to vector<16x128xi32>
    %194 = arith.cmpi eq, %22, %193 : vector<16x128xi32>
    %195 = vector.broadcast %180 : vector<16x1xi1> to vector<16x128xi1>
    %196 = arith.andi %195, %194 : vector<16x128xi1>
    %cst_57 = arith.constant 0xFF800000 : f32
    %197 = vector.broadcast %cst_57 : f32 to vector<16x128xf32>
    %198 = arith.select %196, %197, %162 : vector<16x128xi1>, vector<16x128xf32>
    %cst_58 = arith.constant dense<true> : vector<16x1xi1>
    %199 = arith.xori %180, %cst_58 : vector<16x1xi1>
    %200 = vector.broadcast %192 : vector<16x1xi32> to vector<16x128xi32>
    %201 = arith.cmpi eq, %23, %200 : vector<16x128xi32>
    %202 = vector.broadcast %199 : vector<16x1xi1> to vector<16x128xi1>
    %203 = arith.andi %202, %201 : vector<16x128xi1>
    %cst_59 = arith.constant 0xFF800000 : f32
    %204 = vector.broadcast %cst_59 : f32 to vector<16x128xf32>
    %205 = arith.select %203, %204, %169 : vector<16x128xi1>, vector<16x128xf32>
    %cst_60 = arith.constant dense<0xFF800000> : vector<16xf32>
    %206 = vector.multi_reduction <maximumf>, %198, %cst_60 [1] : vector<16x128xf32> to vector<16xf32>
    %207 = vector.shape_cast %206 : vector<16xf32> to vector<16x1xf32>
    %cst_61 = arith.constant dense<0xFF800000> : vector<16xf32>
    %208 = vector.multi_reduction <maximumf>, %205, %cst_61 [1] : vector<16x128xf32> to vector<16xf32>
    %209 = vector.shape_cast %208 : vector<16xf32> to vector<16x1xf32>
    %210 = arith.maximumf %207, %209 : vector<16x1xf32>
    %c5_i32 = arith.constant 5 : i32
    %211 = vector.broadcast %c5_i32 : i32 to vector<16x128xi32>
    %212 = arith.cmpi eq, %22, %211 : vector<16x128xi32>
    %213 = vector.shape_cast %210 : vector<16x1xf32> to vector<16x1xf32>
    %214 = vector.broadcast %213 : vector<16x1xf32> to vector<16x128xf32>
    %215 = arith.select %212, %214, %179 : vector<16x128xi1>, vector<16x128xf32>
    %216 = arith.cmpf oge, %207, %209 : vector<16x1xf32>
    %217 = vector.broadcast %210 : vector<16x1xf32> to vector<16x128xf32>
    %218 = arith.cmpf oeq, %198, %217 : vector<16x128xf32>
    %c128_i32_62 = arith.constant 128 : i32
    %219 = vector.broadcast %c128_i32_62 : i32 to vector<16x128xi32>
    %220 = arith.select %218, %22, %219 : vector<16x128xi1>, vector<16x128xi32>
    %cst_63 = arith.constant dense<2147483647> : vector<16xi32>
    %221 = vector.multi_reduction <minsi>, %220, %cst_63 [1] : vector<16x128xi32> to vector<16xi32>
    %222 = vector.shape_cast %221 : vector<16xi32> to vector<16x1xi32>
    %223 = vector.broadcast %210 : vector<16x1xf32> to vector<16x128xf32>
    %224 = arith.cmpf oeq, %205, %223 : vector<16x128xf32>
    %c128_i32_64 = arith.constant 128 : i32
    %225 = vector.broadcast %c128_i32_64 : i32 to vector<16x128xi32>
    %226 = arith.select %224, %23, %225 : vector<16x128xi1>, vector<16x128xi32>
    %cst_65 = arith.constant dense<2147483647> : vector<16xi32>
    %227 = vector.multi_reduction <minsi>, %226, %cst_65 [1] : vector<16x128xi32> to vector<16xi32>
    %228 = vector.shape_cast %227 : vector<16xi32> to vector<16x1xi32>
    %229 = vector.broadcast %222 : vector<16x1xi32> to vector<16x128xi32>
    %230 = arith.cmpi eq, %22, %229 : vector<16x128xi32>
    %231 = vector.broadcast %216 : vector<16x1xi1> to vector<16x128xi1>
    %232 = arith.andi %231, %230 : vector<16x128xi1>
    %cst_66 = arith.constant 0xFF800000 : f32
    %233 = vector.broadcast %cst_66 : f32 to vector<16x128xf32>
    %234 = arith.select %232, %233, %198 : vector<16x128xi1>, vector<16x128xf32>
    %cst_67 = arith.constant dense<true> : vector<16x1xi1>
    %235 = arith.xori %216, %cst_67 : vector<16x1xi1>
    %236 = vector.broadcast %228 : vector<16x1xi32> to vector<16x128xi32>
    %237 = arith.cmpi eq, %23, %236 : vector<16x128xi32>
    %238 = vector.broadcast %235 : vector<16x1xi1> to vector<16x128xi1>
    %239 = arith.andi %238, %237 : vector<16x128xi1>
    %cst_68 = arith.constant 0xFF800000 : f32
    %240 = vector.broadcast %cst_68 : f32 to vector<16x128xf32>
    %241 = arith.select %239, %240, %205 : vector<16x128xi1>, vector<16x128xf32>
    %cst_69 = arith.constant dense<0xFF800000> : vector<16xf32>
    %242 = vector.multi_reduction <maximumf>, %234, %cst_69 [1] : vector<16x128xf32> to vector<16xf32>
    %243 = vector.shape_cast %242 : vector<16xf32> to vector<16x1xf32>
    %cst_70 = arith.constant dense<0xFF800000> : vector<16xf32>
    %244 = vector.multi_reduction <maximumf>, %241, %cst_70 [1] : vector<16x128xf32> to vector<16xf32>
    %245 = vector.shape_cast %244 : vector<16xf32> to vector<16x1xf32>
    %246 = arith.maximumf %243, %245 : vector<16x1xf32>
    %c6_i32 = arith.constant 6 : i32
    %247 = vector.broadcast %c6_i32 : i32 to vector<16x128xi32>
    %248 = arith.cmpi eq, %22, %247 : vector<16x128xi32>
    %249 = vector.shape_cast %246 : vector<16x1xf32> to vector<16x1xf32>
    %250 = vector.broadcast %249 : vector<16x1xf32> to vector<16x128xf32>
    %251 = arith.select %248, %250, %215 : vector<16x128xi1>, vector<16x128xf32>
    %252 = arith.cmpf oge, %243, %245 : vector<16x1xf32>
    %253 = vector.broadcast %246 : vector<16x1xf32> to vector<16x128xf32>
    %254 = arith.cmpf oeq, %234, %253 : vector<16x128xf32>
    %c128_i32_71 = arith.constant 128 : i32
    %255 = vector.broadcast %c128_i32_71 : i32 to vector<16x128xi32>
    %256 = arith.select %254, %22, %255 : vector<16x128xi1>, vector<16x128xi32>
    %cst_72 = arith.constant dense<2147483647> : vector<16xi32>
    %257 = vector.multi_reduction <minsi>, %256, %cst_72 [1] : vector<16x128xi32> to vector<16xi32>
    %258 = vector.shape_cast %257 : vector<16xi32> to vector<16x1xi32>
    %259 = vector.broadcast %246 : vector<16x1xf32> to vector<16x128xf32>
    %260 = arith.cmpf oeq, %241, %259 : vector<16x128xf32>
    %c128_i32_73 = arith.constant 128 : i32
    %261 = vector.broadcast %c128_i32_73 : i32 to vector<16x128xi32>
    %262 = arith.select %260, %23, %261 : vector<16x128xi1>, vector<16x128xi32>
    %cst_74 = arith.constant dense<2147483647> : vector<16xi32>
    %263 = vector.multi_reduction <minsi>, %262, %cst_74 [1] : vector<16x128xi32> to vector<16xi32>
    %264 = vector.shape_cast %263 : vector<16xi32> to vector<16x1xi32>
    %265 = vector.broadcast %258 : vector<16x1xi32> to vector<16x128xi32>
    %266 = arith.cmpi eq, %22, %265 : vector<16x128xi32>
    %267 = vector.broadcast %252 : vector<16x1xi1> to vector<16x128xi1>
    %268 = arith.andi %267, %266 : vector<16x128xi1>
    %cst_75 = arith.constant 0xFF800000 : f32
    %269 = vector.broadcast %cst_75 : f32 to vector<16x128xf32>
    %270 = arith.select %268, %269, %234 : vector<16x128xi1>, vector<16x128xf32>
    %cst_76 = arith.constant dense<true> : vector<16x1xi1>
    %271 = arith.xori %252, %cst_76 : vector<16x1xi1>
    %272 = vector.broadcast %264 : vector<16x1xi32> to vector<16x128xi32>
    %273 = arith.cmpi eq, %23, %272 : vector<16x128xi32>
    %274 = vector.broadcast %271 : vector<16x1xi1> to vector<16x128xi1>
    %275 = arith.andi %274, %273 : vector<16x128xi1>
    %cst_77 = arith.constant 0xFF800000 : f32
    %276 = vector.broadcast %cst_77 : f32 to vector<16x128xf32>
    %277 = arith.select %275, %276, %241 : vector<16x128xi1>, vector<16x128xf32>
    %cst_78 = arith.constant dense<0xFF800000> : vector<16xf32>
    %278 = vector.multi_reduction <maximumf>, %270, %cst_78 [1] : vector<16x128xf32> to vector<16xf32>
    %279 = vector.shape_cast %278 : vector<16xf32> to vector<16x1xf32>
    %cst_79 = arith.constant dense<0xFF800000> : vector<16xf32>
    %280 = vector.multi_reduction <maximumf>, %277, %cst_79 [1] : vector<16x128xf32> to vector<16xf32>
    %281 = vector.shape_cast %280 : vector<16xf32> to vector<16x1xf32>
    %282 = arith.maximumf %279, %281 : vector<16x1xf32>
    %c7_i32 = arith.constant 7 : i32
    %283 = vector.broadcast %c7_i32 : i32 to vector<16x128xi32>
    %284 = arith.cmpi eq, %22, %283 : vector<16x128xi32>
    %285 = vector.shape_cast %282 : vector<16x1xf32> to vector<16x1xf32>
    %286 = vector.broadcast %285 : vector<16x1xf32> to vector<16x128xf32>
    %287 = arith.select %284, %286, %251 : vector<16x128xi1>, vector<16x128xf32>
    %288 = arith.cmpf oge, %279, %281 : vector<16x1xf32>
    %289 = vector.broadcast %282 : vector<16x1xf32> to vector<16x128xf32>
    %290 = arith.cmpf oeq, %270, %289 : vector<16x128xf32>
    %c128_i32_80 = arith.constant 128 : i32
    %291 = vector.broadcast %c128_i32_80 : i32 to vector<16x128xi32>
    %292 = arith.select %290, %22, %291 : vector<16x128xi1>, vector<16x128xi32>
    %cst_81 = arith.constant dense<2147483647> : vector<16xi32>
    %293 = vector.multi_reduction <minsi>, %292, %cst_81 [1] : vector<16x128xi32> to vector<16xi32>
    %294 = vector.shape_cast %293 : vector<16xi32> to vector<16x1xi32>
    %295 = vector.broadcast %282 : vector<16x1xf32> to vector<16x128xf32>
    %296 = arith.cmpf oeq, %277, %295 : vector<16x128xf32>
    %c128_i32_82 = arith.constant 128 : i32
    %297 = vector.broadcast %c128_i32_82 : i32 to vector<16x128xi32>
    %298 = arith.select %296, %23, %297 : vector<16x128xi1>, vector<16x128xi32>
    %cst_83 = arith.constant dense<2147483647> : vector<16xi32>
    %299 = vector.multi_reduction <minsi>, %298, %cst_83 [1] : vector<16x128xi32> to vector<16xi32>
    %300 = vector.shape_cast %299 : vector<16xi32> to vector<16x1xi32>
    %301 = vector.broadcast %294 : vector<16x1xi32> to vector<16x128xi32>
    %302 = arith.cmpi eq, %22, %301 : vector<16x128xi32>
    %303 = vector.broadcast %288 : vector<16x1xi1> to vector<16x128xi1>
    %304 = arith.andi %303, %302 : vector<16x128xi1>
    %cst_84 = arith.constant 0xFF800000 : f32
    %305 = vector.broadcast %cst_84 : f32 to vector<16x128xf32>
    %306 = arith.select %304, %305, %270 : vector<16x128xi1>, vector<16x128xf32>
    %cst_85 = arith.constant dense<true> : vector<16x1xi1>
    %307 = arith.xori %288, %cst_85 : vector<16x1xi1>
    %308 = vector.broadcast %300 : vector<16x1xi32> to vector<16x128xi32>
    %309 = arith.cmpi eq, %23, %308 : vector<16x128xi32>
    %310 = vector.broadcast %307 : vector<16x1xi1> to vector<16x128xi1>
    %311 = arith.andi %310, %309 : vector<16x128xi1>
    %cst_86 = arith.constant 0xFF800000 : f32
    %312 = vector.broadcast %cst_86 : f32 to vector<16x128xf32>
    %313 = arith.select %311, %312, %277 : vector<16x128xi1>, vector<16x128xf32>
    %cst_87 = arith.constant dense<0xFF800000> : vector<16xf32>
    %314 = vector.multi_reduction <maximumf>, %306, %cst_87 [1] : vector<16x128xf32> to vector<16xf32>
    %315 = vector.shape_cast %314 : vector<16xf32> to vector<16x1xf32>
    %cst_88 = arith.constant dense<0xFF800000> : vector<16xf32>
    %316 = vector.multi_reduction <maximumf>, %313, %cst_88 [1] : vector<16x128xf32> to vector<16xf32>
    %317 = vector.shape_cast %316 : vector<16xf32> to vector<16x1xf32>
    %318 = arith.maximumf %315, %317 : vector<16x1xf32>
    %c8_i32 = arith.constant 8 : i32
    %319 = vector.broadcast %c8_i32 : i32 to vector<16x128xi32>
    %320 = arith.cmpi eq, %22, %319 : vector<16x128xi32>
    %321 = vector.shape_cast %318 : vector<16x1xf32> to vector<16x1xf32>
    %322 = vector.broadcast %321 : vector<16x1xf32> to vector<16x128xf32>
    %323 = arith.select %320, %322, %287 : vector<16x128xi1>, vector<16x128xf32>
    %324 = arith.cmpf oge, %315, %317 : vector<16x1xf32>
    %325 = vector.broadcast %318 : vector<16x1xf32> to vector<16x128xf32>
    %326 = arith.cmpf oeq, %306, %325 : vector<16x128xf32>
    %c128_i32_89 = arith.constant 128 : i32
    %327 = vector.broadcast %c128_i32_89 : i32 to vector<16x128xi32>
    %328 = arith.select %326, %22, %327 : vector<16x128xi1>, vector<16x128xi32>
    %cst_90 = arith.constant dense<2147483647> : vector<16xi32>
    %329 = vector.multi_reduction <minsi>, %328, %cst_90 [1] : vector<16x128xi32> to vector<16xi32>
    %330 = vector.shape_cast %329 : vector<16xi32> to vector<16x1xi32>
    %331 = vector.broadcast %318 : vector<16x1xf32> to vector<16x128xf32>
    %332 = arith.cmpf oeq, %313, %331 : vector<16x128xf32>
    %c128_i32_91 = arith.constant 128 : i32
    %333 = vector.broadcast %c128_i32_91 : i32 to vector<16x128xi32>
    %334 = arith.select %332, %23, %333 : vector<16x128xi1>, vector<16x128xi32>
    %cst_92 = arith.constant dense<2147483647> : vector<16xi32>
    %335 = vector.multi_reduction <minsi>, %334, %cst_92 [1] : vector<16x128xi32> to vector<16xi32>
    %336 = vector.shape_cast %335 : vector<16xi32> to vector<16x1xi32>
    %337 = vector.broadcast %330 : vector<16x1xi32> to vector<16x128xi32>
    %338 = arith.cmpi eq, %22, %337 : vector<16x128xi32>
    %339 = vector.broadcast %324 : vector<16x1xi1> to vector<16x128xi1>
    %340 = arith.andi %339, %338 : vector<16x128xi1>
    %cst_93 = arith.constant 0xFF800000 : f32
    %341 = vector.broadcast %cst_93 : f32 to vector<16x128xf32>
    %342 = arith.select %340, %341, %306 : vector<16x128xi1>, vector<16x128xf32>
    %cst_94 = arith.constant dense<true> : vector<16x1xi1>
    %343 = arith.xori %324, %cst_94 : vector<16x1xi1>
    %344 = vector.broadcast %336 : vector<16x1xi32> to vector<16x128xi32>
    %345 = arith.cmpi eq, %23, %344 : vector<16x128xi32>
    %346 = vector.broadcast %343 : vector<16x1xi1> to vector<16x128xi1>
    %347 = arith.andi %346, %345 : vector<16x128xi1>
    %cst_95 = arith.constant 0xFF800000 : f32
    %348 = vector.broadcast %cst_95 : f32 to vector<16x128xf32>
    %349 = arith.select %347, %348, %313 : vector<16x128xi1>, vector<16x128xf32>
    %cst_96 = arith.constant dense<0xFF800000> : vector<16xf32>
    %350 = vector.multi_reduction <maximumf>, %342, %cst_96 [1] : vector<16x128xf32> to vector<16xf32>
    %351 = vector.shape_cast %350 : vector<16xf32> to vector<16x1xf32>
    %cst_97 = arith.constant dense<0xFF800000> : vector<16xf32>
    %352 = vector.multi_reduction <maximumf>, %349, %cst_97 [1] : vector<16x128xf32> to vector<16xf32>
    %353 = vector.shape_cast %352 : vector<16xf32> to vector<16x1xf32>
    %354 = arith.maximumf %351, %353 : vector<16x1xf32>
    %c9_i32 = arith.constant 9 : i32
    %355 = vector.broadcast %c9_i32 : i32 to vector<16x128xi32>
    %356 = arith.cmpi eq, %22, %355 : vector<16x128xi32>
    %357 = vector.shape_cast %354 : vector<16x1xf32> to vector<16x1xf32>
    %358 = vector.broadcast %357 : vector<16x1xf32> to vector<16x128xf32>
    %359 = arith.select %356, %358, %323 : vector<16x128xi1>, vector<16x128xf32>
    %c0_98 = arith.constant 0 : index
    %c0_99 = arith.constant 0 : index
    %360 = vector.load %arg7[%c0_98, %c0_99] : memref<16x128xf32, #tpu.memory_space<vmem>>, vector<16x128xf32>
    tpu.vector_store %arg7[%c0_98, %c0_99], %359 {strides = array<i32>} : memref<16x128xf32, #tpu.memory_space<vmem>>, vector<16x128xf32>,
    %361 = tpu.iota {dimensions = array<i32: 1>} : vector<16x128xi32>
    %362 = tpu.iota {dimensions = array<i32: 1>} : vector<16x128xi32>
    %c0_100 = arith.constant 0 : index
    %c0_101 = arith.constant 0 : index
    %363 = vector.load %arg8[%c0_100, %c0_101] : memref<16x128xf32, #tpu.memory_space<vmem>>, vector<16x128xf32>
    %cst_102 = arith.constant 0xFF800000 : f32
    %364 = vector.broadcast %cst_102 : f32 to vector<16x128xf32>
    %cst_103 = arith.constant dense<0xFF800000> : vector<16xf32>
    %365 = vector.multi_reduction <maximumf>, %363, %cst_103 [1] : vector<16x128xf32> to vector<16xf32>
    %366 = vector.shape_cast %365 : vector<16xf32> to vector<16x1xf32>
    %cst_104 = arith.constant dense<0xFF800000> : vector<16xf32>
    %367 = vector.multi_reduction <maximumf>, %21, %cst_104 [1] : vector<16x128xf32> to vector<16xf32>
    %368 = vector.shape_cast %367 : vector<16xf32> to vector<16x1xf32>
    %369 = arith.maximumf %366, %368 : vector<16x1xf32>
    %c0_i32_105 = arith.constant 0 : i32
    %370 = vector.broadcast %c0_i32_105 : i32 to vector<16x128xi32>
    %371 = arith.cmpi eq, %361, %370 : vector<16x128xi32>
    %372 = vector.shape_cast %369 : vector<16x1xf32> to vector<16x1xf32>
    %373 = vector.broadcast %372 : vector<16x1xf32> to vector<16x128xf32>
    %374 = arith.select %371, %373, %364 : vector<16x128xi1>, vector<16x128xf32>
    %375 = arith.cmpf oge, %366, %368 : vector<16x1xf32>
    %376 = vector.broadcast %369 : vector<16x1xf32> to vector<16x128xf32>
    %377 = arith.cmpf oeq, %363, %376 : vector<16x128xf32>
    %c128_i32_106 = arith.constant 128 : i32
    %378 = vector.broadcast %c128_i32_106 : i32 to vector<16x128xi32>
    %379 = arith.select %377, %361, %378 : vector<16x128xi1>, vector<16x128xi32>
    %cst_107 = arith.constant dense<2147483647> : vector<16xi32>
    %380 = vector.multi_reduction <minsi>, %379, %cst_107 [1] : vector<16x128xi32> to vector<16xi32>
    %381 = vector.shape_cast %380 : vector<16xi32> to vector<16x1xi32>
    %382 = vector.broadcast %369 : vector<16x1xf32> to vector<16x128xf32>
    %383 = arith.cmpf oeq, %21, %382 : vector<16x128xf32>
    %c128_i32_108 = arith.constant 128 : i32
    %384 = vector.broadcast %c128_i32_108 : i32 to vector<16x128xi32>
    %385 = arith.select %383, %362, %384 : vector<16x128xi1>, vector<16x128xi32>
    %cst_109 = arith.constant dense<2147483647> : vector<16xi32>
    %386 = vector.multi_reduction <minsi>, %385, %cst_109 [1] : vector<16x128xi32> to vector<16xi32>
    %387 = vector.shape_cast %386 : vector<16xi32> to vector<16x1xi32>
    %388 = vector.broadcast %381 : vector<16x1xi32> to vector<16x128xi32>
    %389 = arith.cmpi eq, %361, %388 : vector<16x128xi32>
    %390 = vector.broadcast %375 : vector<16x1xi1> to vector<16x128xi1>
    %391 = arith.andi %390, %389 : vector<16x128xi1>
    %cst_110 = arith.constant 0xFF800000 : f32
    %392 = vector.broadcast %cst_110 : f32 to vector<16x128xf32>
    %393 = arith.select %391, %392, %363 : vector<16x128xi1>, vector<16x128xf32>
    %cst_111 = arith.constant dense<true> : vector<16x1xi1>
    %394 = arith.xori %375, %cst_111 : vector<16x1xi1>
    %395 = vector.broadcast %387 : vector<16x1xi32> to vector<16x128xi32>
    %396 = arith.cmpi eq, %362, %395 : vector<16x128xi32>
    %397 = vector.broadcast %394 : vector<16x1xi1> to vector<16x128xi1>
    %398 = arith.andi %397, %396 : vector<16x128xi1>
    %cst_112 = arith.constant 0xFF800000 : f32
    %399 = vector.broadcast %cst_112 : f32 to vector<16x128xf32>
    %400 = arith.select %398, %399, %21 : vector<16x128xi1>, vector<16x128xf32>
    %cst_113 = arith.constant dense<0xFF800000> : vector<16xf32>
    %401 = vector.multi_reduction <maximumf>, %393, %cst_113 [1] : vector<16x128xf32> to vector<16xf32>
    %402 = vector.shape_cast %401 : vector<16xf32> to vector<16x1xf32>
    %cst_114 = arith.constant dense<0xFF800000> : vector<16xf32>
    %403 = vector.multi_reduction <maximumf>, %400, %cst_114 [1] : vector<16x128xf32> to vector<16xf32>
    %404 = vector.shape_cast %403 : vector<16xf32> to vector<16x1xf32>
    %405 = arith.maximumf %402, %404 : vector<16x1xf32>
    %c1_i32_115 = arith.constant 1 : i32
    %406 = vector.broadcast %c1_i32_115 : i32 to vector<16x128xi32>
    %407 = arith.cmpi eq, %361, %406 : vector<16x128xi32>
    %408 = vector.shape_cast %405 : vector<16x1xf32> to vector<16x1xf32>
    %409 = vector.broadcast %408 : vector<16x1xf32> to vector<16x128xf32>
    %410 = arith.select %407, %409, %374 : vector<16x128xi1>, vector<16x128xf32>
    %411 = arith.cmpf oge, %402, %404 : vector<16x1xf32>
    %412 = vector.broadcast %405 : vector<16x1xf32> to vector<16x128xf32>
    %413 = arith.cmpf oeq, %393, %412 : vector<16x128xf32>
    %c128_i32_116 = arith.constant 128 : i32
    %414 = vector.broadcast %c128_i32_116 : i32 to vector<16x128xi32>
    %415 = arith.select %413, %361, %414 : vector<16x128xi1>, vector<16x128xi32>
    %cst_117 = arith.constant dense<2147483647> : vector<16xi32>
    %416 = vector.multi_reduction <minsi>, %415, %cst_117 [1] : vector<16x128xi32> to vector<16xi32>
    %417 = vector.shape_cast %416 : vector<16xi32> to vector<16x1xi32>
    %418 = vector.broadcast %405 : vector<16x1xf32> to vector<16x128xf32>
    %419 = arith.cmpf oeq, %400, %418 : vector<16x128xf32>
    %c128_i32_118 = arith.constant 128 : i32
    %420 = vector.broadcast %c128_i32_118 : i32 to vector<16x128xi32>
    %421 = arith.select %419, %362, %420 : vector<16x128xi1>, vector<16x128xi32>
    %cst_119 = arith.constant dense<2147483647> : vector<16xi32>
    %422 = vector.multi_reduction <minsi>, %421, %cst_119 [1] : vector<16x128xi32> to vector<16xi32>
    %423 = vector.shape_cast %422 : vector<16xi32> to vector<16x1xi32>
    %424 = vector.broadcast %417 : vector<16x1xi32> to vector<16x128xi32>
    %425 = arith.cmpi eq, %361, %424 : vector<16x128xi32>
    %426 = vector.broadcast %411 : vector<16x1xi1> to vector<16x128xi1>
    %427 = arith.andi %426, %425 : vector<16x128xi1>
    %cst_120 = arith.constant 0xFF800000 : f32
    %428 = vector.broadcast %cst_120 : f32 to vector<16x128xf32>
    %429 = arith.select %427, %428, %393 : vector<16x128xi1>, vector<16x128xf32>
    %cst_121 = arith.constant dense<true> : vector<16x1xi1>
    %430 = arith.xori %411, %cst_121 : vector<16x1xi1>
    %431 = vector.broadcast %423 : vector<16x1xi32> to vector<16x128xi32>
    %432 = arith.cmpi eq, %362, %431 : vector<16x128xi32>
    %433 = vector.broadcast %430 : vector<16x1xi1> to vector<16x128xi1>
    %434 = arith.andi %433, %432 : vector<16x128xi1>
    %cst_122 = arith.constant 0xFF800000 : f32
    %435 = vector.broadcast %cst_122 : f32 to vector<16x128xf32>
    %436 = arith.select %434, %435, %400 : vector<16x128xi1>, vector<16x128xf32>
    %cst_123 = arith.constant dense<0xFF800000> : vector<16xf32>
    %437 = vector.multi_reduction <maximumf>, %429, %cst_123 [1] : vector<16x128xf32> to vector<16xf32>
    %438 = vector.shape_cast %437 : vector<16xf32> to vector<16x1xf32>
    %cst_124 = arith.constant dense<0xFF800000> : vector<16xf32>
    %439 = vector.multi_reduction <maximumf>, %436, %cst_124 [1] : vector<16x128xf32> to vector<16xf32>
    %440 = vector.shape_cast %439 : vector<16xf32> to vector<16x1xf32>
    %441 = arith.maximumf %438, %440 : vector<16x1xf32>
    %c2_i32_125 = arith.constant 2 : i32
    %442 = vector.broadcast %c2_i32_125 : i32 to vector<16x128xi32>
    %443 = arith.cmpi eq, %361, %442 : vector<16x128xi32>
    %444 = vector.shape_cast %441 : vector<16x1xf32> to vector<16x1xf32>
    %445 = vector.broadcast %444 : vector<16x1xf32> to vector<16x128xf32>
    %446 = arith.select %443, %445, %410 : vector<16x128xi1>, vector<16x128xf32>
    %447 = arith.cmpf oge, %438, %440 : vector<16x1xf32>
    %448 = vector.broadcast %441 : vector<16x1xf32> to vector<16x128xf32>
    %449 = arith.cmpf oeq, %429, %448 : vector<16x128xf32>
    %c128_i32_126 = arith.constant 128 : i32
    %450 = vector.broadcast %c128_i32_126 : i32 to vector<16x128xi32>
    %451 = arith.select %449, %361, %450 : vector<16x128xi1>, vector<16x128xi32>
    %cst_127 = arith.constant dense<2147483647> : vector<16xi32>
    %452 = vector.multi_reduction <minsi>, %451, %cst_127 [1] : vector<16x128xi32> to vector<16xi32>
    %453 = vector.shape_cast %452 : vector<16xi32> to vector<16x1xi32>
    %454 = vector.broadcast %441 : vector<16x1xf32> to vector<16x128xf32>
    %455 = arith.cmpf oeq, %436, %454 : vector<16x128xf32>
    %c128_i32_128 = arith.constant 128 : i32
    %456 = vector.broadcast %c128_i32_128 : i32 to vector<16x128xi32>
    %457 = arith.select %455, %362, %456 : vector<16x128xi1>, vector<16x128xi32>
    %cst_129 = arith.constant dense<2147483647> : vector<16xi32>
    %458 = vector.multi_reduction <minsi>, %457, %cst_129 [1] : vector<16x128xi32> to vector<16xi32>
    %459 = vector.shape_cast %458 : vector<16xi32> to vector<16x1xi32>
    %460 = vector.broadcast %453 : vector<16x1xi32> to vector<16x128xi32>
    %461 = arith.cmpi eq, %361, %460 : vector<16x128xi32>
    %462 = vector.broadcast %447 : vector<16x1xi1> to vector<16x128xi1>
    %463 = arith.andi %462, %461 : vector<16x128xi1>
    %cst_130 = arith.constant 0xFF800000 : f32
    %464 = vector.broadcast %cst_130 : f32 to vector<16x128xf32>
    %465 = arith.select %463, %464, %429 : vector<16x128xi1>, vector<16x128xf32>
    %cst_131 = arith.constant dense<true> : vector<16x1xi1>
    %466 = arith.xori %447, %cst_131 : vector<16x1xi1>
    %467 = vector.broadcast %459 : vector<16x1xi32> to vector<16x128xi32>
    %468 = arith.cmpi eq, %362, %467 : vector<16x128xi32>
    %469 = vector.broadcast %466 : vector<16x1xi1> to vector<16x128xi1>
    %470 = arith.andi %469, %468 : vector<16x128xi1>
    %cst_132 = arith.constant 0xFF800000 : f32
    %471 = vector.broadcast %cst_132 : f32 to vector<16x128xf32>
    %472 = arith.select %470, %471, %436 : vector<16x128xi1>, vector<16x128xf32>
    %cst_133 = arith.constant dense<0xFF800000> : vector<16xf32>
    %473 = vector.multi_reduction <maximumf>, %465, %cst_133 [1] : vector<16x128xf32> to vector<16xf32>
    %474 = vector.shape_cast %473 : vector<16xf32> to vector<16x1xf32>
    %cst_134 = arith.constant dense<0xFF800000> : vector<16xf32>
    %475 = vector.multi_reduction <maximumf>, %472, %cst_134 [1] : vector<16x128xf32> to vector<16xf32>
    %476 = vector.shape_cast %475 : vector<16xf32> to vector<16x1xf32>
    %477 = arith.maximumf %474, %476 : vector<16x1xf32>
    %c3_i32_135 = arith.constant 3 : i32
    %478 = vector.broadcast %c3_i32_135 : i32 to vector<16x128xi32>
    %479 = arith.cmpi eq, %361, %478 : vector<16x128xi32>
    %480 = vector.shape_cast %477 : vector<16x1xf32> to vector<16x1xf32>
    %481 = vector.broadcast %480 : vector<16x1xf32> to vector<16x128xf32>
    %482 = arith.select %479, %481, %446 : vector<16x128xi1>, vector<16x128xf32>
    %483 = arith.cmpf oge, %474, %476 : vector<16x1xf32>
    %484 = vector.broadcast %477 : vector<16x1xf32> to vector<16x128xf32>
    %485 = arith.cmpf oeq, %465, %484 : vector<16x128xf32>
    %c128_i32_136 = arith.constant 128 : i32
    %486 = vector.broadcast %c128_i32_136 : i32 to vector<16x128xi32>
    %487 = arith.select %485, %361, %486 : vector<16x128xi1>, vector<16x128xi32>
    %cst_137 = arith.constant dense<2147483647> : vector<16xi32>
    %488 = vector.multi_reduction <minsi>, %487, %cst_137 [1] : vector<16x128xi32> to vector<16xi32>
    %489 = vector.shape_cast %488 : vector<16xi32> to vector<16x1xi32>
    %490 = vector.broadcast %477 : vector<16x1xf32> to vector<16x128xf32>
    %491 = arith.cmpf oeq, %472, %490 : vector<16x128xf32>
    %c128_i32_138 = arith.constant 128 : i32
    %492 = vector.broadcast %c128_i32_138 : i32 to vector<16x128xi32>
    %493 = arith.select %491, %362, %492 : vector<16x128xi1>, vector<16x128xi32>
    %cst_139 = arith.constant dense<2147483647> : vector<16xi32>
    %494 = vector.multi_reduction <minsi>, %493, %cst_139 [1] : vector<16x128xi32> to vector<16xi32>
    %495 = vector.shape_cast %494 : vector<16xi32> to vector<16x1xi32>
    %496 = vector.broadcast %489 : vector<16x1xi32> to vector<16x128xi32>
    %497 = arith.cmpi eq, %361, %496 : vector<16x128xi32>
    %498 = vector.broadcast %483 : vector<16x1xi1> to vector<16x128xi1>
    %499 = arith.andi %498, %497 : vector<16x128xi1>
    %cst_140 = arith.constant 0xFF800000 : f32
    %500 = vector.broadcast %cst_140 : f32 to vector<16x128xf32>
    %501 = arith.select %499, %500, %465 : vector<16x128xi1>, vector<16x128xf32>
    %cst_141 = arith.constant dense<true> : vector<16x1xi1>
    %502 = arith.xori %483, %cst_141 : vector<16x1xi1>
    %503 = vector.broadcast %495 : vector<16x1xi32> to vector<16x128xi32>
    %504 = arith.cmpi eq, %362, %503 : vector<16x128xi32>
    %505 = vector.broadcast %502 : vector<16x1xi1> to vector<16x128xi1>
    %506 = arith.andi %505, %504 : vector<16x128xi1>
    %cst_142 = arith.constant 0xFF800000 : f32
    %507 = vector.broadcast %cst_142 : f32 to vector<16x128xf32>
    %508 = arith.select %506, %507, %472 : vector<16x128xi1>, vector<16x128xf32>
    %cst_143 = arith.constant dense<0xFF800000> : vector<16xf32>
    %509 = vector.multi_reduction <maximumf>, %501, %cst_143 [1] : vector<16x128xf32> to vector<16xf32>
    %510 = vector.shape_cast %509 : vector<16xf32> to vector<16x1xf32>
    %cst_144 = arith.constant dense<0xFF800000> : vector<16xf32>
    %511 = vector.multi_reduction <maximumf>, %508, %cst_144 [1] : vector<16x128xf32> to vector<16xf32>
    %512 = vector.shape_cast %511 : vector<16xf32> to vector<16x1xf32>
    %513 = arith.maximumf %510, %512 : vector<16x1xf32>
    %c4_i32_145 = arith.constant 4 : i32
    %514 = vector.broadcast %c4_i32_145 : i32 to vector<16x128xi32>
    %515 = arith.cmpi eq, %361, %514 : vector<16x128xi32>
    %516 = vector.shape_cast %513 : vector<16x1xf32> to vector<16x1xf32>
    %517 = vector.broadcast %516 : vector<16x1xf32> to vector<16x128xf32>
    %518 = arith.select %515, %517, %482 : vector<16x128xi1>, vector<16x128xf32>
    %519 = arith.cmpf oge, %510, %512 : vector<16x1xf32>
    %520 = vector.broadcast %513 : vector<16x1xf32> to vector<16x128xf32>
    %521 = arith.cmpf oeq, %501, %520 : vector<16x128xf32>
    %c128_i32_146 = arith.constant 128 : i32
    %522 = vector.broadcast %c128_i32_146 : i32 to vector<16x128xi32>
    %523 = arith.select %521, %361, %522 : vector<16x128xi1>, vector<16x128xi32>
    %cst_147 = arith.constant dense<2147483647> : vector<16xi32>
    %524 = vector.multi_reduction <minsi>, %523, %cst_147 [1] : vector<16x128xi32> to vector<16xi32>
    %525 = vector.shape_cast %524 : vector<16xi32> to vector<16x1xi32>
    %526 = vector.broadcast %513 : vector<16x1xf32> to vector<16x128xf32>
    %527 = arith.cmpf oeq, %508, %526 : vector<16x128xf32>
    %c128_i32_148 = arith.constant 128 : i32
    %528 = vector.broadcast %c128_i32_148 : i32 to vector<16x128xi32>
    %529 = arith.select %527, %362, %528 : vector<16x128xi1>, vector<16x128xi32>
    %cst_149 = arith.constant dense<2147483647> : vector<16xi32>
    %530 = vector.multi_reduction <minsi>, %529, %cst_149 [1] : vector<16x128xi32> to vector<16xi32>
    %531 = vector.shape_cast %530 : vector<16xi32> to vector<16x1xi32>
    %532 = vector.broadcast %525 : vector<16x1xi32> to vector<16x128xi32>
    %533 = arith.cmpi eq, %361, %532 : vector<16x128xi32>
    %534 = vector.broadcast %519 : vector<16x1xi1> to vector<16x128xi1>
    %535 = arith.andi %534, %533 : vector<16x128xi1>
    %cst_150 = arith.constant 0xFF800000 : f32
    %536 = vector.broadcast %cst_150 : f32 to vector<16x128xf32>
    %537 = arith.select %535, %536, %501 : vector<16x128xi1>, vector<16x128xf32>
    %cst_151 = arith.constant dense<true> : vector<16x1xi1>
    %538 = arith.xori %519, %cst_151 : vector<16x1xi1>
    %539 = vector.broadcast %531 : vector<16x1xi32> to vector<16x128xi32>
    %540 = arith.cmpi eq, %362, %539 : vector<16x128xi32>
    %541 = vector.broadcast %538 : vector<16x1xi1> to vector<16x128xi1>
    %542 = arith.andi %541, %540 : vector<16x128xi1>
    %cst_152 = arith.constant 0xFF800000 : f32
    %543 = vector.broadcast %cst_152 : f32 to vector<16x128xf32>
    %544 = arith.select %542, %543, %508 : vector<16x128xi1>, vector<16x128xf32>
    %cst_153 = arith.constant dense<0xFF800000> : vector<16xf32>
    %545 = vector.multi_reduction <maximumf>, %537, %cst_153 [1] : vector<16x128xf32> to vector<16xf32>
    %546 = vector.shape_cast %545 : vector<16xf32> to vector<16x1xf32>
    %cst_154 = arith.constant dense<0xFF800000> : vector<16xf32>
    %547 = vector.multi_reduction <maximumf>, %544, %cst_154 [1] : vector<16x128xf32> to vector<16xf32>
    %548 = vector.shape_cast %547 : vector<16xf32> to vector<16x1xf32>
    %549 = arith.maximumf %546, %548 : vector<16x1xf32>
    %c5_i32_155 = arith.constant 5 : i32
    %550 = vector.broadcast %c5_i32_155 : i32 to vector<16x128xi32>
    %551 = arith.cmpi eq, %361, %550 : vector<16x128xi32>
    %552 = vector.shape_cast %549 : vector<16x1xf32> to vector<16x1xf32>
    %553 = vector.broadcast %552 : vector<16x1xf32> to vector<16x128xf32>
    %554 = arith.select %551, %553, %518 : vector<16x128xi1>, vector<16x128xf32>
    %555 = arith.cmpf oge, %546, %548 : vector<16x1xf32>
    %556 = vector.broadcast %549 : vector<16x1xf32> to vector<16x128xf32>
    %557 = arith.cmpf oeq, %537, %556 : vector<16x128xf32>
    %c128_i32_156 = arith.constant 128 : i32
    %558 = vector.broadcast %c128_i32_156 : i32 to vector<16x128xi32>
    %559 = arith.select %557, %361, %558 : vector<16x128xi1>, vector<16x128xi32>
    %cst_157 = arith.constant dense<2147483647> : vector<16xi32>
    %560 = vector.multi_reduction <minsi>, %559, %cst_157 [1] : vector<16x128xi32> to vector<16xi32>
    %561 = vector.shape_cast %560 : vector<16xi32> to vector<16x1xi32>
    %562 = vector.broadcast %549 : vector<16x1xf32> to vector<16x128xf32>
    %563 = arith.cmpf oeq, %544, %562 : vector<16x128xf32>
    %c128_i32_158 = arith.constant 128 : i32
    %564 = vector.broadcast %c128_i32_158 : i32 to vector<16x128xi32>
    %565 = arith.select %563, %362, %564 : vector<16x128xi1>, vector<16x128xi32>
    %cst_159 = arith.constant dense<2147483647> : vector<16xi32>
    %566 = vector.multi_reduction <minsi>, %565, %cst_159 [1] : vector<16x128xi32> to vector<16xi32>
    %567 = vector.shape_cast %566 : vector<16xi32> to vector<16x1xi32>
    %568 = vector.broadcast %561 : vector<16x1xi32> to vector<16x128xi32>
    %569 = arith.cmpi eq, %361, %568 : vector<16x128xi32>
    %570 = vector.broadcast %555 : vector<16x1xi1> to vector<16x128xi1>
    %571 = arith.andi %570, %569 : vector<16x128xi1>
    %cst_160 = arith.constant 0xFF800000 : f32
    %572 = vector.broadcast %cst_160 : f32 to vector<16x128xf32>
    %573 = arith.select %571, %572, %537 : vector<16x128xi1>, vector<16x128xf32>
    %cst_161 = arith.constant dense<true> : vector<16x1xi1>
    %574 = arith.xori %555, %cst_161 : vector<16x1xi1>
    %575 = vector.broadcast %567 : vector<16x1xi32> to vector<16x128xi32>
    %576 = arith.cmpi eq, %362, %575 : vector<16x128xi32>
    %577 = vector.broadcast %574 : vector<16x1xi1> to vector<16x128xi1>
    %578 = arith.andi %577, %576 : vector<16x128xi1>
    %cst_162 = arith.constant 0xFF800000 : f32
    %579 = vector.broadcast %cst_162 : f32 to vector<16x128xf32>
    %580 = arith.select %578, %579, %544 : vector<16x128xi1>, vector<16x128xf32>
    %cst_163 = arith.constant dense<0xFF800000> : vector<16xf32>
    %581 = vector.multi_reduction <maximumf>, %573, %cst_163 [1] : vector<16x128xf32> to vector<16xf32>
    %582 = vector.shape_cast %581 : vector<16xf32> to vector<16x1xf32>
    %cst_164 = arith.constant dense<0xFF800000> : vector<16xf32>
    %583 = vector.multi_reduction <maximumf>, %580, %cst_164 [1] : vector<16x128xf32> to vector<16xf32>
    %584 = vector.shape_cast %583 : vector<16xf32> to vector<16x1xf32>
    %585 = arith.maximumf %582, %584 : vector<16x1xf32>
    %c6_i32_165 = arith.constant 6 : i32
    %586 = vector.broadcast %c6_i32_165 : i32 to vector<16x128xi32>
    %587 = arith.cmpi eq, %361, %586 : vector<16x128xi32>
    %588 = vector.shape_cast %585 : vector<16x1xf32> to vector<16x1xf32>
    %589 = vector.broadcast %588 : vector<16x1xf32> to vector<16x128xf32>
    %590 = arith.select %587, %589, %554 : vector<16x128xi1>, vector<16x128xf32>
    %591 = arith.cmpf oge, %582, %584 : vector<16x1xf32>
    %592 = vector.broadcast %585 : vector<16x1xf32> to vector<16x128xf32>
    %593 = arith.cmpf oeq, %573, %592 : vector<16x128xf32>
    %c128_i32_166 = arith.constant 128 : i32
    %594 = vector.broadcast %c128_i32_166 : i32 to vector<16x128xi32>
    %595 = arith.select %593, %361, %594 : vector<16x128xi1>, vector<16x128xi32>
    %cst_167 = arith.constant dense<2147483647> : vector<16xi32>
    %596 = vector.multi_reduction <minsi>, %595, %cst_167 [1] : vector<16x128xi32> to vector<16xi32>
    %597 = vector.shape_cast %596 : vector<16xi32> to vector<16x1xi32>
    %598 = vector.broadcast %585 : vector<16x1xf32> to vector<16x128xf32>
    %599 = arith.cmpf oeq, %580, %598 : vector<16x128xf32>
    %c128_i32_168 = arith.constant 128 : i32
    %600 = vector.broadcast %c128_i32_168 : i32 to vector<16x128xi32>
    %601 = arith.select %599, %362, %600 : vector<16x128xi1>, vector<16x128xi32>
    %cst_169 = arith.constant dense<2147483647> : vector<16xi32>
    %602 = vector.multi_reduction <minsi>, %601, %cst_169 [1] : vector<16x128xi32> to vector<16xi32>
    %603 = vector.shape_cast %602 : vector<16xi32> to vector<16x1xi32>
    %604 = vector.broadcast %597 : vector<16x1xi32> to vector<16x128xi32>
    %605 = arith.cmpi eq, %361, %604 : vector<16x128xi32>
    %606 = vector.broadcast %591 : vector<16x1xi1> to vector<16x128xi1>
    %607 = arith.andi %606, %605 : vector<16x128xi1>
    %cst_170 = arith.constant 0xFF800000 : f32
    %608 = vector.broadcast %cst_170 : f32 to vector<16x128xf32>
    %609 = arith.select %607, %608, %573 : vector<16x128xi1>, vector<16x128xf32>
    %cst_171 = arith.constant dense<true> : vector<16x1xi1>
    %610 = arith.xori %591, %cst_171 : vector<16x1xi1>
    %611 = vector.broadcast %603 : vector<16x1xi32> to vector<16x128xi32>
    %612 = arith.cmpi eq, %362, %611 : vector<16x128xi32>
    %613 = vector.broadcast %610 : vector<16x1xi1> to vector<16x128xi1>
    %614 = arith.andi %613, %612 : vector<16x128xi1>
    %cst_172 = arith.constant 0xFF800000 : f32
    %615 = vector.broadcast %cst_172 : f32 to vector<16x128xf32>
    %616 = arith.select %614, %615, %580 : vector<16x128xi1>, vector<16x128xf32>
    %cst_173 = arith.constant dense<0xFF800000> : vector<16xf32>
    %617 = vector.multi_reduction <maximumf>, %609, %cst_173 [1] : vector<16x128xf32> to vector<16xf32>
    %618 = vector.shape_cast %617 : vector<16xf32> to vector<16x1xf32>
    %cst_174 = arith.constant dense<0xFF800000> : vector<16xf32>
    %619 = vector.multi_reduction <maximumf>, %616, %cst_174 [1] : vector<16x128xf32> to vector<16xf32>
    %620 = vector.shape_cast %619 : vector<16xf32> to vector<16x1xf32>
    %621 = arith.maximumf %618, %620 : vector<16x1xf32>
    %c7_i32_175 = arith.constant 7 : i32
    %622 = vector.broadcast %c7_i32_175 : i32 to vector<16x128xi32>
    %623 = arith.cmpi eq, %361, %622 : vector<16x128xi32>
    %624 = vector.shape_cast %621 : vector<16x1xf32> to vector<16x1xf32>
    %625 = vector.broadcast %624 : vector<16x1xf32> to vector<16x128xf32>
    %626 = arith.select %623, %625, %590 : vector<16x128xi1>, vector<16x128xf32>
    %627 = arith.cmpf oge, %618, %620 : vector<16x1xf32>
    %628 = vector.broadcast %621 : vector<16x1xf32> to vector<16x128xf32>
    %629 = arith.cmpf oeq, %609, %628 : vector<16x128xf32>
    %c128_i32_176 = arith.constant 128 : i32
    %630 = vector.broadcast %c128_i32_176 : i32 to vector<16x128xi32>
    %631 = arith.select %629, %361, %630 : vector<16x128xi1>, vector<16x128xi32>
    %cst_177 = arith.constant dense<2147483647> : vector<16xi32>
    %632 = vector.multi_reduction <minsi>, %631, %cst_177 [1] : vector<16x128xi32> to vector<16xi32>
    %633 = vector.shape_cast %632 : vector<16xi32> to vector<16x1xi32>
    %634 = vector.broadcast %621 : vector<16x1xf32> to vector<16x128xf32>
    %635 = arith.cmpf oeq, %616, %634 : vector<16x128xf32>
    %c128_i32_178 = arith.constant 128 : i32
    %636 = vector.broadcast %c128_i32_178 : i32 to vector<16x128xi32>
    %637 = arith.select %635, %362, %636 : vector<16x128xi1>, vector<16x128xi32>
    %cst_179 = arith.constant dense<2147483647> : vector<16xi32>
    %638 = vector.multi_reduction <minsi>, %637, %cst_179 [1] : vector<16x128xi32> to vector<16xi32>
    %639 = vector.shape_cast %638 : vector<16xi32> to vector<16x1xi32>
    %640 = vector.broadcast %633 : vector<16x1xi32> to vector<16x128xi32>
    %641 = arith.cmpi eq, %361, %640 : vector<16x128xi32>
    %642 = vector.broadcast %627 : vector<16x1xi1> to vector<16x128xi1>
    %643 = arith.andi %642, %641 : vector<16x128xi1>
    %cst_180 = arith.constant 0xFF800000 : f32
    %644 = vector.broadcast %cst_180 : f32 to vector<16x128xf32>
    %645 = arith.select %643, %644, %609 : vector<16x128xi1>, vector<16x128xf32>
    %cst_181 = arith.constant dense<true> : vector<16x1xi1>
    %646 = arith.xori %627, %cst_181 : vector<16x1xi1>
    %647 = vector.broadcast %639 : vector<16x1xi32> to vector<16x128xi32>
    %648 = arith.cmpi eq, %362, %647 : vector<16x128xi32>
    %649 = vector.broadcast %646 : vector<16x1xi1> to vector<16x128xi1>
    %650 = arith.andi %649, %648 : vector<16x128xi1>
    %cst_182 = arith.constant 0xFF800000 : f32
    %651 = vector.broadcast %cst_182 : f32 to vector<16x128xf32>
    %652 = arith.select %650, %651, %616 : vector<16x128xi1>, vector<16x128xf32>
    %cst_183 = arith.constant dense<0xFF800000> : vector<16xf32>
    %653 = vector.multi_reduction <maximumf>, %645, %cst_183 [1] : vector<16x128xf32> to vector<16xf32>
    %654 = vector.shape_cast %653 : vector<16xf32> to vector<16x1xf32>
    %cst_184 = arith.constant dense<0xFF800000> : vector<16xf32>
    %655 = vector.multi_reduction <maximumf>, %652, %cst_184 [1] : vector<16x128xf32> to vector<16xf32>
    %656 = vector.shape_cast %655 : vector<16xf32> to vector<16x1xf32>
    %657 = arith.maximumf %654, %656 : vector<16x1xf32>
    %c8_i32_185 = arith.constant 8 : i32
    %658 = vector.broadcast %c8_i32_185 : i32 to vector<16x128xi32>
    %659 = arith.cmpi eq, %361, %658 : vector<16x128xi32>
    %660 = vector.shape_cast %657 : vector<16x1xf32> to vector<16x1xf32>
    %661 = vector.broadcast %660 : vector<16x1xf32> to vector<16x128xf32>
    %662 = arith.select %659, %661, %626 : vector<16x128xi1>, vector<16x128xf32>
    %663 = arith.cmpf oge, %654, %656 : vector<16x1xf32>
    %664 = vector.broadcast %657 : vector<16x1xf32> to vector<16x128xf32>
    %665 = arith.cmpf oeq, %645, %664 : vector<16x128xf32>
    %c128_i32_186 = arith.constant 128 : i32
    %666 = vector.broadcast %c128_i32_186 : i32 to vector<16x128xi32>
    %667 = arith.select %665, %361, %666 : vector<16x128xi1>, vector<16x128xi32>
    %cst_187 = arith.constant dense<2147483647> : vector<16xi32>
    %668 = vector.multi_reduction <minsi>, %667, %cst_187 [1] : vector<16x128xi32> to vector<16xi32>
    %669 = vector.shape_cast %668 : vector<16xi32> to vector<16x1xi32>
    %670 = vector.broadcast %657 : vector<16x1xf32> to vector<16x128xf32>
    %671 = arith.cmpf oeq, %652, %670 : vector<16x128xf32>
    %c128_i32_188 = arith.constant 128 : i32
    %672 = vector.broadcast %c128_i32_188 : i32 to vector<16x128xi32>
    %673 = arith.select %671, %362, %672 : vector<16x128xi1>, vector<16x128xi32>
    %cst_189 = arith.constant dense<2147483647> : vector<16xi32>
    %674 = vector.multi_reduction <minsi>, %673, %cst_189 [1] : vector<16x128xi32> to vector<16xi32>
    %675 = vector.shape_cast %674 : vector<16xi32> to vector<16x1xi32>
    %676 = vector.broadcast %669 : vector<16x1xi32> to vector<16x128xi32>
    %677 = arith.cmpi eq, %361, %676 : vector<16x128xi32>
    %678 = vector.broadcast %663 : vector<16x1xi1> to vector<16x128xi1>
    %679 = arith.andi %678, %677 : vector<16x128xi1>
    %cst_190 = arith.constant 0xFF800000 : f32
    %680 = vector.broadcast %cst_190 : f32 to vector<16x128xf32>
    %681 = arith.select %679, %680, %645 : vector<16x128xi1>, vector<16x128xf32>
    %cst_191 = arith.constant dense<true> : vector<16x1xi1>
    %682 = arith.xori %663, %cst_191 : vector<16x1xi1>
    %683 = vector.broadcast %675 : vector<16x1xi32> to vector<16x128xi32>
    %684 = arith.cmpi eq, %362, %683 : vector<16x128xi32>
    %685 = vector.broadcast %682 : vector<16x1xi1> to vector<16x128xi1>
    %686 = arith.andi %685, %684 : vector<16x128xi1>
    %cst_192 = arith.constant 0xFF800000 : f32
    %687 = vector.broadcast %cst_192 : f32 to vector<16x128xf32>
    %688 = arith.select %686, %687, %652 : vector<16x128xi1>, vector<16x128xf32>
    %cst_193 = arith.constant dense<0xFF800000> : vector<16xf32>
    %689 = vector.multi_reduction <maximumf>, %681, %cst_193 [1] : vector<16x128xf32> to vector<16xf32>
    %690 = vector.shape_cast %689 : vector<16xf32> to vector<16x1xf32>
    %cst_194 = arith.constant dense<0xFF800000> : vector<16xf32>
    %691 = vector.multi_reduction <maximumf>, %688, %cst_194 [1] : vector<16x128xf32> to vector<16xf32>
    %692 = vector.shape_cast %691 : vector<16xf32> to vector<16x1xf32>
    %693 = arith.maximumf %690, %692 : vector<16x1xf32>
    %c9_i32_195 = arith.constant 9 : i32
    %694 = vector.broadcast %c9_i32_195 : i32 to vector<16x128xi32>
    %695 = arith.cmpi eq, %361, %694 : vector<16x128xi32>
    %696 = vector.shape_cast %693 : vector<16x1xf32> to vector<16x1xf32>
    %697 = vector.broadcast %696 : vector<16x1xf32> to vector<16x128xf32>
    %698 = arith.select %695, %697, %662 : vector<16x128xi1>, vector<16x128xf32>
    %c0_196 = arith.constant 0 : index
    %c0_197 = arith.constant 0 : index
    %699 = vector.load %arg8[%c0_196, %c0_197] : memref<16x128xf32, #tpu.memory_space<vmem>>, vector<16x128xf32>
    tpu.vector_store %arg8[%c0_196, %c0_197], %698 {strides = array<i32>} : memref<16x128xf32, #tpu.memory_space<vmem>>, vector<16x128xf32>,
    %c2_i32_198 = arith.constant 2 : i32
    %700 = arith.cmpi eq, %arg1, %c2_i32_198 : i32
    %701 = arith.extui %700 : i1 to i32
    %c0_i32_199 = arith.constant 0 : i32
    %702 = arith.cmpi ne, %701, %c0_i32_199 : i32
    scf.if %702 {
      %703 = tpu.iota {dimensions = array<i32: 1>} : vector<16x128xi32>
      %c10_i32 = arith.constant 10 : i32
      %704 = vector.broadcast %c10_i32 : i32 to vector<16x128xi32>
      %705 = arith.cmpi slt, %703, %704 : vector<16x128xi32>
      %c0_200 = arith.constant 0 : index
      %c0_201 = arith.constant 0 : index
      %706 = vector.load %arg7[%c0_200, %c0_201] : memref<16x128xf32, #tpu.memory_space<vmem>>, vector<16x128xf32>
      %c0_202 = arith.constant 0 : index
      %c0_203 = arith.constant 0 : index
      %707 = vector.load %arg8[%c0_202, %c0_203] : memref<16x128xf32, #tpu.memory_space<vmem>>, vector<16x128xf32>
      %cst_204 = arith.constant 0xFF800000 : f32
      %708 = vector.broadcast %cst_204 : f32 to vector<16x128xf32>
      %709 = arith.cmpf one, %706, %708 : vector<16x128xf32>
      %710 = arith.andi %705, %709 : vector<16x128xi1>
      %cst_205 = arith.constant 0.000000e+00 : f32
      %711 = vector.broadcast %cst_205 : f32 to vector<16x128xf32>
      %712 = arith.select %710, %706, %711 : vector<16x128xi1>, vector<16x128xf32>
      %713 = vector.shape_cast %712 : vector<16x128xf32> to vector<1x16x128xf32>
      %cst_206 = arith.constant dense<0.000000e+00> : vector<1xf32>
      %714 = vector.multi_reduction <add>, %713, %cst_206 [1, 2] : vector<1x16x128xf32> to vector<1xf32>
      %715 = vector.shape_cast %714 : vector<1xf32> to vector<1x1x1xf32>
      %716 = vector.extract %715[0, 0, 0] : f32 from vector<1x1x1xf32>
      %cst_207 = arith.constant 0xFF800000 : f32
      %717 = vector.broadcast %cst_207 : f32 to vector<16x128xf32>
      %718 = arith.cmpf one, %707, %717 : vector<16x128xf32>
      %719 = arith.andi %705, %718 : vector<16x128xi1>
      %cst_208 = arith.constant 0.000000e+00 : f32
      %720 = vector.broadcast %cst_208 : f32 to vector<16x128xf32>
      %721 = arith.select %719, %707, %720 : vector<16x128xi1>, vector<16x128xf32>
      %722 = vector.shape_cast %721 : vector<16x128xf32> to vector<1x16x128xf32>
      %cst_209 = arith.constant dense<0.000000e+00> : vector<1xf32>
      %723 = vector.multi_reduction <add>, %722, %cst_209 [1, 2] : vector<1x16x128xf32> to vector<1xf32>
      %724 = vector.shape_cast %723 : vector<1xf32> to vector<1x1x1xf32>
      %725 = vector.extract %724[0, 0, 0] : f32 from vector<1x1x1xf32>
      %cst_210 = arith.constant 0.000000e+00 : f32
      %726 = vector.broadcast %cst_210 : f32 to vector<1x8x128xf32>
      %727 = arith.addf %716, %725 : f32
      %728 = vector.broadcast %727 : f32 to vector<1x8x128xf32>
      %729 = arith.addf %726, %728 : vector<1x8x128xf32>
      %c0_211 = arith.constant 0 : index
      %c0_212 = arith.constant 0 : index
      %c0_213 = arith.constant 0 : index
      %730 = vector.load %arg6[%c0_211, %c0_212, %c0_213] : memref<1x8x128xf32, #tpu.memory_space<vmem>>, vector<1x8x128xf32>
      tpu.vector_store %arg6[%c0_211, %c0_212, %c0_213], %729 {strides = array<i32>} : memref<1x8x128xf32, #tpu.memory_space<vmem>>, vector<1x8x128xf32>,
    } else {
    }
    return
  }
  func.func @transform_0(%arg0: i32, %arg1: i32) -> (i32, i32) {
    %c0_i32 = arith.constant 0 : i32
    %c0_i32_0 = arith.constant 0 : i32
    return %arg0, %c0_i32 : i32, i32
  }
  func.func @transform_1(%arg0: i32, %arg1: i32) -> (i32, i32) {
    %c0_i32 = arith.constant 0 : i32
    %c0_i32_0 = arith.constant 0 : i32
    return %arg0, %c0_i32 : i32, i32
  }
  func.func @transform_2(%arg0: i32, %arg1: i32) -> (i32, i32) {
    %c0_i32 = arith.constant 0 : i32
    %c0_i32_0 = arith.constant 0 : i32
    return %c0_i32, %arg1 : i32, i32
  }
  func.func @transform_3(%arg0: i32, %arg1: i32) -> (i32, i32) {
    %c0_i32 = arith.constant 0 : i32
    %c0_i32_0 = arith.constant 0 : i32
    return %c0_i32, %arg1 : i32, i32
  }
  func.func @transform_4(%arg0: i32, %arg1: i32) -> (i32, i32, i32) {
    %c0_i32 = arith.constant 0 : i32
    %c0_i32_0 = arith.constant 0 : i32
    %c0_i32_1 = arith.constant 0 : i32
    return %arg0, %c0_i32, %c0_i32_0 : i32, i32, i32
  }
}

</mosaic_0001>

<bundles_post_ra>
// kernel: tpu_custom_call.1
= control target key start
LH: loop header
LB: loop body
LE: loop exit
PB: predicated region body
PF: predicated region fallthrough
CT: control target
= control target key end

     0   :  { %s4597_s0 = inlined_call_operand.hbm [shape: f32[48,128], index: 0, kind: input, shape index: {}]   ;;  %s4598_s1 = inlined_call_operand.hbm [shape: f32[48,128], index: 1, kind: input, shape index: {}]   ;;  %s4599_s2 = inlined_call_operand.hbm [shape: f32[128,384], index: 2, kind: input, shape index: {}]   ;;  %s4600_s3 = inlined_call_operand.hbm [shape: f32[128,384], index: 3, kind: input, shape index: {}]   ;;  %s4601_s4 = inlined_call_operand.hbm [shape: f32[3,8,128], index: 4, kind: output, shape index: {}]  }
   0x1   :  { %4615 = sst [smem:[#allocation30_spill]] %s4598_s1 }
   0x2   :  { %4616 = sst [smem:[#allocation31_spill]] %s4601_s4 }
   0x3   :  { %9 = vsyncpa [#allocation5], 0 }
   0x4   :  { %11 = vsyncpa [#allocation5 + $0x1], 0 }
   0x5   :  { %12 = vsyncpa [#allocation8], 0 }
   0x6   :  { %14 = vsyncpa [#allocation8 + $0x1], 0 }
   0x7   :  { %15 = vsyncpa [#allocation11], 0 }
   0x8   :  { %17 = vsyncpa [#allocation11 + $0x1], 0 }
   0x9   :  { %18 = vsyncpa [#allocation6], 0 }
   0xa   :  { %20 = vsyncpa [#allocation6 + $0x1], 0  ;;  %s2975_s15 = smov 0   ;;  %s2977_s16 = smov 0  }
   0xb   :  { %s2979_s17 = smov 0   ;;  %s2981_s18 = smov 0  }
   0xc   :  { %s2983_s19 = smov 0   ;;  %s2985_s20 = smov 0  }
   0xd   :  { %s2987_s21 = smov 0   ;;  %s2989_s22 = smov 0  }
   0xe   :  { %s2991_s23 = smov 0   ;;  %s2993_s24 = smov 0  }
   0xf   :  { %s2995_s25 = smov 0  }
  0x10 LB: > { %4617 = sst [smem:[#allocation18_spill]] %s2914_s18  ;;  %s3031_s26 = sadd.s32 4294967295, %s2942_s25   ;;  %s2942_s25 = sphi %s2995_s25, %s26_s25   ;;  %s2938_s24 = sphi %s2993_s24, %s4654_s24   ;;  %s2934_s23 = sphi %s2991_s23, %s4661_s23   ;;  %s2930_s22 = sphi %s2989_s22, %s4652_s22   ;;  %s2926_s21 = sphi %s2987_s21, %s4660_s21   ;;  %s2922_s20 = sphi %s2985_s20, %s4651_s20   ;;  %s2918_s19 = sphi %s2983_s19, %s4659_s19   ;;  %s2914_s18 = sphi %s2981_s18, %s4658_s18   ;;  %s2910_s17 = sphi %s2979_s17, %s4657_s17   ;;  %s2906_s16 = sphi %s2977_s16, %s4656_s16   ;;  %s2902_s15 = sphi %s2975_s15, %s4655_s15  }
  0x11   : > { %4618 = sst [smem:[#allocation19_spill]] %s2922_s20  ;;  %s2501_s27 = sadd.s32 4294967294, %s2942_s25  }
  0x12   : > { %4619 = sst [smem:[#allocation20_spill]] %s2926_s21  ;;  %s35_s28 = sadd.s32 1, %s2934_s23 }
  0x13   : > { %4620 = sst [smem:[#allocation21_spill]] %s2930_s22  ;;  %s38_s29 = sadd.s32 1, %s2938_s24 }
  0x14   : > { %4621 = sst [smem:[#allocation22_spill]] %s2938_s24  ;;  %p36_p0 = scmp.ge.s32.totalorder %s35_s28, 3 }
  0x15   : > { %4622 = sst [smem:[#allocation23_spill]] %s2942_s25  ;;  %s45_s30 = sadd.s32 1, %s2922_s20 }
  0x16   : > { %p52_p1 = scmp.ne.s32.totalorder %s2922_s20, %s2918_s19  ;;  %p53_p2 = scmp.eq.s32.totalorder %s2942_s25, 0 }
  0x17   : > { %s4663_s28 = smov (%p36_p0, %s35_s28), 0  ;;  %s4665_s29 = smov (!%p36_p0, %s38_s29), %s2938_s24 }
  0x18   : > { %4623 = sst [smem:[#allocation24_spill]] %s4663_s28  ;;  %p3048_p3 = por %p53_p2, %p52_p1 }
  0x19   : > { %p4602_p4 = scmp.ne.s32.totalorder %s2918_s19, %s2914_s18  ;;  %p40_p5 = scmp.ge.s32.totalorder %s4665_s29, 3 }
  0x1a   : > { %p59_p6 = scmp.eq.s32.totalorder %s3031_s26, 0  ;;  %s94_s6 = ssub.s32 %s2934_s23, %s4663_s28 }
  0x1b   : > { %s97_s7 = sadd.s32 1, %s2910_s17  ;;  %s4667_s29 = smov (%p40_p5, %s4665_s29), 0 }
  0x1c   : > { %4625 = sst [smem:[#allocation25_spill]] %s4667_s29  ;;  %p3065_p7 = por %p59_p6, %p4602_p4 }
  0x1d   : > { %p95_p8 = scmp.eq.s32.totalorder %s94_s6, 0  ;;  %s42_s9 = ssub.s32 %s2938_s24, %s4667_s29 }
  0x1e   : > { %p104_p9 = scmp.ne.s32.totalorder %s2910_s17, %s2906_s16  ;;  %p43_p10 = scmp.eq.s32.totalorder %s42_s9, 0 }
  0x1f   : > { %p110_p11 = scmp.ne.s32.totalorder %s2906_s16, %s2902_s15  ;;  %p160_p0 = scmp.eq.s32.totalorder %s3031_s26, 8 }
  0x20   : > { %s3076_s10 = scalar_select %p95_p8, %s2910_s17, %s97_s7  }
  0x21   : > { %s3079_s11 = scalar_select %p43_p10, %s2922_s20, %s45_s30  }
  0x22   : > { %4627 = sst [smem:[#allocation26_spill]] %s3076_s10  ;;  %p3083_p12 = por %p104_p9, %p53_p2 }
  0x23   : > { %4628 = sst [smem:[#allocation27_spill]] %s3079_s11  ;;  %p3089_p13 = por %p110_p11, %p59_p6 }
  0x24   : > { %p166_p5 = scmp.eq.s32.totalorder %s2501_s27, 8  ;;  %p2592_p4 = scmp.lt.s32.totalorder %s2942_s25, 9 }
  0x25   : > { %p3098_p8 = por %p160_p0, %p52_p1  ;;  %p4633_p10 = scmp.ne.s32.totalorder %s2918_s19, %s2914_s18 }
  0x26   : > { %s186_s30 = sand.u32 1, %s2922_s20   ;;  %s2527_s6 = sshll.u32 %s2938_s24, 4 }
  0x27   : > { %s4631_s14 = scalar_select %p3098_p8, 1, 0 }
  0x28   : > { %p3105_p2 = por %p166_p5, %p4633_p10  ;;  %s2504_s7 = sshll.u32 %s186_s30, 4 }
  0x29   : > { %4632 = sst [smem:[#allocation28_spill]] %s4631_s14  ;;  %p3115_p6 = pnand %p2592_p4, %p3048_p3 }
  0x2a   : > { %s4634_s15 = scalar_select %p3105_p2, 1, 0 }
  0x2b   : > { %s208_s9 = sand.u32 1, %s2942_s25   ;;  %s4637_s1 = sld [smem:[#allocation30_spill]] }
  0x2c   : > { %4635 = sst [smem:[#allocation29_spill]] %s4634_s15  ;;  %s212_s10 = scalar_lea.vmem [#allocation7], %s2504_s7 }
  0x2d   : > { %s220_s18 = sshll.u32 %s212_s10, 4  ;;  %p3127_p1 = pnand %p2592_p4, %p3083_p12  ;;  %s221_s18 = int_to_ptr.vmem [resolvable:$true] %s220_s18 }
  0x2e   : > { %s3131_s24 = scalar_lea.sflag [#allocation8], %s208_s9  ;;  %s2944_s20 = smov 128  }
  0x2f   : > { %s2945_s28 = smov 8   ;;  %p2514_p3 = scmp.ge.s32.totalorder %s2942_s25, 1 }
  0x30   : > { %p270_p9 = scmp.lt.s32.totalorder %s2942_s25, 10  ;;  %s195_s12 = scalar_lea.hbm %s4597_s0, %s2527_s6 }
  0x31   : > { %s217_s11 = scalar_lea.hbm %s4637_s1, %s2527_s6  ;;  %s190_s9 = scalar_lea.vmem [#allocation4], %s2504_s7 }
  0x32   : > { %s218_s15 = sshll.u32 %s217_s11, 4  ;;  %p3141_p11 = pnand %p2514_p3, %p270_p9  ;;  %s219_s15 = int_to_ptr.hbm [resolvable:$true] %s218_s15 }
  0x33   : > { %2581 = dma.hbm_to_vmem [thread:$0]  (!%p3115_p6), %s219_s15, 256, %s221_s18, %s3131_s24, %s2944_s20, %s2944_s20, %s2945_s28  }
  0x34   : > { %s198_s1 = sshll.u32 %s190_s9, 4  ;;  %s196_s4 = sshll.u32 %s195_s12, 4  ;;  %s199_s1 = int_to_ptr.vmem [resolvable:$true] %s198_s1  ;;  %s197_s4 = int_to_ptr.hbm [resolvable:$true] %s196_s4 }
  0x35   : > { %s232_s14 = sand.u32 1, %s2910_s17   ;;  %s187_s22 = scalar_lea.sflag [#allocation5], %s186_s30 }
  0x36   : > { %2578 = dma.hbm_to_vmem [thread:$0]  (!%p3115_p6), %s197_s4, 256, %s199_s1, %s187_s22, %s2944_s20, %s2944_s20, %s2945_s28  }
  0x37   : > { %s2510_s18 = sshll.u32 %s232_s14, 7  ;;  %s2511_s15 = sshll.u32 %s2934_s23, 3 }
  0x38   : > { %s238_s6 = scalar_lea.hbm %s4599_s2, %s2511_s15  ;;  %s234_s10 = scalar_lea.vmem [#allocation9], %s2510_s18 }
  0x39   : > { %s239_s7 = sshll.u32 %s238_s6, 4  ;;  %s241_s11 = sshll.u32 %s234_s10, 4  ;;  %s240_s7 = int_to_ptr.hbm [resolvable:$true] %s239_s7  ;;  %s242_s11 = int_to_ptr.vmem [resolvable:$true] %s241_s11 }
  0x3a   : > { %s2946_s12 = smov 384   ;;  %s259_s1 = scalar_lea.hbm %s4600_s3, %s2511_s15 }
  0x3b   : > { %2584 = dma.hbm_to_vmem [thread:$0]  (!%p3127_p1), %s240_s7, 2048, %s242_s11, %s3131_s24, %s2946_s12, %s2944_s20, %s2945_s28  }
  0x3c   : > { %s260_s4 = sshll.u32 %s259_s1, 4  ;;  %s255_s22 = scalar_lea.vmem [#allocation10], %s2510_s18  ;;  %s261_s4 = int_to_ptr.hbm [resolvable:$true] %s260_s4 }
  0x3d   : > { %s262_s9 = sshll.u32 %s255_s22, 4  ;;  %s252_s21 = scalar_lea.sflag [#allocation11], %s232_s14  ;;  %s263_s9 = int_to_ptr.vmem [resolvable:$true] %s262_s9 }
  0x3e   : > { %2587 = dma.hbm_to_vmem [thread:$0]  (!%p3127_p1), %s261_s4, 2048, %s263_s9, %s252_s21, %s2946_s12, %s2944_s20, %s2945_s28  }
  0x3f   : > { %274 = sbr.rel (%p3141_p11) target bundleno = 3967 (0xf7f), region = 36  ;;  %s3173_s24 = sand.u32 (!%p3141_p11), 1, %s2918_s19  }
  0x40   : > { %s2515_s25 = sshll.u32 (!%p3141_p11), %s3173_s24, 4  ;;  %s277_s15 = scalar_lea.sflag (!%p3141_p11), [#allocation5], %s3173_s24 }
  0x41   : > { %s3177_s18 = scalar_lea.vmem (!%p3141_p11), [#allocation4], %s2515_s25 }
  0x44   : > { %2881 = dma.done.wait (%p3065_p7), %s277_s15, 256  }
  0x45   : > { %2883 = vsyncadd (%p3065_p7), %s277_s15, 4294967040  ;;  %s286_s20 = sand.u32 1, %s3031_s26   ;;  %s3184_s5 = scalar_lea.vmem [#allocation7], %s2515_s25 }
  0x46   : > { %s287_s14 = scalar_lea.sflag [#allocation8], %s286_s20 }
  0x47   : > { %2885 = dma.done.wait (%p3065_p7), %s287_s14, 256  }
  0x48   : > { %2887 = vsyncadd (%p3065_p7), %s287_s14, 4294967040  ;;  %s298_s28 = sand.u32 1, %s2906_s16  }
  0x49   : > { %s2517_s29 = sshll.u32 %s298_s28, 7 }
  0x4a   : > { %s3191_s6 = scalar_lea.vmem [#allocation9], %s2517_s29 }
  0x4b   : > { %2889 = dma.done.wait (%p3089_p13), %s287_s14, 2048  }
  0x4c   : > { %2891 = vsyncadd (%p3089_p13), %s287_s14, 4294965248  ;;  %s307_s26 = scalar_lea.sflag [#allocation11], %s298_s28  ;;  %s3197_s7 = scalar_lea.vmem [#allocation10], %s2517_s29 }
  0x4d   : > { %2893 = dma.done.wait (%p3089_p13), %s307_s26, 2048  }
  0x4e   : > { %2895 = vsyncadd (%p3089_p13), %s307_s26, 4294965248  ;;  %s2519_s8 = sshll.u32 %s3173_s24, 3  ;;  %s4640_s11 = sld [smem:[#allocation20_spill]] }
  0x4f   : > { %s3204_s10 = scalar_lea.vmem [#allocation12], %s2519_s8 }
  0x54   : > { %p2520_p4 = scmp.ne.s32.totalorder %s4640_s11, 0 }
  0x56   : > { %356 = sbr.rel (%p2520_p4) target bundleno = 96 (0x60), region = 56 }
  0x5b   : > { %v2947_v0 = vmov -inf  }
  0x5c   : > { %357 = vst [vmem:[#allocation2] sm:$0xff] %v2947_v0 }
  0x5d   : > { %358 = vst [vmem:[#allocation2 + $0x8] sm:$0xff] %v2947_v0 }
  0x5e   : > { %359 = vst [vmem:[#allocation3 + $0x8] sm:$0xff] %v2947_v0 }
  0x5f   : > { %360 = vst [vmem:[#allocation3] sm:$0xff] %v2947_v0 }
  0x60 PF: > { %v378_v1 = vld [vmem:[%s3191_s6 + $0x78] sm:$0xff]  ;;  %v377_v3 = vld [vmem:[%s3191_s6 + $0x70] sm:$0xff]  ;;  %v376_v5 = vld [vmem:[%s3191_s6 + $0x68] sm:$0xff]  ;;  %s4641_s13 = sld [smem:[#allocation20_spill]]  ;;  %v397_v41 = vlaneseq  ;;  %v2948_v45 = vmov -inf  }
  0x61   : > { %v396_v2 = vld [vmem:[%s3197_s7 + $0x78] sm:$0xff]  ;;  %404 = vmatpush.msra.mxu0 %v378_v1  ;;  %v395_v4 = vld [vmem:[%s3197_s7 + $0x70] sm:$0xff]  ;;  %2529 = vmatpush.msra.mxu2 %v378_v1  ;;  %v394_v6 = vld [vmem:[%s3197_s7 + $0x68] sm:$0xff] }
  0x62   : > { %427 = vmatpush.msra.mxu1 %v396_v2  ;;  %2545 = vmatpush.msra.mxu3 %v396_v2  ;;  %v375_v7 = vld [vmem:[%s3191_s6 + $0x60] sm:$0xff]  ;;  %v374_v9 = vld [vmem:[%s3191_s6 + $0x58] sm:$0xff]  ;;  %v373_v11 = vld [vmem:[%s3191_s6 + $0x50] sm:$0xff]  ;;  %v3256_v42 = vand.u32 127, %v397_v41 }
  0x63   : > { %405 = vmatpush.msra.mxu0 %v377_v3  ;;  %2530 = vmatpush.msra.mxu2 %v377_v3  ;;  %v393_v8 = vld [vmem:[%s3197_s7 + $0x60] sm:$0xff]  ;;  %v392_v10 = vld [vmem:[%s3197_s7 + $0x58] sm:$0xff]  ;;  %v391_v12 = vld [vmem:[%s3197_s7 + $0x50] sm:$0xff] }
  0x64   : > { %428 = vmatpush.msra.mxu1 %v395_v4  ;;  %2546 = vmatpush.msra.mxu3 %v395_v4  ;;  %v372_v13 = vld [vmem:[%s3191_s6 + $0x48] sm:$0xff]  ;;  %v371_v15 = vld [vmem:[%s3191_s6 + $0x40] sm:$0xff]  ;;  %v370_v17 = vld [vmem:[%s3191_s6 + $0x38] sm:$0xff]  ;;  %vm462_vm1 = vcmp.eq.s32.totalorder %v3256_v42, 0 }
  0x65   : > { %406 = vmatpush.msra.mxu0 %v376_v5  ;;  %2531 = vmatpush.msra.mxu2 %v376_v5  ;;  %v390_v14 = vld [vmem:[%s3197_s7 + $0x48] sm:$0xff]  ;;  %v389_v16 = vld [vmem:[%s3197_s7 + $0x40] sm:$0xff]  ;;  %v388_v18 = vld [vmem:[%s3197_s7 + $0x38] sm:$0xff] }
  0x66   : > { %429 = vmatpush.msra.mxu1 %v394_v6  ;;  %2547 = vmatpush.msra.mxu3 %v394_v6  ;;  %v369_v19 = vld [vmem:[%s3191_s6 + $0x30] sm:$0xff]  ;;  %v368_v21 = vld [vmem:[%s3191_s6 + $0x28] sm:$0xff]  ;;  %v367_v23 = vld [vmem:[%s3191_s6 + $0x20] sm:$0xff]  ;;  %s2521_s12 = sshll.u32 %s4641_s13, 7  ;;  %p2522_p7 = scmp.ne.s32.totalorder %s4641_s13, 2 }
  0x67   : > { %407 = vmatpush.msra.mxu0 %v375_v7  ;;  %2532 = vmatpush.msra.mxu2 %v375_v7  ;;  %v387_v20 = vld [vmem:[%s3197_s7 + $0x30] sm:$0xff]  ;;  %v386_v22 = vld [vmem:[%s3197_s7 + $0x28] sm:$0xff]  ;;  %v385_v24 = vld [vmem:[%s3197_s7 + $0x20] sm:$0xff]  ;;  %v400_v43 = vstv %s2521_s12 }
  0x68   : > { %430 = vmatpush.msra.mxu1 %v393_v8  ;;  %2548 = vmatpush.msra.mxu3 %v393_v8  ;;  %v366_v25 = vld [vmem:[%s3191_s6 + $0x18] sm:$0xff]  ;;  %v365_v27 = vld [vmem:[%s3191_s6 + $0x10] sm:$0xff]  ;;  %v364_v29 = vld [vmem:[%s3191_s6 + $0x8] sm:$0xff]  ;;  %v401_v44 = vadd.s32 %v400_v43, %v3256_v42 }
  0x69   : > { %408 = vmatpush.msra.mxu0 %v374_v9  ;;  %2533 = vmatpush.msra.mxu2 %v374_v9  ;;  %v384_v26 = vld [vmem:[%s3197_s7 + $0x18] sm:$0xff]  ;;  %v383_v28 = vld [vmem:[%s3197_s7 + $0x10] sm:$0xff]  ;;  %v382_v30 = vld [vmem:[%s3197_s7 + $0x8] sm:$0xff] }
  0x6a   : > { %431 = vmatpush.msra.mxu1 %v392_v10  ;;  %2549 = vmatpush.msra.mxu3 %v392_v10  ;;  %v363_v31 = vld [vmem:[%s3191_s6] sm:$0xff]  ;;  %v362_v35 = vld [vmem:[%s3177_s18 + $0x8] sm:$0xff]  ;;  %v3252_v40 = vld [vmem:[#allocation3] sm:$0xff]  ;;  %vm402_vm0 = vcmp.lt.s32.totalorder %v401_v44, 320 }
  0x6b   : > { %409 = vmatpush.msra.mxu0 %v373_v11  ;;  %2534 = vmatpush.msra.mxu2 %v373_v11  ;;  %v381_v32 = vld [vmem:[%s3197_s7] sm:$0xff]  ;;  %v380_v36 = vld [vmem:[%s3184_s5 + $0x8] sm:$0xff]  ;;  %v403_v46 = vsel %vm402_vm0, 0.0, %v2948_v45 }
  0x6c   : > { %432 = vmatpush.msra.mxu1 %v391_v12  ;;  %2550 = vmatpush.msra.mxu3 %v391_v12  ;;  %v361_v33 = vld [vmem:[%s3177_s18] sm:$0xff]  ;;  %v3246_v38 = vld [vmem:[#allocation2 + $0x8] sm:$0xff]  ;;  %v3249_v39 = vld [vmem:[#allocation3 + $0x8] sm:$0xff] }
  0x6d   : > { %410 = vmatpush.msra.mxu0 %v372_v13  ;;  %2535 = vmatpush.msra.mxu2 %v372_v13  ;;  %v379_v34 = vld [vmem:[%s3184_s5] sm:$0xff] }
  0x6e   : > { %433 = vmatpush.msra.mxu1 %v390_v14  ;;  %2551 = vmatpush.msra.mxu3 %v390_v14  ;;  %v3243_v37 = vld [vmem:[#allocation2] sm:$0xff] }
  0x6f   : > { %411 = vmatpush.msra.mxu0 %v371_v15  ;;  %2536 = vmatpush.msra.mxu2 %v371_v15 }
  0x70   : > { %434 = vmatpush.msra.mxu1 %v389_v16  ;;  %2552 = vmatpush.msra.mxu3 %v389_v16 }
  0x71   : > { %412 = vmatpush.msra.mxu0 %v370_v17  ;;  %2537 = vmatpush.msra.mxu2 %v370_v17 }
  0x72   : > { %435 = vmatpush.msra.mxu1 %v388_v18  ;;  %2553 = vmatpush.msra.mxu3 %v388_v18 }
  0x73   : > { %413 = vmatpush.msra.mxu0 %v369_v19  ;;  %2538 = vmatpush.msra.mxu2 %v369_v19 }
  0x74   : > { %436 = vmatpush.msra.mxu1 %v387_v20  ;;  %2554 = vmatpush.msra.mxu3 %v387_v20 }
  0x75   : > { %414 = vmatpush.msra.mxu0 %v368_v21  ;;  %2539 = vmatpush.msra.mxu2 %v368_v21 }
  0x76   : > { %437 = vmatpush.msra.mxu1 %v386_v22  ;;  %2555 = vmatpush.msra.mxu3 %v386_v22 }
  0x77   : > { %415 = vmatpush.msra.mxu0 %v367_v23  ;;  %2540 = vmatpush.msra.mxu2 %v367_v23 }
  0x78   : > { %438 = vmatpush.msra.mxu1 %v385_v24  ;;  %2556 = vmatpush.msra.mxu3 %v385_v24 }
  0x79   : > { %416 = vmatpush.msra.mxu0 %v366_v25  ;;  %2541 = vmatpush.msra.mxu2 %v366_v25 }
  0x7a   : > { %439 = vmatpush.msra.mxu1 %v384_v26  ;;  %2557 = vmatpush.msra.mxu3 %v384_v26 }
  0x7b   : > { %417 = vmatpush.msra.mxu0 %v365_v27  ;;  %2542 = vmatpush.msra.mxu2 %v365_v27 }
  0x7c   : > { %440 = vmatpush.msra.mxu1 %v383_v28  ;;  %2558 = vmatpush.msra.mxu3 %v383_v28 }
  0x7d   : > { %418 = vmatpush.msra.mxu0 %v364_v29  ;;  %2543 = vmatpush.msra.mxu2 %v364_v29 }
  0x7e   : > { %441 = vmatpush.msra.mxu1 %v382_v30  ;;  %2559 = vmatpush.msra.mxu3 %v382_v30 }
  0x7f   : > { %419 = vmatpush.msra.mxu0 %v363_v31  ;;  %2544 = vmatpush.msra.mxu2 %v363_v31 }
  0x80   : > { %442 = vmatpush.msra.mxu1 %v381_v32  ;;  %420 = vmatmul.f32.vlgmr.msra.gmra.mxu0 %v361_v33 }
  0x81   : > { %443 = vmatmul.f32.vlgmr.msra.gmra.mxu1 %v379_v34  ;;  %2560 = vmatpush.msra.mxu3 %v381_v32 }
  0x82   : > { %423 = vmatmul.f32.vlgmr.msra.gmra.mxu2 %v362_v35  ;;  %446 = vmatmul.f32.vlgmr.msra.gmra.mxu3 %v380_v36 }
  0x83   : > { %452 = vmax.xlane.f32.xlu0 %v3243_v37  ;;  %1378 = vmax.xlane.f32.xlu2 %v3249_v39 }
  0x8b   : > { %454 = vmax.xlane.f32.xlu0 %v3246_v38  ;;  %1380 = vmax.xlane.f32.xlu2 %v3252_v40 }
  0xf6   : > { %v3271_v55 = vpop.xlane.xlu0 %452  ;;  %v3275_v57 = vpop.xlane.xlu2 %1378 }
  0xfd   : > { %v421_v47 = vpop.f32.mrf.mxu0 }
  0xfe   : > { %v444_v48 = vpop.f32.mrf.mxu1  ;;  %v3259_v49 = vadd.f32 %v421_v47, %v403_v46  ;;  %v3273_v56 = vpop.xlane.xlu0 %454 }
  0xff   : > { %v3261_v50 = vadd.f32 %v444_v48, %v403_v46  ;;  %v3312_v15 = vpop.xlane.xlu2 %1380 }
 0x100   : > { %456 = vmax.xlane.f32.xlu1 %v3259_v49 }
 0x101   : > { %1382 = vmax.xlane.f32.xlu0 %v3261_v50 }
 0x105   : > { %v424_v51 = vpop.f32.mrf.mxu2  ;;  %v447_v53 = vpop.f32.mrf.mxu3 }
 0x106   : > { %v3265_v52 = vadd.f32 %v424_v51, %v403_v46  ;;  %v3268_v54 = vadd.f32 %v447_v53, %v403_v46 }
 0x108   : > { %458 = vmax.xlane.f32.xlu1 %v3265_v52 }
 0x110   : > { %1384 = vmax.xlane.f32.xlu1 %v3268_v54 }
 0x173   : > { %v3280_v59 = vpop.xlane.xlu1 %456 }
 0x174   : > { %v3278_v58 = vpop.xlane.xlu0 %1382  ;;  %v3286_v61 = vmax.f32 %v3271_v55, %v3280_v59 }
 0x175   : > { %v1386_v60 = vmax.f32 %v3275_v57, %v3278_v58 }
 0x176   : > { %vm499_vm3 = vcmp.eq.f32.partialorder %v3259_v49, %v3286_v61  ;;  %vm467_vm4 = vcmp.eq.f32.partialorder %v3243_v37, %v3286_v61 }
 0x177   : > { %v3290_v62 = vsel %vm462_vm1, %v1386_v60, -inf  ;;  %vm1392_vm2 = vcmp.eq.f32.partialorder %v3249_v39, %v1386_v60  ;;  %v501_v0 = vsel %vm499_vm3, %v3256_v42, 128  ;;  %v469_v3 = vsel %vm467_vm4, %v3256_v42, 128 }
 0x178   : > { %v1394_v63 = vsel %vm1392_vm2, %v3256_v42, 128  ;;  %v504_v2 = vshra.s32 %v501_v0, 16  ;;  %v472_v4 = vshra.s32 %v469_v3, 16  ;;  %vm1424_vm7 = vcmp.eq.f32.partialorder %v3261_v50, %v1386_v60 }
 0x179   : > { %v1397_v1 = vshra.s32 %v1394_v63, 16  ;;  %v1426_v20 = vsel %vm1424_vm7, %v3256_v42, 128  ;;  %v1396_v30 = vand.u32 65535, %v1394_v63  ;;  %v503_v31 = vand.u32 65535, %v501_v0 }
 0x17a   : > { %v506_v6 = vcvt.s32.f32 %v504_v2  ;;  %v474_v8 = vcvt.s32.f32 %v472_v4  ;;  %v1429_v22 = vshra.s32 %v1426_v20, 16  ;;  %v471_v32 = vand.u32 65535, %v469_v3 }
 0x17b   : > { %v1399_v5 = vcvt.s32.f32 %v1397_v1  ;;  %v3300_v7 = vpop.xlane.xlu1 %458  ;;  %v1398_v35 = vcvt.s32.f32 %v1396_v30  ;;  %v505_v36 = vcvt.s32.f32 %v503_v31  ;;  %v1428_v4 = vand.u32 65535, %v1426_v20 }
 0x17c   : > { %v461_v9 = vmax.f32 %v3273_v56, %v3300_v7  ;;  %507 = vmin.xlane.f32.xlu1 %v506_v6  ;;  %475 = vmin.xlane.f32.xlu2 %v474_v8  ;;  %v1431_v29 = vcvt.s32.f32 %v1429_v22  ;;  %v473_v43 = vcvt.s32.f32 %v471_v32  ;;  %vm465_vm3 = vcmp.ge.f32.partialorder %v3271_v55, %v3280_v59 }
 0x17d   : > { %1400 = vmin.xlane.f32.xlu0 %v1399_v5  ;;  %vm1390_vm4 = vcmp.ge.f32.partialorder %v3275_v57, %v3278_v58 }
 0x17e   : > { %v3306_v10 = vsel %vm462_vm1, %v461_v9, -inf  ;;  %vm500_vm5 = vcmp.eq.f32.partialorder %v3265_v52, %v461_v9  ;;  %vm468_vm6 = vcmp.eq.f32.partialorder %v3246_v38, %v461_v9 }
 0x17f   : > { %v502_v11 = vsel %vm500_vm5, %v3256_v42, 128  ;;  %v470_v12 = vsel %vm468_vm6, %v3256_v42, 128  ;;  %vm2949_vm6 = vmmov 1  }
 0x180   : > { %v518_v13 = vshra.s32 %v502_v11, 16  ;;  %v486_v14 = vshra.s32 %v470_v12, 16  ;;  %v485_v47 = vand.u32 65535, %v470_v12  ;;  %v517_v48 = vand.u32 65535, %v502_v11  ;;  %vm541_vm7 = vmxor %vm465_vm3, %vm2949_vm6 }
 0x181   : > { %v1430_v12 = vcvt.s32.f32 %v1428_v4 }
 0x182   : > { %v520_v16 = vcvt.s32.f32 %v518_v13  ;;  %v488_v17 = vcvt.s32.f32 %v486_v14  ;;  %v487_v53 = vcvt.s32.f32 %v485_v47  ;;  %v519_v63 = vcvt.s32.f32 %v517_v48 }
 0x183   : > { %v3315_v18 = vpop.xlane.xlu1 %1384 }
 0x184   : > { %v1387_v19 = vmax.f32 %v3312_v15, %v3315_v18  ;;  %521 = vmin.xlane.f32.xlu2 %v520_v16 }
 0x185   : > { %489 = vmin.xlane.f32.xlu0 %v488_v17 }
 0x186   : > { %v3322_v21 = vsel %vm462_vm1, %v1387_v19, -inf  ;;  %vm1425_vm8 = vcmp.eq.f32.partialorder %v3268_v54, %v1387_v19  ;;  %vm1393_vm9 = vcmp.eq.f32.partialorder %v3252_v40, %v1387_v19 }
 0x187   : > { %v1427_v23 = vsel %vm1425_vm8, %v3256_v42, 128  ;;  %v1395_v24 = vsel %vm1393_vm9, %v3256_v42, 128 }
 0x188   : > { %v1443_v25 = vshra.s32 %v1427_v23, 16  ;;  %v1411_v26 = vshra.s32 %v1395_v24, 16  ;;  %v1442_v2 = vand.u32 65535, %v1427_v23  ;;  %v1410_v3 = vand.u32 65535, %v1395_v24 }
 0x18a   : > { %v1445_v27 = vcvt.s32.f32 %v1443_v25  ;;  %v1413_v28 = vcvt.s32.f32 %v1411_v26  ;;  %v1412_v9 = vcvt.s32.f32 %v1410_v3 }
 0x18c   : > { %1414 = vmin.xlane.f32.xlu1 %v1413_v28  ;;  %1432 = vmin.xlane.f32.xlu2 %v1431_v29 }
 0x18d   : > { %1446 = vmin.xlane.f32.xlu0 %v1445_v27 }
 0x1ef   : > { %v508_v34 = vpop.xlane.xlu1 %507  ;;  %v476_v41 = vpop.xlane.xlu2 %475 }
 0x1f0   : > { %v1401_v33 = vpop.xlane.xlu0 %1400  ;;  %vm509_vm11 = vcmp.eq.f32.partialorder %v506_v6, %v508_v34  ;;  %vm477_vm12 = vcmp.eq.f32.partialorder %v474_v8, %v476_v41  ;;  %v1444_v8 = vcvt.s32.f32 %v1442_v2  ;;  %v514_v19 = vcvt.f32.s32 %v508_v34 }
 0x1f1   : > { %vm1402_vm10 = vcmp.eq.f32.partialorder %v1399_v5, %v1401_v33  ;;  %v510_v45 = vsel %vm509_vm11, %v505_v36, inf  ;;  %v478_v46 = vsel %vm477_vm12, %v473_v43, inf  ;;  %v482_v20 = vcvt.f32.s32 %v476_v41 }
 0x1f2   : > { %v1403_v44 = vsel %vm1402_vm10, %v1398_v35, inf  ;;  %511 = vmin.xlane.f32.xlu0 %v510_v45  ;;  %479 = vmin.xlane.f32.xlu1 %v478_v46  ;;  %v515_v25 = vshll.u32 %v514_v19, 16 }
 0x1f3   : > { %1404 = vmin.xlane.f32.xlu2 %v1403_v44 }
 0x1f7   : > { %v3328_v60 = vpop.xlane.xlu2 %521 }
 0x1f8   : > { %v490_v51 = vpop.xlane.xlu0 %489  ;;  %vm523_vm14 = vcmp.eq.f32.partialorder %v520_v16, %v3328_v60  ;;  %v528_v34 = vcvt.f32.s32 %v3328_v60 }
 0x1f9   : > { %vm491_vm13 = vcmp.eq.f32.partialorder %v488_v17, %v490_v51  ;;  %v524_v1 = vsel %vm523_vm14, %v519_v63, inf  ;;  %v1407_v17 = vcvt.f32.s32 %v1401_v33  ;;  %v496_v33 = vcvt.f32.s32 %v490_v51 }
 0x1fa   : > { %v492_v0 = vsel %vm491_vm13, %v487_v53, inf  ;;  %525 = vmin.xlane.f32.xlu1 %v524_v1  ;;  %vm466_vm13 = vcmp.ge.f32.partialorder %v3273_v56, %v3300_v7  ;;  %v529_v47 = vshll.u32 %v528_v34, 16 }
 0x1fb   : > { %493 = vmin.xlane.f32.xlu2 %v492_v0  ;;  %v1408_v24 = vshll.u32 %v1407_v17, 16  ;;  %v497_v44 = vshll.u32 %v496_v33, 16 }
 0x1ff   : > { %v3333_v6 = vpop.xlane.xlu1 %1414  ;;  %v3335_v11 = vpop.xlane.xlu2 %1432 }
 0x200   : > { %v3331_v5 = vpop.xlane.xlu0 %1446  ;;  %vm1416_vm0 = vcmp.eq.f32.partialorder %v1413_v28, %v3333_v6  ;;  %vm1434_vm2 = vcmp.eq.f32.partialorder %v1431_v29, %v3335_v11  ;;  %v483_v28 = vshll.u32 %v482_v20, 16  ;;  %v1421_v59 = vcvt.f32.s32 %v3333_v6 }
 0x201   : > { %vm1448_vm15 = vcmp.eq.f32.partialorder %v1445_v27, %v3331_v5  ;;  %v1417_v14 = vsel %vm1416_vm0, %v1412_v9, inf  ;;  %v1435_v16 = vsel %vm1434_vm2, %v1430_v12, inf  ;;  %v1453_v55 = vcvt.f32.s32 %v3331_v5 }
 0x202   : > { %v1449_v13 = vsel %vm1448_vm15, %v1444_v8, inf  ;;  %1418 = vmin.xlane.f32.xlu0 %v1417_v14  ;;  %1436 = vmin.xlane.f32.xlu1 %v1435_v16  ;;  %vm542_vm15 = vmxor %vm466_vm13, %vm2949_vm6  ;;  %v1422_v0 = vshll.u32 %v1421_v59, 16  ;;  %v463_v9 = vsel %vm462_vm1, %v3286_v61, -inf }
 0x203   : > { %1450 = vmin.xlane.f32.xlu2 %v1449_v13  ;;  %v1454_v63 = vshll.u32 %v1453_v55, 16 }
 0x265   : > { %v512_v23 = vpop.xlane.xlu0 %511  ;;  %v480_v30 = vpop.xlane.xlu1 %479 }
 0x266   : > { %v1405_v22 = vpop.xlane.xlu2 %1404  ;;  %v513_v27 = vcvt.f32.s32 %v512_v23  ;;  %v481_v29 = vcvt.f32.s32 %v480_v30 }
 0x267   : > { %v1406_v26 = vcvt.f32.s32 %v1405_v22 }
 0x268   : > { %v516_v32 = vadd.s32 %v515_v25, %v513_v27  ;;  %v484_v35 = vadd.s32 %v483_v28, %v481_v29 }
 0x269   : > { %v1409_v31 = vadd.s32 %v1408_v24, %v1406_v26 }
 0x26a   : > { %vm543_vm8 = vcmp.eq.s32.totalorder %v3256_v42, %v516_v32  ;;  %vm531_vm10 = vcmp.eq.s32.totalorder %v3256_v42, %v484_v35 }
 0x26b   : > { %vm1456_vm5 = vcmp.eq.s32.totalorder %v3256_v42, %v1409_v31  ;;  %vm549_vm11 = vmand %vm541_vm7, %vm543_vm8 }
 0x26c   : > { %vm1462_vm9 = vmand %vm1390_vm4, %vm1456_vm5  ;;  %v3360_v43 = vsel %vm549_vm11, -inf, %v3259_v49  ;;  %vm1391_vm5 = vcmp.ge.f32.partialorder %v3312_v15, %v3315_v18 }
 0x26d   : > { %v3356_v36 = vsel %vm1462_vm9, -inf, %v3249_v39  ;;  %vm537_vm12 = vmand %vm465_vm3, %vm531_vm10  ;;  %557 = vmax.xlane.f32.xlu2 %v3360_v43  ;;  %v526_v39 = vpop.xlane.xlu1 %525 }
 0x26e   : > { %v494_v41 = vpop.xlane.xlu2 %493  ;;  %1478 = vmax.xlane.f32.xlu1 %v3356_v36  ;;  %v3367_v46 = vsel %vm537_vm12, -inf, %v3243_v37  ;;  %v527_v49 = vcvt.f32.s32 %v526_v39  ;;  %v1439_v37 = vcvt.f32.s32 %v3335_v11  ;;  %vm1466_vm7 = vmxor %vm1390_vm4, %vm2949_vm6  ;;  %vm563_vm4 = vcmp.eq.s32.totalorder %v3256_v42, 1 }
 0x26f   : > { %v495_v45 = vcvt.f32.s32 %v494_v41  ;;  %553 = vmax.xlane.f32.xlu0 %v3367_v46  ;;  %vm1467_vm8 = vmxor %vm1391_vm5, %vm2949_vm6 }
 0x270   : > { %v530_v51 = vadd.s32 %v529_v47, %v527_v49  ;;  %v1440_v4 = vshll.u32 %v1439_v37, 16 }
 0x271   : > { %v498_v48 = vadd.s32 %v497_v44, %v495_v45 }
 0x272   : > { %vm544_vm2 = vcmp.eq.s32.totalorder %v3256_v42, %v530_v51 }
 0x273   : > { %vm532_vm14 = vcmp.eq.s32.totalorder %v3256_v42, %v498_v48  ;;  %vm550_vm3 = vmand %vm542_vm15, %vm544_vm2 }
 0x274   : > { %vm538_vm0 = vmand %vm466_vm13, %vm532_vm14  ;;  %v3383_v60 = vsel %vm550_vm3, -inf, %v3265_v52 }
 0x275   : > { %v3379_v56 = vsel %vm538_vm0, -inf, %v3246_v38  ;;  %v1419_v53 = vpop.xlane.xlu0 %1418  ;;  %v1437_v3 = vpop.xlane.xlu1 %1436 }
 0x276   : > { %v1451_v7 = vpop.xlane.xlu2 %1450  ;;  %555 = vmax.xlane.f32.xlu1 %v3379_v56  ;;  %v1420_v2 = vcvt.f32.s32 %v1419_v53  ;;  %v1438_v38 = vcvt.f32.s32 %v1437_v3 }
 0x277   : > { %v1452_v1 = vcvt.f32.s32 %v1451_v7  ;;  %559 = vmax.xlane.f32.xlu0 %v3383_v60 }
 0x278   : > { %v1423_v6 = vadd.s32 %v1422_v0, %v1420_v2  ;;  %v1441_v8 = vadd.s32 %v1440_v4, %v1438_v38 }
 0x279   : > { %v1455_v5 = vadd.s32 %v1454_v63, %v1452_v1 }
 0x27a   : > { %vm1457_vm10 = vcmp.eq.s32.totalorder %v3256_v42, %v1423_v6  ;;  %vm1468_vm12 = vcmp.eq.s32.totalorder %v3256_v42, %v1441_v8 }
 0x27b   : > { %vm1469_vm9 = vcmp.eq.s32.totalorder %v3256_v42, %v1455_v5  ;;  %vm1463_vm13 = vmand %vm1391_vm5, %vm1457_vm10 }
 0x27c   : > { %vm1475_vm11 = vmand %vm1467_vm8, %vm1469_vm9  ;;  %v3401_v15 = vsel %vm1463_vm13, -inf, %v3252_v40 }
 0x27d   : > { %v3397_v52 = vsel %vm1475_vm11, -inf, %v3268_v54  ;;  %vm1474_vm14 = vmand %vm1466_vm7, %vm1468_vm12  ;;  %1480 = vmax.xlane.f32.xlu2 %v3401_v15 }
 0x27e   : > { %1484 = vmax.xlane.f32.xlu1 %v3397_v52  ;;  %v3405_v57 = vsel %vm1474_vm14, -inf, %v3261_v50 }
 0x27f   : > { %1482 = vmax.xlane.f32.xlu0 %v3405_v57 }
 0x2e0   : > { %v3410_v18 = vpop.xlane.xlu2 %557 }
 0x2e1   : > { %v3408_v58 = vpop.xlane.xlu1 %1478 }
 0x2e2   : > { %v3413_v54 = vpop.xlane.xlu0 %553 }
 0x2e3   : > { %v561_v40 = vmax.f32 %v3413_v54, %v3410_v18 }
 0x2e5   : > { %v3422_v50 = vsel %vm563_vm4, %v561_v40, %v463_v9  ;;  %vm600_vm15 = vcmp.eq.f32.partialorder %v3360_v43, %v561_v40  ;;  %vm568_vm0 = vcmp.eq.f32.partialorder %v3367_v46, %v561_v40 }
 0x2e6   : > { %v602_v11 = vsel %vm600_vm15, %v3256_v42, 128  ;;  %v570_v12 = vsel %vm568_vm0, %v3256_v42, 128  ;;  %vm566_vm0 = vcmp.ge.f32.partialorder %v3413_v54, %v3410_v18 }
 0x2e7   : > { %v605_v13 = vshra.s32 %v602_v11, 16  ;;  %v573_v14 = vshra.s32 %v570_v12, 16  ;;  %v572_v59 = vand.u32 65535, %v570_v12  ;;  %v604_v37 = vand.u32 65535, %v602_v11 }
 0x2e9   : > { %v3428_v16 = vpop.xlane.xlu1 %555  ;;  %v607_v17 = vcvt.s32.f32 %v605_v13  ;;  %v575_v19 = vcvt.s32.f32 %v573_v14  ;;  %v574_v63 = vcvt.s32.f32 %v572_v59  ;;  %v606_v0 = vcvt.s32.f32 %v604_v37 }
 0x2ea   : > { %v3430_v20 = vpop.xlane.xlu0 %559 }
 0x2eb   : > { %v562_v61 = vmax.f32 %v3428_v16, %v3430_v20  ;;  %608 = vmin.xlane.f32.xlu1 %v607_v17  ;;  %576 = vmin.xlane.f32.xlu2 %v575_v19 }
 0x2ed   : > { %v3437_v22 = vsel %vm563_vm4, %v562_v61, %v3306_v10  ;;  %vm601_vm1 = vcmp.eq.f32.partialorder %v3383_v60, %v562_v61  ;;  %vm569_vm7 = vcmp.eq.f32.partialorder %v3379_v56, %v562_v61 }
 0x2ee   : > { %v603_v23 = vsel %vm601_vm1, %v3256_v42, 128  ;;  %vm642_vm1 = vmxor %vm566_vm0, %vm2949_vm6 }
 0x2ef   : > { %v619_v24 = vshra.s32 %v603_v23, 16  ;;  %v618_v3 = vand.u32 65535, %v603_v23 }
 0x2f0   : > { %v3443_v26 = vpop.xlane.xlu2 %1480 }
 0x2f1   : > { %v3441_v25 = vpop.xlane.xlu1 %1484  ;;  %v621_v27 = vcvt.s32.f32 %v619_v24  ;;  %v620_v38 = vcvt.s32.f32 %v618_v3 }
 0x2f2   : > { %v3445_v30 = vpop.xlane.xlu0 %1482  ;;  %v1487_v28 = vmax.f32 %v3443_v26, %v3441_v25 }
 0x2f3   : > { %v1486_v29 = vmax.f32 %v3408_v58, %v3445_v30  ;;  %622 = vmin.xlane.f32.xlu2 %v621_v27 }
 0x2f4   : > { %v3454_v10 = vsel %vm563_vm4, %v1487_v28, %v3322_v21  ;;  %vm1493_vm2 = vcmp.eq.f32.partialorder %v3401_v15, %v1487_v28  ;;  %vm1525_vm8 = vcmp.eq.f32.partialorder %v3397_v52, %v1487_v28 }
 0x2f5   : > { %v3460_v31 = vsel %vm563_vm4, %v1486_v29, %v3290_v62  ;;  %vm1492_vm3 = vcmp.eq.f32.partialorder %v3356_v36, %v1486_v29  ;;  %vm1524_vm5 = vcmp.eq.f32.partialorder %v3405_v57, %v1486_v29  ;;  %v1495_v32 = vsel %vm1493_vm2, %v3256_v42, 128 }
 0x2f6   : > { %v1494_v35 = vsel %vm1492_vm3, %v3256_v42, 128  ;;  %v1526_v33 = vsel %vm1524_vm5, %v3256_v42, 128  ;;  %v1511_v34 = vshra.s32 %v1495_v32, 16  ;;  %v571_v62 = vsel %vm569_vm7, %v3256_v42, 128 }
 0x2f7   : > { %v1497_v21 = vshra.s32 %v1494_v35, 16  ;;  %v1529_v41 = vshra.s32 %v1526_v33, 16  ;;  %v587_v47 = vshra.s32 %v571_v62, 16  ;;  %v1527_v48 = vsel %vm1525_vm8, %v3256_v42, 128 }
 0x2f8   : > { %v1513_v44 = vcvt.s32.f32 %v1511_v34  ;;  %v1543_v51 = vshra.s32 %v1527_v48, 16  ;;  %v1496_v6 = vand.u32 65535, %v1494_v35  ;;  %v1528_v8 = vand.u32 65535, %v1526_v33 }
 0x2f9   : > { %v1499_v45 = vcvt.s32.f32 %v1497_v21  ;;  %v1531_v39 = vcvt.s32.f32 %v1529_v41  ;;  %v589_v49 = vcvt.s32.f32 %v587_v47  ;;  %v1510_v40 = vand.u32 65535, %v1495_v32 }
 0x2fa   : > { %1514 = vmin.xlane.f32.xlu1 %v1513_v44  ;;  %v1545_v55 = vcvt.s32.f32 %v1543_v51  ;;  %v1498_v13 = vcvt.s32.f32 %v1496_v6  ;;  %v1530_v14 = vcvt.s32.f32 %v1528_v8  ;;  %v586_v24 = vand.u32 65535, %v571_v62 }
 0x2fb   : > { %1500 = vmin.xlane.f32.xlu0 %v1499_v45  ;;  %1532 = vmin.xlane.f32.xlu2 %v1531_v39  ;;  %v1542_v32 = vand.u32 65535, %v1527_v48  ;;  %vm567_vm8 = vcmp.ge.f32.partialorder %v3428_v16, %v3430_v20 }
 0x2fc   : > { %v588_v28 = vcvt.s32.f32 %v586_v24 }
 0x2fd   : > { %v1544_v33 = vcvt.s32.f32 %v1542_v32 }
 0x303   : > { %590 = vmin.xlane.f32.xlu0 %v589_v49 }
 0x30b   : > { %1546 = vmin.xlane.f32.xlu0 %v1545_v55 }
 0x35e   : > { %v577_v7 = vpop.xlane.xlu2 %576  ;;  %v609_v53 = vpop.xlane.xlu1 %608 }
 0x35f   : > { %vm578_vm9 = vcmp.eq.f32.partialorder %v575_v19, %v577_v7  ;;  %vm610_vm10 = vcmp.eq.f32.partialorder %v607_v17, %v609_v53  ;;  %v1512_v17 = vcvt.s32.f32 %v1510_v40  ;;  %v583_v21 = vcvt.f32.s32 %v577_v7 }
 0x360   : > { %v579_v1 = vsel %vm578_vm9, %v574_v63, inf  ;;  %v611_v2 = vsel %vm610_vm10, %v606_v0, inf  ;;  %v615_v41 = vcvt.f32.s32 %v609_v53  ;;  %vm643_vm9 = vmxor %vm567_vm8, %vm2949_vm6 }
 0x361   : > { %580 = vmin.xlane.f32.xlu1 %v579_v1  ;;  %612 = vmin.xlane.f32.xlu0 %v611_v2 }
 0x362   : > { %v616_v62 = vshll.u32 %v615_v41, 16 }
 0x366   : > { %v623_v4 = vpop.xlane.xlu2 %622 }
 0x367   : > { %vm624_vm11 = vcmp.eq.f32.partialorder %v621_v27, %v623_v4  ;;  %v629_v59 = vcvt.f32.s32 %v623_v4 }
 0x368   : > { %v625_v5 = vsel %vm624_vm11, %v620_v38, inf }
 0x369   : > { %626 = vmin.xlane.f32.xlu1 %v625_v5  ;;  %v630_v54 = vshll.u32 %v629_v59, 16 }
 0x36d   : > { %v3471_v9 = vpop.xlane.xlu1 %1514 }
 0x36e   : > { %v1501_v11 = vpop.xlane.xlu0 %1500  ;;  %v1533_v12 = vpop.xlane.xlu2 %1532  ;;  %vm1516_vm12 = vcmp.eq.f32.partialorder %v1513_v44, %v3471_v9 }
 0x36f   : > { %vm1502_vm13 = vcmp.eq.f32.partialorder %v1499_v45, %v1501_v11  ;;  %vm1534_vm14 = vcmp.eq.f32.partialorder %v1531_v39, %v1533_v12  ;;  %v1517_v23 = vsel %vm1516_vm12, %v1512_v17, inf  ;;  %v584_v39 = vshll.u32 %v583_v21, 16 }
 0x370   : > { %v1503_v19 = vsel %vm1502_vm13, %v1498_v13, inf  ;;  %v1535_v61 = vsel %vm1534_vm14, %v1530_v14, inf  ;;  %1518 = vmin.xlane.f32.xlu0 %v1517_v23  ;;  %v1507_v63 = vcvt.f32.s32 %v1501_v11  ;;  %v1539_v0 = vcvt.f32.s32 %v1533_v12 }
 0x371   : > { %1504 = vmin.xlane.f32.xlu2 %v1503_v19  ;;  %1536 = vmin.xlane.f32.xlu1 %v1535_v61  ;;  %vm1490_vm12 = vcmp.ge.f32.partialorder %v3408_v58, %v3445_v30 }
 0x372   : > { %v1508_v3 = vshll.u32 %v1507_v63, 16  ;;  %v1540_v4 = vshll.u32 %v1539_v0, 16  ;;  %vm1566_vm14 = vmxor %vm1490_vm12, %vm2949_vm6 }
 0x376   : > { %v3474_v27 = vpop.xlane.xlu0 %590 }
 0x377   : > { %vm592_vm4 = vcmp.eq.f32.partialorder %v589_v49, %v3474_v27 }
 0x378   : > { %v593_v29 = vsel %vm592_vm4, %v588_v28, inf }
 0x379   : > { %594 = vmin.xlane.f32.xlu2 %v593_v29 }
 0x37e   : > { %v3477_v35 = vpop.xlane.xlu0 %1546 }
 0x37f   : > { %vm1548_vm15 = vcmp.eq.f32.partialorder %v1545_v55, %v3477_v35  ;;  %v1553_v61 = vcvt.f32.s32 %v3477_v35 }
 0x380   : > { %v1549_v34 = vsel %vm1548_vm15, %v1544_v33, inf  ;;  %vm1491_vm15 = vcmp.ge.f32.partialorder %v3443_v26, %v3441_v25 }
 0x381   : > { %1550 = vmin.xlane.f32.xlu2 %v1549_v34  ;;  %v1554_v24 = vshll.u32 %v1553_v61, 16 }
 0x3d4   : > { %v613_v44 = vpop.xlane.xlu0 %612  ;;  %v581_v45 = vpop.xlane.xlu1 %580 }
 0x3d5   : > { %v614_v47 = vcvt.f32.s32 %v613_v44  ;;  %v582_v51 = vcvt.f32.s32 %v581_v45 }
 0x3d7   : > { %v617_v49 = vadd.s32 %v616_v62, %v614_v47  ;;  %v585_v48 = vadd.s32 %v584_v39, %v582_v51 }
 0x3d9   : > { %vm644_vm2 = vcmp.eq.s32.totalorder %v3256_v42, %v617_v49  ;;  %vm632_vm3 = vcmp.eq.s32.totalorder %v3256_v42, %v585_v48 }
 0x3da   : > { %vm650_vm5 = vmand %vm642_vm1, %vm644_vm2 }
 0x3db   : > { %v3486_v55 = vsel %vm650_vm5, -inf, %v3360_v43  ;;  %vm638_vm7 = vmand %vm566_vm0, %vm632_vm3  ;;  %v1521_v43 = vcvt.f32.s32 %v3471_v9 }
 0x3dc   : > { %658 = vmax.xlane.f32.xlu2 %v3486_v55  ;;  %v3490_v37 = vsel %vm638_vm7, -inf, %v3367_v46  ;;  %v627_v18 = vpop.xlane.xlu1 %626 }
 0x3dd   : > { %654 = vmax.xlane.f32.xlu0 %v3490_v37  ;;  %v628_v7 = vcvt.f32.s32 %v627_v18  ;;  %v1522_v8 = vshll.u32 %v1521_v43, 16 }
 0x3df   : > { %v631_v53 = vadd.s32 %v630_v54, %v628_v7 }
 0x3e1   : > { %vm645_vm10 = vcmp.eq.s32.totalorder %v3256_v42, %v631_v53 }
 0x3e2   : > { %vm651_vm11 = vmand %vm643_vm9, %vm645_vm10 }
 0x3e3   : > { %v3502_v46 = vsel %vm651_vm11, -inf, %v3383_v60  ;;  %v1519_v5 = vpop.xlane.xlu0 %1518  ;;  %v597_v60 = vcvt.f32.s32 %v3474_v27  ;;  %vm1567_vm9 = vmxor %vm1491_vm15, %vm2949_vm6 }
 0x3e4   : > { %v1505_v1 = vpop.xlane.xlu2 %1504  ;;  %v1537_v2 = vpop.xlane.xlu1 %1536  ;;  %v1520_v40 = vcvt.f32.s32 %v1519_v5 }
 0x3e5   : > { %v1506_v38 = vcvt.f32.s32 %v1505_v1  ;;  %660 = vmax.xlane.f32.xlu0 %v3502_v46  ;;  %v1538_v6 = vcvt.f32.s32 %v1537_v2  ;;  %v598_v14 = vshll.u32 %v597_v60, 16 }
 0x3e6   : > { %v1523_v12 = vadd.s32 %v1522_v8, %v1520_v40 }
 0x3e7   : > { %v1509_v11 = vadd.s32 %v1508_v3, %v1506_v38  ;;  %v1541_v9 = vadd.s32 %v1540_v4, %v1538_v6 }
 0x3e8   : > { %vm1557_vm1 = vcmp.eq.s32.totalorder %v3256_v42, %v1523_v12 }
 0x3e9   : > { %vm1556_vm13 = vcmp.eq.s32.totalorder %v3256_v42, %v1509_v11  ;;  %vm1568_vm4 = vcmp.eq.s32.totalorder %v3256_v42, %v1541_v9  ;;  %vm1563_vm2 = vmand %vm1491_vm15, %vm1557_vm1 }
 0x3ea   : > { %vm1562_vm0 = vmand %vm1490_vm12, %vm1556_vm13  ;;  %v3522_v13 = vsel %vm1563_vm2, -inf, %v3401_v15 }
 0x3eb   : > { %v3515_v58 = vsel %vm1562_vm0, -inf, %v3356_v36  ;;  %vm1574_vm3 = vmand %vm1566_vm14, %vm1568_vm4  ;;  %1580 = vmax.xlane.f32.xlu2 %v3522_v13 }
 0x3ec   : > { %v595_v30 = vpop.xlane.xlu2 %594  ;;  %1578 = vmax.xlane.f32.xlu1 %v3515_v58  ;;  %v3526_v19 = vsel %vm1574_vm3, -inf, %v3405_v57 }
 0x3ed   : > { %v596_v17 = vcvt.f32.s32 %v595_v30  ;;  %1582 = vmax.xlane.f32.xlu0 %v3526_v19 }
 0x3ef   : > { %v599_v36 = vadd.s32 %v598_v14, %v596_v17 }
 0x3f1   : > { %vm633_vm5 = vcmp.eq.s32.totalorder %v3256_v42, %v599_v36 }
 0x3f2   : > { %vm639_vm7 = vmand %vm567_vm8, %vm633_vm5  ;;  %vm664_vm8 = vcmp.eq.s32.totalorder %v3256_v42, 2 }
 0x3f3   : > { %v3535_v15 = vsel %vm639_vm7, -inf, %v3379_v56 }
 0x3f4   : > { %v1551_v23 = vpop.xlane.xlu2 %1550  ;;  %656 = vmax.xlane.f32.xlu1 %v3535_v15 }
 0x3f5   : > { %v1552_v57 = vcvt.f32.s32 %v1551_v23 }
 0x3f7   : > { %v1555_v27 = vadd.s32 %v1554_v24, %v1552_v57 }
 0x3f9   : > { %vm1569_vm10 = vcmp.eq.s32.totalorder %v3256_v42, %v1555_v27 }
 0x3fa   : > { %vm1575_vm11 = vmand %vm1567_vm9, %vm1569_vm10 }
 0x3fb   : > { %v3544_v16 = vsel %vm1575_vm11, -inf, %v3397_v52 }
 0x3fc   : > { %1584 = vmax.xlane.f32.xlu1 %v3544_v16 }
 0x44f   : > { %v3547_v56 = vpop.xlane.xlu2 %658 }
 0x450   : > { %v3550_v20 = vpop.xlane.xlu0 %654 }
 0x451   : > { %v662_v28 = vmax.f32 %v3550_v20, %v3547_v56 }
 0x453   : > { %v3557_v25 = vsel %vm664_vm8, %v662_v28, %v3422_v50  ;;  %vm701_vm12 = vcmp.eq.f32.partialorder %v3486_v55, %v662_v28  ;;  %vm669_vm13 = vcmp.eq.f32.partialorder %v3490_v37, %v662_v28 }
 0x454   : > { %v703_v52 = vsel %vm701_vm12, %v3256_v42, 128  ;;  %v671_v26 = vsel %vm669_vm13, %v3256_v42, 128  ;;  %vm667_vm13 = vcmp.ge.f32.partialorder %v3550_v20, %v3547_v56 }
 0x455   : > { %v706_v29 = vshra.s32 %v703_v52, 16  ;;  %v674_v32 = vshra.s32 %v671_v26, 16  ;;  %v705_v40 = vand.u32 65535, %v703_v52 }
 0x457   : > { %v708_v35 = vcvt.s32.f32 %v706_v29  ;;  %v676_v33 = vcvt.s32.f32 %v674_v32  ;;  %v707_v60 = vcvt.s32.f32 %v705_v40 }
 0x458   : > { %v3563_v34 = vpop.xlane.xlu0 %660 }
 0x459   : > { %709 = vmin.xlane.f32.xlu1 %v708_v35  ;;  %677 = vmin.xlane.f32.xlu2 %v676_v33 }
 0x45e   : > { %v3592_v53 = vpop.xlane.xlu2 %1580 }
 0x45f   : > { %v3565_v21 = vpop.xlane.xlu1 %1578 }
 0x460   : > { %v3567_v50 = vpop.xlane.xlu0 %1582 }
 0x461   : > { %v1586_v41 = vmax.f32 %v3565_v21, %v3567_v50 }
 0x463   : > { %v3574_v44 = vsel %vm664_vm8, %v1586_v41, %v3460_v31  ;;  %vm1592_vm14 = vcmp.eq.f32.partialorder %v3515_v58, %v1586_v41  ;;  %vm1624_vm0 = vcmp.eq.f32.partialorder %v3526_v19, %v1586_v41 }
 0x464   : > { %v1594_v45 = vsel %vm1592_vm14, %v3256_v42, 128  ;;  %vm743_vm14 = vmxor %vm667_vm13, %vm2949_vm6 }
 0x465   : > { %v1597_v39 = vshra.s32 %v1594_v45, 16  ;;  %v1596_v17 = vand.u32 65535, %v1594_v45 }
 0x467   : > { %v3578_v62 = vpop.xlane.xlu1 %656  ;;  %v1599_v51 = vcvt.s32.f32 %v1597_v39  ;;  %v1598_v61 = vcvt.s32.f32 %v1596_v17 }
 0x468   : > { %v663_v47 = vmax.f32 %v3578_v62, %v3563_v34 }
 0x469   : > { %1600 = vmin.xlane.f32.xlu0 %v1599_v51 }
 0x46a   : > { %v3585_v49 = vsel %vm664_vm8, %v663_v47, %v3437_v22  ;;  %vm702_vm4 = vcmp.eq.f32.partialorder %v3502_v46, %v663_v47  ;;  %vm670_vm15 = vcmp.eq.f32.partialorder %v3535_v15, %v663_v47  ;;  %v1626_v22 = vsel %vm1624_vm0, %v3256_v42, 128 }
 0x46b   : > { %v704_v31 = vsel %vm702_vm4, %v3256_v42, 128  ;;  %v672_v48 = vsel %vm670_vm15, %v3256_v42, 128  ;;  %v1629_v1 = vshra.s32 %v1626_v22, 16 }
 0x46c   : > { %v720_v59 = vshra.s32 %v704_v31, 16  ;;  %v688_v18 = vshra.s32 %v672_v48, 16  ;;  %v719_v24 = vand.u32 65535, %v704_v31  ;;  %v687_v57 = vand.u32 65535, %v672_v48 }
 0x46d   : > { %v1631_v5 = vcvt.s32.f32 %v1629_v1 }
 0x46e   : > { %v722_v54 = vcvt.s32.f32 %v720_v59  ;;  %v690_v7 = vcvt.s32.f32 %v688_v18  ;;  %v721_v28 = vcvt.s32.f32 %v719_v24 }
 0x46f   : > { %v3594_v63 = vpop.xlane.xlu1 %1584 }
 0x470   : > { %v1587_v0 = vmax.f32 %v3592_v53, %v3594_v63  ;;  %723 = vmin.xlane.f32.xlu2 %v722_v54 }
 0x471   : > { %691 = vmin.xlane.f32.xlu0 %v690_v7 }
 0x472   : > { %v3602_v43 = vsel %vm664_vm8, %v1587_v0, %v3454_v10  ;;  %vm1625_vm1 = vcmp.eq.f32.partialorder %v3544_v16, %v1587_v0  ;;  %vm1593_vm2 = vcmp.eq.f32.partialorder %v3522_v13, %v1587_v0  ;;  %v673_v10 = vand.u32 65535, %v671_v26 }
 0x473   : > { %v1627_v2 = vsel %vm1625_vm1, %v3256_v42, 128  ;;  %v1595_v3 = vsel %vm1593_vm2, %v3256_v42, 128  ;;  %v689_v26 = vcvt.s32.f32 %v687_v57  ;;  %vm1590_vm2 = vcmp.ge.f32.partialorder %v3565_v21, %v3567_v50 }
 0x474   : > { %v1643_v4 = vshra.s32 %v1627_v2, 16  ;;  %v1611_v38 = vshra.s32 %v1595_v3, 16  ;;  %v675_v12 = vcvt.s32.f32 %v673_v10  ;;  %v1642_v41 = vand.u32 65535, %v1627_v2 }
 0x476   : > { %v1645_v6 = vcvt.s32.f32 %v1643_v4  ;;  %v1613_v8 = vcvt.s32.f32 %v1611_v38  ;;  %v1644_v48 = vcvt.s32.f32 %v1642_v41 }
 0x478   : > { %1632 = vmin.xlane.f32.xlu2 %v1631_v5  ;;  %1614 = vmin.xlane.f32.xlu1 %v1613_v8 }
 0x479   : > { %1646 = vmin.xlane.f32.xlu0 %v1645_v6 }
 0x4cc   : > { %v678_v11 = vpop.xlane.xlu2 %677  ;;  %v710_v9 = vpop.xlane.xlu1 %709 }
 0x4cd   : > { %vm679_vm3 = vcmp.eq.f32.partialorder %v676_v33, %v678_v11  ;;  %vm711_vm5 = vcmp.eq.f32.partialorder %v708_v35, %v710_v9  ;;  %v1628_v35 = vand.u32 65535, %v1626_v22  ;;  %v1610_v33 = vand.u32 65535, %v1595_v3 }
 0x4ce   : > { %v680_v30 = vsel %vm679_vm3, %v675_v12, inf  ;;  %v712_v14 = vsel %vm711_vm5, %v707_v60, inf  ;;  %v716_v22 = vcvt.f32.s32 %v710_v9 }
 0x4cf   : > { %681 = vmin.xlane.f32.xlu1 %v680_v30  ;;  %713 = vmin.xlane.f32.xlu0 %v712_v14  ;;  %v1630_v47 = vcvt.s32.f32 %v1628_v35 }
 0x4d0   : > { %v717_v3 = vshll.u32 %v716_v22, 16 }
 0x4dc   : > { %v1601_v36 = vpop.xlane.xlu0 %1600 }
 0x4dd   : > { %vm1602_vm7 = vcmp.eq.f32.partialorder %v1599_v51, %v1601_v36  ;;  %v1612_v51 = vcvt.s32.f32 %v1610_v33  ;;  %v1607_v56 = vcvt.f32.s32 %v1601_v36 }
 0x4de   : > { %v1603_v23 = vsel %vm1602_vm7, %v1598_v61, inf  ;;  %vm668_vm7 = vcmp.ge.f32.partialorder %v3578_v62, %v3563_v34 }
 0x4df   : > { %1604 = vmin.xlane.f32.xlu2 %v1603_v23  ;;  %v1608_v40 = vshll.u32 %v1607_v56, 16 }
 0x4e3   : > { %v724_v27 = vpop.xlane.xlu2 %723 }
 0x4e4   : > { %vm725_vm9 = vcmp.eq.f32.partialorder %v722_v54, %v724_v27  ;;  %v692_v52 = vpop.xlane.xlu0 %691  ;;  %v730_v9 = vcvt.f32.s32 %v724_v27 }
 0x4e5   : > { %v726_v29 = vsel %vm725_vm9, %v721_v28, inf  ;;  %vm693_vm10 = vcmp.eq.f32.partialorder %v690_v7, %v692_v52  ;;  %v684_v7 = vcvt.f32.s32 %v678_v11  ;;  %v698_v60 = vcvt.f32.s32 %v692_v52  ;;  %vm744_vm9 = vmxor %vm668_vm7, %vm2949_vm6 }
 0x4e6   : > { %727 = vmin.xlane.f32.xlu1 %v726_v29  ;;  %v694_v32 = vsel %vm693_vm10, %v689_v26, inf }
 0x4e7   : > { %695 = vmin.xlane.f32.xlu2 %v694_v32  ;;  %v685_v2 = vshll.u32 %v684_v7, 16  ;;  %v699_v36 = vshll.u32 %v698_v60, 16 }
 0x4eb   : > { %v3608_v45 = vpop.xlane.xlu2 %1632  ;;  %v3610_v39 = vpop.xlane.xlu1 %1614 }
 0x4ec   : > { %vm1634_vm11 = vcmp.eq.f32.partialorder %v1631_v5, %v3608_v45  ;;  %vm1616_vm8 = vcmp.eq.f32.partialorder %v1613_v8, %v3610_v39  ;;  %v3614_v31 = vpop.xlane.xlu0 %1646  ;;  %v1639_v24 = vcvt.f32.s32 %v3608_v45  ;;  %v1621_v57 = vcvt.f32.s32 %v3610_v39 }
 0x4ed   : > { %v1635_v59 = vsel %vm1634_vm11, %v1630_v47, inf  ;;  %v1617_v18 = vsel %vm1616_vm8, %v1612_v51, inf  ;;  %vm1648_vm12 = vcmp.eq.f32.partialorder %v1645_v6, %v3614_v31 }
 0x4ee   : > { %1636 = vmin.xlane.f32.xlu1 %v1635_v59  ;;  %1618 = vmin.xlane.f32.xlu0 %v1617_v18  ;;  %v1649_v54 = vsel %vm1648_vm12, %v1644_v48, inf  ;;  %v1640_v52 = vshll.u32 %v1639_v24, 16  ;;  %v1622_v32 = vshll.u32 %v1621_v57, 16 }
 0x4ef   : > { %1650 = vmin.xlane.f32.xlu2 %v1649_v54 }
 0x542   : > { %v714_v0 = vpop.xlane.xlu0 %713  ;;  %v682_v1 = vpop.xlane.xlu1 %681 }
 0x543   : > { %v715_v4 = vcvt.f32.s32 %v714_v0  ;;  %v683_v38 = vcvt.f32.s32 %v682_v1 }
 0x545   : > { %v718_v5 = vadd.s32 %v717_v3, %v715_v4  ;;  %v686_v8 = vadd.s32 %v685_v2, %v683_v38 }
 0x547   : > { %vm745_vm4 = vcmp.eq.s32.totalorder %v3256_v42, %v718_v5  ;;  %vm733_vm15 = vcmp.eq.s32.totalorder %v3256_v42, %v686_v8 }
 0x548   : > { %vm751_vm0 = vmand %vm743_vm14, %vm745_vm4 }
 0x549   : > { %v3623_v6 = vsel %vm751_vm0, -inf, %v3486_v55  ;;  %vm739_vm1 = vmand %vm667_vm13, %vm733_vm15  ;;  %vm1591_vm13 = vcmp.ge.f32.partialorder %v3592_v53, %v3594_v63 }
 0x54a   : > { %759 = vmax.xlane.f32.xlu2 %v3623_v6  ;;  %v3627_v10 = vsel %vm739_vm1, -inf, %v3490_v37  ;;  %v731_v37 = vshll.u32 %v730_v9, 16  ;;  %vm1666_vm14 = vmxor %vm1590_vm2, %vm2949_vm6 }
 0x54b   : > { %755 = vmax.xlane.f32.xlu0 %v3627_v10  ;;  %vm1667_vm4 = vmxor %vm1591_vm13, %vm2949_vm6 }
 0x552   : > { %v1605_v20 = vpop.xlane.xlu2 %1604 }
 0x553   : > { %v1606_v11 = vcvt.f32.s32 %v1605_v20 }
 0x555   : > { %v1609_v12 = vadd.s32 %v1608_v40, %v1606_v11 }
 0x557   : > { %vm1656_vm3 = vcmp.eq.s32.totalorder %v3256_v42, %v1609_v12 }
 0x558   : > { %vm1662_vm5 = vmand %vm1590_vm2, %vm1656_vm3  ;;  %vm765_vm2 = vcmp.eq.s32.totalorder %v3256_v42, 3 }
 0x559   : > { %v728_v55 = vpop.xlane.xlu1 %727  ;;  %v3637_v30 = vsel %vm1662_vm5, -inf, %v3515_v58  ;;  %v1653_v58 = vcvt.f32.s32 %v3614_v31 }
 0x55a   : > { %v729_v14 = vcvt.f32.s32 %v728_v55  ;;  %v696_v17 = vpop.xlane.xlu2 %695  ;;  %1678 = vmax.xlane.f32.xlu1 %v3637_v30 }
 0x55b   : > { %v697_v61 = vcvt.f32.s32 %v696_v17  ;;  %v1654_v45 = vshll.u32 %v1653_v58, 16 }
 0x55c   : > { %v732_v23 = vadd.s32 %v731_v37, %v729_v14 }
 0x55d   : > { %v700_v27 = vadd.s32 %v699_v36, %v697_v61 }
 0x55e   : > { %vm746_vm10 = vcmp.eq.s32.totalorder %v3256_v42, %v732_v23 }
 0x55f   : > { %vm752_vm11 = vmand %vm744_vm9, %vm746_vm10  ;;  %vm734_vm8 = vcmp.eq.s32.totalorder %v3256_v42, %v700_v27 }
 0x560   : > { %v3652_v28 = vsel %vm752_vm11, -inf, %v3502_v46  ;;  %vm740_vm12 = vmand %vm668_vm7, %vm734_vm8 }
 0x561   : > { %v1619_v26 = vpop.xlane.xlu0 %1618  ;;  %761 = vmax.xlane.f32.xlu0 %v3652_v28  ;;  %v1637_v29 = vpop.xlane.xlu1 %1636  ;;  %v3659_v35 = vsel %vm740_vm12, -inf, %v3535_v15 }
 0x562   : > { %v1620_v33 = vcvt.f32.s32 %v1619_v26  ;;  %v1638_v41 = vcvt.f32.s32 %v1637_v29  ;;  %v1651_v46 = vpop.xlane.xlu2 %1650  ;;  %757 = vmax.xlane.f32.xlu1 %v3659_v35 }
 0x563   : > { %v1652_v39 = vcvt.f32.s32 %v1651_v46 }
 0x564   : > { %v1623_v34 = vadd.s32 %v1622_v32, %v1620_v33  ;;  %v1641_v62 = vadd.s32 %v1640_v52, %v1638_v41 }
 0x565   : > { %v1655_v47 = vadd.s32 %v1654_v45, %v1652_v39 }
 0x566   : > { %vm1657_vm15 = vcmp.eq.s32.totalorder %v3256_v42, %v1623_v34  ;;  %vm1668_vm0 = vcmp.eq.s32.totalorder %v3256_v42, %v1641_v62 }
 0x567   : > { %vm1663_vm1 = vmand %vm1591_vm13, %vm1657_vm15  ;;  %vm1669_vm3 = vcmp.eq.s32.totalorder %v3256_v42, %v1655_v47 }
 0x568   : > { %v3673_v15 = vsel %vm1663_vm1, -inf, %v3522_v13  ;;  %vm1674_vm5 = vmand %vm1666_vm14, %vm1668_vm0 }
 0x569   : > { %vm1675_vm7 = vmand %vm1667_vm4, %vm1669_vm3  ;;  %1680 = vmax.xlane.f32.xlu2 %v3673_v15  ;;  %v3677_v21 = vsel %vm1674_vm5, -inf, %v3526_v19 }
 0x56a   : > { %v3680_v50 = vsel %vm1675_vm7, -inf, %v3544_v16  ;;  %1682 = vmax.xlane.f32.xlu0 %v3677_v21 }
 0x56b   : > { %1684 = vmax.xlane.f32.xlu1 %v3680_v50 }
 0x5bd   : > { %v3684_v53 = vpop.xlane.xlu2 %759 }
 0x5be   : > { %v3687_v13 = vpop.xlane.xlu0 %755 }
 0x5bf   : > { %v763_v63 = vmax.f32 %v3687_v13, %v3684_v53 }
 0x5c1   : > { %v3694_v19 = vsel %vm765_vm2, %v763_v63, %v3557_v25  ;;  %vm802_vm9 = vcmp.eq.f32.partialorder %v3623_v6, %v763_v63  ;;  %vm770_vm10 = vcmp.eq.f32.partialorder %v3627_v10, %v763_v63 }
 0x5c2   : > { %v804_v16 = vsel %vm802_vm9, %v3256_v42, 128  ;;  %v772_v51 = vsel %vm770_vm10, %v3256_v42, 128  ;;  %vm768_vm10 = vcmp.ge.f32.partialorder %v3687_v13, %v3684_v53 }
 0x5c3   : > { %v807_v31 = vshra.s32 %v804_v16, 16  ;;  %v775_v48 = vshra.s32 %v772_v51, 16  ;;  %v774_v57 = vand.u32 65535, %v772_v51  ;;  %v806_v27 = vand.u32 65535, %v804_v16 }
 0x5c5   : > { %v809_v59 = vcvt.s32.f32 %v807_v31  ;;  %v777_v18 = vcvt.s32.f32 %v775_v48  ;;  %v776_v26 = vcvt.s32.f32 %v774_v57  ;;  %v808_v29 = vcvt.s32.f32 %v806_v27 }
 0x5c7   : > { %810 = vmin.xlane.f32.xlu1 %v809_v59  ;;  %778 = vmin.xlane.f32.xlu2 %v777_v18 }
 0x5cd   : > { %v3700_v54 = vpop.xlane.xlu1 %1678 }
 0x5d4   : > { %v3702_v7 = vpop.xlane.xlu0 %761 }
 0x5d5   : > { %v3704_v25 = vpop.xlane.xlu1 %757 }
 0x5d6   : > { %v764_v22 = vmax.f32 %v3704_v25, %v3702_v7 }
 0x5d8   : > { %v3711_v0 = vsel %vm765_vm2, %v764_v22, %v3585_v49  ;;  %vm803_vm11 = vcmp.eq.f32.partialorder %v3652_v28, %v764_v22  ;;  %vm771_vm14 = vcmp.eq.f32.partialorder %v3659_v35, %v764_v22 }
 0x5d9   : > { %v805_v1 = vsel %vm803_vm11, %v3256_v42, 128  ;;  %v773_v17 = vsel %vm771_vm14, %v3256_v42, 128  ;;  %vm844_vm11 = vmxor %vm768_vm10, %vm2949_vm6 }
 0x5da   : > { %v821_v2 = vshra.s32 %v805_v1, 16  ;;  %v820_v41 = vand.u32 65535, %v805_v1 }
 0x5dc   : > { %v3715_v3 = vpop.xlane.xlu2 %1680  ;;  %v823_v38 = vcvt.s32.f32 %v821_v2  ;;  %v822_v45 = vcvt.s32.f32 %v820_v41  ;;  %v788_v2 = vand.u32 65535, %v773_v17 }
 0x5dd   : > { %v3717_v4 = vpop.xlane.xlu0 %1682 }
 0x5de   : > { %v1686_v5 = vmax.f32 %v3700_v54, %v3717_v4  ;;  %v3721_v8 = vpop.xlane.xlu1 %1684  ;;  %824 = vmin.xlane.f32.xlu2 %v823_v38 }
 0x5df   : > { %v1687_v56 = vmax.f32 %v3715_v3, %v3721_v8 }
 0x5e0   : > { %v3728_v49 = vsel %vm765_vm2, %v1686_v5, %v3574_v44  ;;  %vm1692_vm8 = vcmp.eq.f32.partialorder %v3637_v30, %v1686_v5  ;;  %vm1724_vm12 = vcmp.eq.f32.partialorder %v3677_v21, %v1686_v5  ;;  %v790_v5 = vcvt.s32.f32 %v788_v2 }
 0x5e1   : > { %v3735_v20 = vsel %vm765_vm2, %v1687_v56, %v3602_v43  ;;  %v1694_v40 = vsel %vm1692_vm8, %v3256_v42, 128  ;;  %v1726_v11 = vsel %vm1724_vm12, %v3256_v42, 128  ;;  %vm1693_vm13 = vcmp.eq.f32.partialorder %v3673_v15, %v1687_v56 }
 0x5e2   : > { %v1697_v9 = vshra.s32 %v1694_v40, 16  ;;  %v1729_v12 = vshra.s32 %v1726_v11, 16  ;;  %v1695_v44 = vsel %vm1693_vm13, %v3256_v42, 128  ;;  %v789_v43 = vshra.s32 %v773_v17, 16 }
 0x5e3   : > { %v1711_v60 = vshra.s32 %v1695_v44, 16  ;;  %vm1725_vm4 = vcmp.eq.f32.partialorder %v3680_v50, %v1687_v56  ;;  %v1696_v34 = vand.u32 65535, %v1694_v40  ;;  %v1728_v62 = vand.u32 65535, %v1726_v11 }
 0x5e4   : > { %v1699_v55 = vcvt.s32.f32 %v1697_v9  ;;  %v1731_v37 = vcvt.s32.f32 %v1729_v12  ;;  %v791_v36 = vcvt.s32.f32 %v789_v43  ;;  %v1727_v61 = vsel %vm1725_vm4, %v3256_v42, 128 }
 0x5e5   : > { %v1713_v14 = vcvt.s32.f32 %v1711_v60  ;;  %v1743_v23 = vshra.s32 %v1727_v61, 16  ;;  %v1710_v47 = vand.u32 65535, %v1695_v44  ;;  %v1698_v16 = vcvt.s32.f32 %v1696_v34 }
 0x5e6   : > { %1700 = vmin.xlane.f32.xlu0 %v1699_v55  ;;  %1732 = vmin.xlane.f32.xlu2 %v1731_v37  ;;  %v1730_v48 = vcvt.s32.f32 %v1728_v62  ;;  %v1742_v40 = vand.u32 65535, %v1727_v61  ;;  %vm769_vm4 = vcmp.ge.f32.partialorder %v3704_v25, %v3702_v7 }
 0x5e7   : > { %1714 = vmin.xlane.f32.xlu1 %v1713_v14  ;;  %v1745_v24 = vcvt.s32.f32 %v1743_v23 }
 0x5e8   : > { %v1744_v9 = vcvt.s32.f32 %v1742_v40 }
 0x5ee   : > { %792 = vmin.xlane.f32.xlu0 %v791_v36 }
 0x5f6   : > { %1746 = vmin.xlane.f32.xlu0 %v1745_v24 }
 0x63a   : > { %v779_v58 = vpop.xlane.xlu2 %778  ;;  %v811_v52 = vpop.xlane.xlu1 %810 }
 0x63b   : > { %vm780_vm15 = vcmp.eq.f32.partialorder %v777_v18, %v779_v58  ;;  %vm812_vm0 = vcmp.eq.f32.partialorder %v809_v59, %v811_v52  ;;  %v1712_v18 = vcvt.s32.f32 %v1710_v47  ;;  %v785_v44 = vcvt.f32.s32 %v779_v58 }
 0x63c   : > { %v781_v32 = vsel %vm780_vm15, %v776_v26, inf  ;;  %v813_v33 = vsel %vm812_vm0, %v808_v29, inf  ;;  %v817_v60 = vcvt.f32.s32 %v811_v52  ;;  %vm845_vm15 = vmxor %vm769_vm4, %vm2949_vm6 }
 0x63d   : > { %782 = vmin.xlane.f32.xlu1 %v781_v32  ;;  %814 = vmin.xlane.f32.xlu0 %v813_v33 }
 0x63e   : > { %v818_v17 = vshll.u32 %v817_v60, 16 }
 0x651   : > { %v825_v46 = vpop.xlane.xlu2 %824 }
 0x652   : > { %vm826_vm1 = vcmp.eq.f32.partialorder %v823_v38, %v825_v46  ;;  %v831_v53 = vcvt.f32.s32 %v825_v46 }
 0x653   : > { %v827_v39 = vsel %vm826_vm1, %v822_v45, inf }
 0x654   : > { %828 = vmin.xlane.f32.xlu1 %v827_v39  ;;  %v832_v27 = vshll.u32 %v831_v53, 16 }
 0x659   : > { %v1701_v63 = vpop.xlane.xlu0 %1700  ;;  %v3745_v51 = vpop.xlane.xlu2 %1732 }
 0x65a   : > { %v3747_v31 = vpop.xlane.xlu1 %1714  ;;  %vm1702_vm3 = vcmp.eq.f32.partialorder %v1699_v55, %v1701_v63  ;;  %vm1734_vm5 = vcmp.eq.f32.partialorder %v1731_v37, %v3745_v51  ;;  %v1707_v26 = vcvt.f32.s32 %v1701_v63 }
 0x65b   : > { %v1703_v59 = vsel %vm1702_vm3, %v1698_v16, inf  ;;  %v1735_v22 = vsel %vm1734_vm5, %v1730_v48, inf  ;;  %vm1716_vm7 = vcmp.eq.f32.partialorder %v1713_v14, %v3747_v31  ;;  %v786_v14 = vshll.u32 %v785_v44, 16 }
 0x65c   : > { %1704 = vmin.xlane.f32.xlu2 %v1703_v59  ;;  %1736 = vmin.xlane.f32.xlu1 %v1735_v22  ;;  %v1717_v1 = vsel %vm1716_vm7, %v1712_v18, inf  ;;  %v1708_v33 = vshll.u32 %v1707_v26, 16  ;;  %vm1690_vm3 = vcmp.ge.f32.partialorder %v3700_v54, %v3717_v4 }
 0x65d   : > { %1718 = vmin.xlane.f32.xlu0 %v1717_v1  ;;  %vm1766_vm5 = vmxor %vm1690_vm3, %vm2949_vm6 }
 0x661   : > { %v3751_v38 = vpop.xlane.xlu0 %792 }
 0x662   : > { %vm794_vm2 = vcmp.eq.f32.partialorder %v791_v36, %v3751_v38 }
 0x663   : > { %v795_v56 = vsel %vm794_vm2, %v790_v5, inf }
 0x664   : > { %796 = vmin.xlane.f32.xlu2 %v795_v56 }
 0x669   : > { %v3754_v11 = vpop.xlane.xlu0 %1746 }
 0x66a   : > { %vm1748_vm9 = vcmp.eq.f32.partialorder %v1745_v24, %v3754_v11  ;;  %v1753_v22 = vcvt.f32.s32 %v3754_v11 }
 0x66b   : > { %v1749_v12 = vsel %vm1748_vm9, %v1744_v9, inf }
 0x66c   : > { %1750 = vmin.xlane.f32.xlu2 %v1749_v12 }
 0x6b0   : > { %v815_v55 = vpop.xlane.xlu0 %814  ;;  %v783_v37 = vpop.xlane.xlu1 %782 }
 0x6b1   : > { %v816_v43 = vcvt.f32.s32 %v815_v55  ;;  %v784_v23 = vcvt.f32.s32 %v783_v37 }
 0x6b3   : > { %v819_v36 = vadd.s32 %v818_v17, %v816_v43  ;;  %v787_v61 = vadd.s32 %v786_v14, %v784_v23 }
 0x6b5   : > { %vm846_vm8 = vcmp.eq.s32.totalorder %v3256_v42, %v819_v36  ;;  %vm834_vm12 = vcmp.eq.s32.totalorder %v3256_v42, %v787_v61 }
 0x6b6   : > { %vm852_vm13 = vmand %vm844_vm11, %vm846_vm8 }
 0x6b7   : > { %v3763_v24 = vsel %vm852_vm13, -inf, %v3623_v6  ;;  %vm840_vm14 = vmand %vm768_vm10, %vm834_vm12  ;;  %v1739_v6 = vcvt.f32.s32 %v3745_v51  ;;  %vm1691_vm10 = vcmp.ge.f32.partialorder %v3715_v3, %v3721_v8 }
 0x6b8   : > { %860 = vmax.xlane.f32.xlu2 %v3763_v24  ;;  %v3767_v57 = vsel %vm840_vm14, -inf, %v3627_v10  ;;  %v1721_v10 = vcvt.f32.s32 %v3747_v31 }
 0x6b9   : > { %856 = vmax.xlane.f32.xlu0 %v3767_v57  ;;  %v1740_v45 = vshll.u32 %v1739_v6, 16 }
 0x6ba   : > { %v1722_v62 = vshll.u32 %v1721_v10, 16 }
 0x6c7   : > { %v829_v13 = vpop.xlane.xlu1 %828 }
 0x6c8   : > { %v830_v58 = vcvt.f32.s32 %v829_v13 }
 0x6ca   : > { %v833_v52 = vadd.s32 %v832_v27, %v830_v58 }
 0x6cc   : > { %vm847_vm0 = vcmp.eq.s32.totalorder %v3256_v42, %v833_v52 }
 0x6cd   : > { %vm853_vm1 = vmand %vm845_vm15, %vm847_vm0 }
 0x6ce   : > { %v3780_v32 = vsel %vm853_vm1, -inf, %v3652_v28  ;;  %v799_v28 = vcvt.f32.s32 %v3751_v38  ;;  %vm1767_vm15 = vmxor %vm1691_vm10, %vm2949_vm6 }
 0x6cf   : > { %v1705_v29 = vpop.xlane.xlu2 %1704  ;;  %862 = vmax.xlane.f32.xlu0 %v3780_v32  ;;  %v1737_v46 = vpop.xlane.xlu1 %1736 }
 0x6d0   : > { %v1706_v41 = vcvt.f32.s32 %v1705_v29  ;;  %v1719_v39 = vpop.xlane.xlu0 %1718  ;;  %v1738_v34 = vcvt.f32.s32 %v1737_v46  ;;  %v800_v48 = vshll.u32 %v799_v28, 16 }
 0x6d1   : > { %v1720_v63 = vcvt.f32.s32 %v1719_v39 }
 0x6d2   : > { %v1709_v47 = vadd.s32 %v1708_v33, %v1706_v41  ;;  %v1741_v16 = vadd.s32 %v1740_v45, %v1738_v34 }
 0x6d3   : > { %v1723_v51 = vadd.s32 %v1722_v62, %v1720_v63 }
 0x6d4   : > { %vm1756_vm7 = vcmp.eq.s32.totalorder %v3256_v42, %v1709_v47  ;;  %vm1768_vm9 = vcmp.eq.s32.totalorder %v3256_v42, %v1741_v16 }
 0x6d5   : > { %vm1762_vm2 = vmand %vm1690_vm3, %vm1756_vm7  ;;  %vm1757_vm11 = vcmp.eq.s32.totalorder %v3256_v42, %v1723_v51 }
 0x6d6   : > { %v3792_v54 = vsel %vm1762_vm2, -inf, %v3637_v30  ;;  %vm1774_vm8 = vmand %vm1766_vm5, %vm1768_vm9 }
 0x6d7   : > { %v797_v4 = vpop.xlane.xlu2 %796  ;;  %1778 = vmax.xlane.f32.xlu1 %v3792_v54  ;;  %vm1763_vm12 = vmand %vm1691_vm10, %vm1757_vm11  ;;  %v3800_v31 = vsel %vm1774_vm8, -inf, %v3677_v21 }
 0x6d8   : > { %v798_v59 = vcvt.f32.s32 %v797_v4  ;;  %v3803_v18 = vsel %vm1763_vm12, -inf, %v3673_v15  ;;  %1782 = vmax.xlane.f32.xlu0 %v3800_v31  ;;  %v1754_v15 = vshll.u32 %v1753_v22, 16 }
 0x6d9   : > { %1780 = vmax.xlane.f32.xlu2 %v3803_v18 }
 0x6da   : > { %v801_v30 = vadd.s32 %v800_v48, %v798_v59 }
 0x6dc   : > { %vm835_vm13 = vcmp.eq.s32.totalorder %v3256_v42, %v801_v30 }
 0x6dd   : > { %vm841_vm14 = vmand %vm769_vm4, %vm835_vm13  ;;  %vm866_vm4 = vcmp.eq.s32.totalorder %v3256_v42, 4 }
 0x6de   : > { %v3813_v21 = vsel %vm841_vm14, -inf, %v3659_v35 }
 0x6df   : > { %v1751_v1 = vpop.xlane.xlu2 %1750  ;;  %858 = vmax.xlane.f32.xlu1 %v3813_v21 }
 0x6e0   : > { %v1752_v2 = vcvt.f32.s32 %v1751_v1 }
 0x6e2   : > { %v1755_v38 = vadd.s32 %v1754_v15, %v1752_v2 }
 0x6e4   : > { %vm1769_vm0 = vcmp.eq.s32.totalorder %v3256_v42, %v1755_v38 }
 0x6e5   : > { %vm1775_vm1 = vmand %vm1767_vm15, %vm1769_vm0 }
 0x6e6   : > { %v3822_v7 = vsel %vm1775_vm1, -inf, %v3680_v50 }
 0x6e7   : > { %1784 = vmax.xlane.f32.xlu1 %v3822_v7 }
 0x72b   : > { %v3825_v35 = vpop.xlane.xlu2 %860 }
 0x72c   : > { %v3828_v25 = vpop.xlane.xlu0 %856 }
 0x72d   : > { %v864_v5 = vmax.f32 %v3828_v25, %v3825_v35  ;;  %vm869_vm3 = vcmp.ge.f32.partialorder %v3828_v25, %v3825_v35 }
 0x72f   : > { %v3837_v3 = vsel %vm866_vm4, %v864_v5, %v3694_v19  ;;  %vm903_vm5 = vcmp.eq.f32.partialorder %v3763_v24, %v864_v5  ;;  %vm871_vm7 = vcmp.eq.f32.partialorder %v3767_v57, %v864_v5 }
 0x730   : > { %v905_v50 = vsel %vm903_vm5, %v3256_v42, 128  ;;  %v873_v8 = vsel %vm871_vm7, %v3256_v42, 128 }
 0x731   : > { %v908_v56 = vshra.s32 %v905_v50, 16  ;;  %v876_v40 = vshra.s32 %v873_v8, 16  ;;  %v875_v47 = vand.u32 65535, %v873_v8 }
 0x733   : > { %v910_v11 = vcvt.s32.f32 %v908_v56  ;;  %v878_v9 = vcvt.s32.f32 %v876_v40  ;;  %v877_v28 = vcvt.s32.f32 %v875_v47 }
 0x735   : > { %911 = vmin.xlane.f32.xlu1 %v910_v11  ;;  %879 = vmin.xlane.f32.xlu2 %v878_v9 }
 0x742   : > { %v3843_v12 = vpop.xlane.xlu0 %862 }
 0x74a   : > { %v3845_v44 = vpop.xlane.xlu1 %1778 }
 0x74b   : > { %v3847_v19 = vpop.xlane.xlu0 %1782 }
 0x74c   : > { %v1786_v60 = vmax.f32 %v3845_v44, %v3847_v19  ;;  %v3874_v52 = vpop.xlane.xlu2 %1780 }
 0x74e   : > { %v3854_v55 = vsel %vm866_vm4, %v1786_v60, %v3728_v49  ;;  %vm1792_vm2 = vcmp.eq.f32.partialorder %v3792_v54, %v1786_v60  ;;  %vm1824_vm8 = vcmp.eq.f32.partialorder %v3800_v31, %v1786_v60 }
 0x74f   : > { %v1794_v37 = vsel %vm1792_vm2, %v3256_v42, 128 }
 0x750   : > { %v1797_v14 = vshra.s32 %v1794_v37, 16  ;;  %v1796_v59 = vand.u32 65535, %v1794_v37 }
 0x752   : > { %v3858_v17 = vpop.xlane.xlu1 %858  ;;  %v1799_v43 = vcvt.s32.f32 %v1797_v14  ;;  %v1798_v22 = vcvt.s32.f32 %v1796_v59 }
 0x753   : > { %v865_v23 = vmax.f32 %v3858_v17, %v3843_v12  ;;  %vm870_vm9 = vcmp.ge.f32.partialorder %v3858_v17, %v3843_v12 }
 0x754   : > { %1800 = vmin.xlane.f32.xlu0 %v1799_v43 }
 0x755   : > { %v3867_v49 = vsel %vm866_vm4, %v865_v23, %v3711_v0  ;;  %vm904_vm10 = vcmp.eq.f32.partialorder %v3780_v32, %v865_v23  ;;  %vm872_vm11 = vcmp.eq.f32.partialorder %v3813_v21, %v865_v23  ;;  %v1826_v0 = vsel %vm1824_vm8, %v3256_v42, 128 }
 0x756   : > { %v906_v36 = vsel %vm904_vm10, %v3256_v42, 128  ;;  %v874_v61 = vsel %vm872_vm11, %v3256_v42, 128  ;;  %v1829_v29 = vshra.s32 %v1826_v0, 16  ;;  %vm945_vm10 = vmxor %vm869_vm3, %vm2949_vm6 }
 0x757   : > { %v922_v53 = vshra.s32 %v906_v36, 16  ;;  %v890_v13 = vshra.s32 %v874_v61, 16  ;;  %v921_v15 = vand.u32 65535, %v906_v36  ;;  %v889_v2 = vand.u32 65535, %v874_v61 }
 0x758   : > { %v1831_v39 = vcvt.s32.f32 %v1829_v29 }
 0x759   : > { %v924_v27 = vcvt.s32.f32 %v922_v53  ;;  %v892_v58 = vcvt.s32.f32 %v890_v13  ;;  %v923_v5 = vcvt.s32.f32 %v921_v15  ;;  %v891_v8 = vcvt.s32.f32 %v889_v2 }
 0x75a   : > { %v3876_v26 = vpop.xlane.xlu1 %1784 }
 0x75b   : > { %v1787_v6 = vmax.f32 %v3874_v52, %v3876_v26  ;;  %925 = vmin.xlane.f32.xlu2 %v924_v27 }
 0x75c   : > { %893 = vmin.xlane.f32.xlu0 %v892_v58 }
 0x75d   : > { %v3884_v10 = vsel %vm866_vm4, %v1787_v6, %v3735_v20  ;;  %vm1825_vm12 = vcmp.eq.f32.partialorder %v3822_v7, %v1787_v6  ;;  %vm1793_vm13 = vcmp.eq.f32.partialorder %v3803_v18, %v1787_v6  ;;  %v907_v20 = vand.u32 65535, %v905_v50 }
 0x75e   : > { %v1827_v33 = vsel %vm1825_vm12, %v3256_v42, 128  ;;  %v1795_v41 = vsel %vm1793_vm13, %v3256_v42, 128 }
 0x75f   : > { %v1843_v46 = vshra.s32 %v1827_v33, 16  ;;  %v1811_v45 = vshra.s32 %v1795_v41, 16  ;;  %v909_v51 = vcvt.s32.f32 %v907_v20  ;;  %v1842_v60 = vand.u32 65535, %v1827_v33 }
 0x761   : > { %v1845_v34 = vcvt.s32.f32 %v1843_v46  ;;  %v1813_v62 = vcvt.s32.f32 %v1811_v45  ;;  %v1844_v61 = vcvt.s32.f32 %v1842_v60 }
 0x763   : > { %1832 = vmin.xlane.f32.xlu2 %v1831_v39  ;;  %1814 = vmin.xlane.f32.xlu1 %v1813_v62 }
 0x764   : > { %1846 = vmin.xlane.f32.xlu0 %v1845_v34 }
 0x7a8   : > { %v880_v63 = vpop.xlane.xlu2 %879  ;;  %v912_v16 = vpop.xlane.xlu1 %911 }
 0x7a9   : > { %vm881_vm14 = vcmp.eq.f32.partialorder %v878_v9, %v880_v63  ;;  %vm913_vm15 = vcmp.eq.f32.partialorder %v910_v11, %v912_v16  ;;  %v1828_v11 = vand.u32 65535, %v1826_v0  ;;  %v1810_v9 = vand.u32 65535, %v1795_v41 }
 0x7aa   : > { %v882_v4 = vsel %vm881_vm14, %v877_v28, inf  ;;  %v914_v48 = vsel %vm913_vm15, %v909_v51, inf  ;;  %v918_v0 = vcvt.f32.s32 %v912_v16  ;;  %vm1790_vm14 = vcmp.ge.f32.partialorder %v3845_v44, %v3847_v19 }
 0x7ab   : > { %883 = vmin.xlane.f32.xlu1 %v882_v4  ;;  %915 = vmin.xlane.f32.xlu0 %v914_v48  ;;  %v1812_v23 = vcvt.s32.f32 %v1810_v9 }
 0x7ac   : > { %v919_v41 = vshll.u32 %v918_v0, 16 }
 0x7c7   : > { %v1801_v30 = vpop.xlane.xlu0 %1800 }
 0x7c8   : > { %vm1802_vm0 = vcmp.eq.f32.partialorder %v1799_v43, %v1801_v30  ;;  %v1830_v43 = vcvt.s32.f32 %v1828_v11  ;;  %v1807_v20 = vcvt.f32.s32 %v1801_v30 }
 0x7c9   : > { %v1803_v1 = vsel %vm1802_vm0, %v1798_v22, inf  ;;  %vm946_vm0 = vmxor %vm870_vm9, %vm2949_vm6 }
 0x7ca   : > { %1804 = vmin.xlane.f32.xlu2 %v1803_v1  ;;  %v1808_v16 = vshll.u32 %v1807_v20, 16 }
 0x7ce   : > { %v926_v38 = vpop.xlane.xlu2 %925 }
 0x7cf   : > { %v894_v50 = vpop.xlane.xlu0 %893  ;;  %vm927_vm1 = vcmp.eq.f32.partialorder %v924_v27, %v926_v38  ;;  %v932_v4 = vcvt.f32.s32 %v926_v38 }
 0x7d0   : > { %vm895_vm4 = vcmp.eq.f32.partialorder %v892_v58, %v894_v50  ;;  %v928_v56 = vsel %vm927_vm1, %v923_v5, inf  ;;  %v886_v58 = vcvt.f32.s32 %v880_v63 }
 0x7d1   : > { %v896_v40 = vsel %vm895_vm4, %v891_v8, inf  ;;  %929 = vmin.xlane.f32.xlu1 %v928_v56  ;;  %v933_v25 = vshll.u32 %v932_v4, 16 }
 0x7d2   : > { %897 = vmin.xlane.f32.xlu2 %v896_v40  ;;  %v887_v33 = vshll.u32 %v886_v58, 16 }
 0x7d6   : > { %v3890_v37 = vpop.xlane.xlu2 %1832  ;;  %v3892_v14 = vpop.xlane.xlu1 %1814 }
 0x7d7   : > { %v3894_v36 = vpop.xlane.xlu0 %1846  ;;  %vm1834_vm5 = vcmp.eq.f32.partialorder %v1831_v39, %v3890_v37  ;;  %vm1816_vm7 = vcmp.eq.f32.partialorder %v1813_v62, %v3892_v14  ;;  %v1839_v2 = vcvt.f32.s32 %v3890_v37 }
 0x7d8   : > { %vm1848_vm2 = vcmp.eq.f32.partialorder %v1845_v34, %v3894_v36  ;;  %v1835_v53 = vsel %vm1834_vm5, %v1830_v43, inf  ;;  %v1817_v13 = vsel %vm1816_vm7, %v1812_v23, inf  ;;  %v1853_v38 = vcvt.f32.s32 %v3894_v36 }
 0x7d9   : > { %v1849_v27 = vsel %vm1848_vm2, %v1844_v61, inf  ;;  %1836 = vmin.xlane.f32.xlu1 %v1835_v53  ;;  %1818 = vmin.xlane.f32.xlu0 %v1817_v13  ;;  %v1840_v40 = vshll.u32 %v1839_v2, 16  ;;  %vm1866_vm2 = vmxor %vm1790_vm14, %vm2949_vm6 }
 0x7da   : > { %1850 = vmin.xlane.f32.xlu2 %v1849_v27  ;;  %v1854_v12 = vshll.u32 %v1853_v38, 16 }
 0x81e   : > { %v916_v6 = vpop.xlane.xlu0 %915  ;;  %v884_v29 = vpop.xlane.xlu1 %883 }
 0x81f   : > { %v917_v46 = vcvt.f32.s32 %v916_v6  ;;  %v885_v45 = vcvt.f32.s32 %v884_v29 }
 0x821   : > { %v920_v47 = vadd.s32 %v919_v41, %v917_v46  ;;  %v888_v39 = vadd.s32 %v887_v33, %v885_v45 }
 0x823   : > { %vm947_vm11 = vcmp.eq.s32.totalorder %v3256_v42, %v920_v47  ;;  %vm935_vm8 = vcmp.eq.s32.totalorder %v3256_v42, %v888_v39 }
 0x824   : > { %vm953_vm12 = vmand %vm945_vm10, %vm947_vm11 }
 0x825   : > { %v3906_v34 = vsel %vm953_vm12, -inf, %v3763_v24  ;;  %vm941_vm13 = vmand %vm869_vm3, %vm935_vm8  ;;  %v900_v24 = vcvt.f32.s32 %v894_v50 }
 0x826   : > { %961 = vmax.xlane.f32.xlu2 %v3906_v34  ;;  %v3913_v62 = vsel %vm941_vm13, -inf, %v3767_v57 }
 0x827   : > { %957 = vmax.xlane.f32.xlu0 %v3913_v62  ;;  %v901_v30 = vshll.u32 %v900_v24, 16 }
 0x83d   : > { %v1805_v63 = vpop.xlane.xlu2 %1804 }
 0x83e   : > { %v1806_v28 = vcvt.f32.s32 %v1805_v63 }
 0x840   : > { %v1809_v51 = vadd.s32 %v1808_v16, %v1806_v28 }
 0x842   : > { %vm1856_vm15 = vcmp.eq.s32.totalorder %v3256_v42, %v1809_v51 }
 0x843   : > { %vm1862_vm3 = vmand %vm1790_vm14, %vm1856_vm15 }
 0x844   : > { %v3923_v57 = vsel %vm1862_vm3, -inf, %v3792_v54  ;;  %v930_v35 = vpop.xlane.xlu1 %929  ;;  %v1821_v54 = vcvt.f32.s32 %v3892_v14  ;;  %vm967_vm3 = vcmp.eq.s32.totalorder %v3256_v42, 5 }
 0x845   : > { %v898_v48 = vpop.xlane.xlu2 %897  ;;  %1878 = vmax.xlane.f32.xlu1 %v3923_v57  ;;  %v931_v59 = vcvt.f32.s32 %v930_v35 }
 0x846   : > { %v899_v22 = vcvt.f32.s32 %v898_v48  ;;  %v1822_v11 = vshll.u32 %v1821_v54, 16 }
 0x847   : > { %v934_v1 = vadd.s32 %v933_v25, %v931_v59 }
 0x848   : > { %v902_v15 = vadd.s32 %v901_v30, %v899_v22 }
 0x849   : > { %vm948_vm1 = vcmp.eq.s32.totalorder %v3256_v42, %v934_v1 }
 0x84a   : > { %vm936_vm4 = vcmp.eq.s32.totalorder %v3256_v42, %v902_v15  ;;  %vm954_vm5 = vmand %vm946_vm0, %vm948_vm1 }
 0x84b   : > { %vm942_vm7 = vmand %vm870_vm9, %vm936_vm4  ;;  %v3939_v5 = vsel %vm954_vm5, -inf, %v3780_v32  ;;  %vm1791_vm9 = vcmp.ge.f32.partialorder %v3874_v52, %v3876_v26 }
 0x84c   : > { %v3942_v50 = vsel %vm942_vm7, -inf, %v3813_v21  ;;  %v1819_v8 = vpop.xlane.xlu0 %1818  ;;  %963 = vmax.xlane.f32.xlu0 %v3939_v5  ;;  %v1837_v56 = vpop.xlane.xlu1 %1836  ;;  %vm1867_vm10 = vmxor %vm1791_vm9, %vm2949_vm6 }
 0x84d   : > { %v1851_v9 = vpop.xlane.xlu2 %1850  ;;  %959 = vmax.xlane.f32.xlu1 %v3942_v50  ;;  %v1820_v60 = vcvt.f32.s32 %v1819_v8  ;;  %v1838_v37 = vcvt.f32.s32 %v1837_v56 }
 0x84e   : > { %v1852_v32 = vcvt.f32.s32 %v1851_v9 }
 0x84f   : > { %v1823_v17 = vadd.s32 %v1822_v11, %v1820_v60  ;;  %v1841_v14 = vadd.s32 %v1840_v40, %v1838_v37 }
 0x850   : > { %v1855_v21 = vadd.s32 %v1854_v12, %v1852_v32 }
 0x851   : > { %vm1857_vm11 = vcmp.eq.s32.totalorder %v3256_v42, %v1823_v17  ;;  %vm1868_vm8 = vcmp.eq.s32.totalorder %v3256_v42, %v1841_v14 }
 0x852   : > { %vm1869_vm12 = vcmp.eq.s32.totalorder %v3256_v42, %v1855_v21  ;;  %vm1863_vm13 = vmand %vm1791_vm9, %vm1857_vm11 }
 0x853   : > { %vm1875_vm15 = vmand %vm1867_vm10, %vm1869_vm12  ;;  %v3957_v52 = vsel %vm1863_vm13, -inf, %v3803_v18 }
 0x854   : > { %v3960_v26 = vsel %vm1875_vm15, -inf, %v3822_v7  ;;  %1880 = vmax.xlane.f32.xlu2 %v3957_v52  ;;  %vm1874_vm14 = vmand %vm1866_vm2, %vm1868_vm8 }
 0x855   : > { %1884 = vmax.xlane.f32.xlu1 %v3960_v26  ;;  %v3965_v44 = vsel %vm1874_vm14, -inf, %v3800_v31 }
 0x856   : > { %1882 = vmax.xlane.f32.xlu0 %v3965_v44 }
 0x899   : > { %v3968_v19 = vpop.xlane.xlu2 %961 }
 0x89a   : > { %v3971_v43 = vpop.xlane.xlu0 %957 }
 0x89b   : > { %v965_v18 = vmax.f32 %v3971_v43, %v3968_v19  ;;  %vm970_vm0 = vcmp.ge.f32.partialorder %v3971_v43, %v3968_v19 }
 0x89d   : > { %v3980_v7 = vsel %vm967_vm3, %v965_v18, %v3837_v3  ;;  %vm1004_vm1 = vcmp.eq.f32.partialorder %v3906_v34, %v965_v18  ;;  %vm972_vm4 = vcmp.eq.f32.partialorder %v3913_v62, %v965_v18 }
 0x89e   : > { %v1006_v31 = vsel %vm1004_vm1, %v3256_v42, 128  ;;  %v974_v23 = vsel %vm972_vm4, %v3256_v42, 128 }
 0x89f   : > { %v1009_v36 = vshra.s32 %v1006_v31, 16  ;;  %v977_v61 = vshra.s32 %v974_v23, 16  ;;  %v976_v2 = vand.u32 65535, %v974_v23  ;;  %v1008_v54 = vand.u32 65535, %v1006_v31 }
 0x8a1   : > { %v1011_v53 = vcvt.s32.f32 %v1009_v36  ;;  %v979_v13 = vcvt.s32.f32 %v977_v61  ;;  %v978_v56 = vcvt.s32.f32 %v976_v2  ;;  %v1010_v40 = vcvt.s32.f32 %v1008_v54 }
 0x8a3   : > { %1012 = vmin.xlane.f32.xlu1 %v1011_v53  ;;  %980 = vmin.xlane.f32.xlu2 %v979_v13 }
 0x8b8   : > { %v3986_v27 = vpop.xlane.xlu1 %1878 }
 0x8bf   : > { %v3988_v58 = vpop.xlane.xlu0 %963 }
 0x8c0   : > { %v3990_v3 = vpop.xlane.xlu1 %959 }
 0x8c1   : > { %v966_v0 = vmax.f32 %v3990_v3, %v3988_v58  ;;  %vm971_vm5 = vcmp.ge.f32.partialorder %v3990_v3, %v3988_v58 }
 0x8c3   : > { %v3999_v6 = vsel %vm967_vm3, %v966_v0, %v3867_v49  ;;  %vm1005_vm7 = vcmp.eq.f32.partialorder %v3939_v5, %v966_v0  ;;  %vm973_vm11 = vcmp.eq.f32.partialorder %v3942_v50, %v966_v0 }
 0x8c4   : > { %v1007_v29 = vsel %vm1005_vm7, %v3256_v42, 128 }
 0x8c5   : > { %v1023_v33 = vshra.s32 %v1007_v29, 16  ;;  %v1022_v60 = vand.u32 65535, %v1007_v29 }
 0x8c7   : > { %v4003_v41 = vpop.xlane.xlu2 %1880  ;;  %v1025_v46 = vcvt.s32.f32 %v1023_v33  ;;  %v1024_v12 = vcvt.s32.f32 %v1022_v60 }
 0x8c8   : > { %v4005_v45 = vpop.xlane.xlu1 %1884 }
 0x8c9   : > { %v4007_v47 = vpop.xlane.xlu0 %1882  ;;  %v1887_v39 = vmax.f32 %v4003_v41, %v4005_v45  ;;  %1026 = vmin.xlane.f32.xlu2 %v1025_v46 }
 0x8ca   : > { %v1886_v49 = vmax.f32 %v3986_v27, %v4007_v47 }
 0x8cb   : > { %v4016_v20 = vsel %vm967_vm3, %v1887_v39, %v3884_v10  ;;  %vm1893_vm9 = vcmp.eq.f32.partialorder %v3957_v52, %v1887_v39  ;;  %vm1925_vm8 = vcmp.eq.f32.partialorder %v3960_v26, %v1887_v39 }
 0x8cc   : > { %v4022_v63 = vsel %vm967_vm3, %v1886_v49, %v3854_v55  ;;  %vm1892_vm2 = vcmp.eq.f32.partialorder %v3923_v57, %v1886_v49  ;;  %vm1924_vm10 = vcmp.eq.f32.partialorder %v3965_v44, %v1886_v49  ;;  %v1895_v16 = vsel %vm1893_vm9, %v3256_v42, 128  ;;  %vm1046_vm9 = vmxor %vm970_vm0, %vm2949_vm6 }
 0x8cd   : > { %v1894_v28 = vsel %vm1892_vm2, %v3256_v42, 128  ;;  %v1926_v51 = vsel %vm1924_vm10, %v3256_v42, 128  ;;  %v1911_v4 = vshra.s32 %v1895_v16, 16  ;;  %v975_v55 = vsel %vm973_vm11, %v3256_v42, 128 }
 0x8ce   : > { %v1897_v10 = vshra.s32 %v1894_v28, 16  ;;  %v1929_v24 = vshra.s32 %v1926_v51, 16  ;;  %v991_v59 = vshra.s32 %v975_v55, 16  ;;  %v1927_v22 = vsel %vm1925_vm8, %v3256_v42, 128 }
 0x8cf   : > { %v1913_v35 = vcvt.s32.f32 %v1911_v4  ;;  %v1943_v1 = vshra.s32 %v1927_v22, 16  ;;  %v1896_v17 = vand.u32 65535, %v1894_v28  ;;  %v1928_v14 = vand.u32 65535, %v1926_v51 }
 0x8d0   : > { %v1899_v25 = vcvt.s32.f32 %v1897_v10  ;;  %v1931_v48 = vcvt.s32.f32 %v1929_v24  ;;  %v993_v30 = vcvt.s32.f32 %v991_v59  ;;  %v1910_v21 = vand.u32 65535, %v1895_v16 }
 0x8d1   : > { %1914 = vmin.xlane.f32.xlu1 %v1913_v35  ;;  %v1945_v15 = vcvt.s32.f32 %v1943_v1  ;;  %v1898_v36 = vcvt.s32.f32 %v1896_v17  ;;  %v1930_v61 = vcvt.s32.f32 %v1928_v14  ;;  %v990_v33 = vand.u32 65535, %v975_v55 }
 0x8d2   : > { %1900 = vmin.xlane.f32.xlu0 %v1899_v25  ;;  %1932 = vmin.xlane.f32.xlu2 %v1931_v48  ;;  %v1942_v16 = vand.u32 65535, %v1927_v22 }
 0x8d3   : > { %v992_v39 = vcvt.s32.f32 %v990_v33 }
 0x8d4   : > { %v1944_v51 = vcvt.s32.f32 %v1942_v16 }
 0x8da   : > { %994 = vmin.xlane.f32.xlu0 %v993_v30 }
 0x8e2   : > { %1946 = vmin.xlane.f32.xlu0 %v1945_v15 }
 0x916   : > { %v981_v38 = vpop.xlane.xlu2 %980  ;;  %v1013_v8 = vpop.xlane.xlu1 %1012 }
 0x917   : > { %vm982_vm12 = vcmp.eq.f32.partialorder %v979_v13, %v981_v38  ;;  %vm1014_vm13 = vcmp.eq.f32.partialorder %v1011_v53, %v1013_v8  ;;  %v1912_v53 = vcvt.s32.f32 %v1910_v21  ;;  %v987_v10 = vcvt.f32.s32 %v981_v38 }
 0x918   : > { %v983_v11 = vsel %vm982_vm12, %v978_v56, inf  ;;  %v1015_v9 = vsel %vm1014_vm13, %v1010_v40, inf  ;;  %v1019_v24 = vcvt.f32.s32 %v1013_v8  ;;  %vm1047_vm12 = vmxor %vm971_vm5, %vm2949_vm6 }
 0x919   : > { %984 = vmin.xlane.f32.xlu1 %v983_v11  ;;  %1016 = vmin.xlane.f32.xlu0 %v1015_v9 }
 0x91a   : > { %v1020_v55 = vshll.u32 %v1019_v24, 16 }
 0x93c   : > { %v1027_v37 = vpop.xlane.xlu2 %1026 }
 0x93d   : > { %vm1028_vm15 = vcmp.eq.f32.partialorder %v1025_v46, %v1027_v37  ;;  %v1033_v54 = vcvt.f32.s32 %v1027_v37 }
 0x93e   : > { %v1029_v32 = vsel %vm1028_vm15, %v1024_v12, inf  ;;  %vm1890_vm15 = vcmp.ge.f32.partialorder %v3986_v27, %v4007_v47 }
 0x93f   : > { %1030 = vmin.xlane.f32.xlu1 %v1029_v32  ;;  %v1034_v8 = vshll.u32 %v1033_v54, 16 }
 0x944   : > { %v4033_v18 = vpop.xlane.xlu1 %1914 }
 0x945   : > { %v1901_v31 = vpop.xlane.xlu0 %1900  ;;  %v1933_v23 = vpop.xlane.xlu2 %1932  ;;  %vm1916_vm14 = vcmp.eq.f32.partialorder %v1913_v35, %v4033_v18 }
 0x946   : > { %vm1902_vm3 = vcmp.eq.f32.partialorder %v1899_v25, %v1901_v31  ;;  %vm1934_vm1 = vcmp.eq.f32.partialorder %v1931_v48, %v1933_v23  ;;  %v1917_v29 = vsel %vm1916_vm14, %v1912_v53, inf  ;;  %v988_v48 = vshll.u32 %v987_v10, 16  ;;  %vm1966_vm14 = vmxor %vm1890_vm15, %vm2949_vm6 }
 0x947   : > { %v1903_v13 = vsel %vm1902_vm3, %v1898_v36, inf  ;;  %v1935_v0 = vsel %vm1934_vm1, %v1930_v61, inf  ;;  %1918 = vmin.xlane.f32.xlu0 %v1917_v29  ;;  %v1939_v19 = vcvt.f32.s32 %v1933_v23 }
 0x948   : > { %1904 = vmin.xlane.f32.xlu2 %v1903_v13  ;;  %1936 = vmin.xlane.f32.xlu1 %v1935_v0 }
 0x949   : > { %v1940_v37 = vshll.u32 %v1939_v19, 16 }
 0x94d   : > { %v4036_v46 = vpop.xlane.xlu0 %994 }
 0x94e   : > { %vm996_vm4 = vcmp.eq.f32.partialorder %v993_v30, %v4036_v46 }
 0x94f   : > { %v997_v49 = vsel %vm996_vm4, %v992_v39, inf  ;;  %vm1891_vm4 = vcmp.ge.f32.partialorder %v4003_v41, %v4005_v45 }
 0x950   : > { %998 = vmin.xlane.f32.xlu2 %v997_v49 }
 0x955   : > { %v4039_v28 = vpop.xlane.xlu0 %1946 }
 0x956   : > { %vm1948_vm7 = vcmp.eq.f32.partialorder %v1945_v15, %v4039_v28  ;;  %v1953_v0 = vcvt.f32.s32 %v4039_v28 }
 0x957   : > { %v1949_v4 = vsel %vm1948_vm7, %v1944_v51, inf }
 0x958   : > { %1950 = vmin.xlane.f32.xlu2 %v1949_v4  ;;  %v1954_v33 = vshll.u32 %v1953_v0, 16 }
 0x98c   : > { %v1017_v35 = vpop.xlane.xlu0 %1016  ;;  %v985_v25 = vpop.xlane.xlu1 %984 }
 0x98d   : > { %v1018_v59 = vcvt.f32.s32 %v1017_v35  ;;  %v986_v1 = vcvt.f32.s32 %v985_v25 }
 0x98f   : > { %v1021_v2 = vadd.s32 %v1020_v55, %v1018_v59  ;;  %v989_v30 = vadd.s32 %v988_v48, %v986_v1 }
 0x991   : > { %vm1048_vm2 = vcmp.eq.s32.totalorder %v3256_v42, %v1021_v2  ;;  %vm1036_vm10 = vcmp.eq.s32.totalorder %v3256_v42, %v989_v30 }
 0x992   : > { %vm1054_vm11 = vmand %vm1046_vm9, %vm1048_vm2 }
 0x993   : > { %v4049_v22 = vsel %vm1054_vm11, -inf, %v3906_v34  ;;  %vm1042_vm8 = vmand %vm970_vm0, %vm1036_vm10  ;;  %v1907_v34 = vcvt.f32.s32 %v1901_v31 }
 0x994   : > { %1062 = vmax.xlane.f32.xlu2 %v4049_v22  ;;  %v4056_v15 = vsel %vm1042_vm8, -inf, %v3913_v62  ;;  %v1921_v62 = vcvt.f32.s32 %v4033_v18 }
 0x995   : > { %1058 = vmax.xlane.f32.xlu0 %v4056_v15  ;;  %v1908_v60 = vshll.u32 %v1907_v34, 16 }
 0x996   : > { %v1922_v14 = vshll.u32 %v1921_v62, 16 }
 0x9b2   : > { %v1031_v38 = vpop.xlane.xlu1 %1030 }
 0x9b3   : > { %v1032_v56 = vcvt.f32.s32 %v1031_v38 }
 0x9b5   : > { %v1035_v40 = vadd.s32 %v1034_v8, %v1032_v56 }
 0x9b7   : > { %vm1049_vm13 = vcmp.eq.s32.totalorder %v3256_v42, %v1035_v40 }
 0x9b8   : > { %vm1055_vm0 = vmand %vm1047_vm12, %vm1049_vm13 }
 0x9b9   : > { %v4066_v43 = vsel %vm1055_vm0, -inf, %v3939_v5  ;;  %v1001_v5 = vcvt.f32.s32 %v4036_v46  ;;  %vm1967_vm12 = vmxor %vm1891_vm4, %vm2949_vm6 }
 0x9ba   : > { %1064 = vmax.xlane.f32.xlu0 %v4066_v43  ;;  %v1919_v32 = vpop.xlane.xlu0 %1918 }
 0x9bb   : > { %v1905_v11 = vpop.xlane.xlu2 %1904  ;;  %v1937_v9 = vpop.xlane.xlu1 %1936  ;;  %v1920_v21 = vcvt.f32.s32 %v1919_v32  ;;  %v1002_v61 = vshll.u32 %v1001_v5, 16 }
 0x9bc   : > { %v1906_v12 = vcvt.f32.s32 %v1905_v11  ;;  %v1938_v17 = vcvt.f32.s32 %v1937_v9 }
 0x9bd   : > { %v1923_v18 = vadd.s32 %v1922_v14, %v1920_v21 }
 0x9be   : > { %v1909_v31 = vadd.s32 %v1908_v60, %v1906_v12  ;;  %v1941_v23 = vadd.s32 %v1940_v37, %v1938_v17 }
 0x9bf   : > { %vm1957_vm9 = vcmp.eq.s32.totalorder %v3256_v42, %v1923_v18 }
 0x9c0   : > { %vm1956_vm3 = vcmp.eq.s32.totalorder %v3256_v42, %v1909_v31  ;;  %vm1968_vm1 = vcmp.eq.s32.totalorder %v3256_v42, %v1941_v23  ;;  %vm1963_vm2 = vmand %vm1891_vm4, %vm1957_vm9 }
 0x9c1   : > { %vm1962_vm7 = vmand %vm1890_vm15, %vm1956_vm3  ;;  %v4086_v36 = vsel %vm1963_vm2, -inf, %v3957_v52 }
 0x9c2   : > { %v4079_v27 = vsel %vm1962_vm7, -inf, %v3923_v57  ;;  %vm1974_vm10 = vmand %vm1966_vm14, %vm1968_vm1  ;;  %1980 = vmax.xlane.f32.xlu2 %v4086_v36 }
 0x9c3   : > { %v999_v47 = vpop.xlane.xlu2 %998  ;;  %1978 = vmax.xlane.f32.xlu1 %v4079_v27  ;;  %v4090_v13 = vsel %vm1974_vm10, -inf, %v3965_v44 }
 0x9c4   : > { %v1000_v53 = vcvt.f32.s32 %v999_v47  ;;  %1982 = vmax.xlane.f32.xlu0 %v4090_v13 }
 0x9c6   : > { %v1003_v57 = vadd.s32 %v1002_v61, %v1000_v53 }
 0x9c8   : > { %vm1037_vm11 = vcmp.eq.s32.totalorder %v3256_v42, %v1003_v57 }
 0x9c9   : > { %vm1043_vm8 = vmand %vm971_vm5, %vm1037_vm11  ;;  %vm1068_vm5 = vcmp.eq.s32.totalorder %v3256_v42, 6 }
 0x9ca   : > { %v4099_v52 = vsel %vm1043_vm8, -inf, %v3942_v50 }
 0x9cb   : > { %v1951_v29 = vpop.xlane.xlu2 %1950  ;;  %1060 = vmax.xlane.f32.xlu1 %v4099_v52 }
 0x9cc   : > { %v1952_v44 = vcvt.f32.s32 %v1951_v29 }
 0x9ce   : > { %v1955_v46 = vadd.s32 %v1954_v33, %v1952_v44 }
 0x9d0   : > { %vm1969_vm13 = vcmp.eq.s32.totalorder %v3256_v42, %v1955_v46 }
 0x9d1   : > { %vm1975_vm0 = vmand %vm1967_vm12, %vm1969_vm13 }
 0x9d2   : > { %v4108_v58 = vsel %vm1975_vm0, -inf, %v3960_v26 }
 0x9d3   : > { %1984 = vmax.xlane.f32.xlu1 %v4108_v58 }
 0xa07   : > { %v4111_v50 = vpop.xlane.xlu2 %1062 }
 0xa08   : > { %v4114_v3 = vpop.xlane.xlu0 %1058 }
 0xa09   : > { %v1066_v39 = vmax.f32 %v4114_v3, %v4111_v50  ;;  %vm1071_vm15 = vcmp.ge.f32.partialorder %v4114_v3, %v4111_v50 }
 0xa0b   : > { %v4123_v41 = vsel %vm1068_vm5, %v1066_v39, %v3980_v7  ;;  %vm1073_vm14 = vcmp.eq.f32.partialorder %v4056_v15, %v1066_v39  ;;  %vm1105_vm3 = vcmp.eq.f32.partialorder %v4049_v22, %v1066_v39 }
 0xa0c   : > { %v1107_v26 = vsel %vm1105_vm3, %v3256_v42, 128  ;;  %v1075_v45 = vsel %vm1073_vm14, %v3256_v42, 128 }
 0xa0d   : > { %v1110_v49 = vshra.s32 %v1107_v26, 16  ;;  %v1078_v16 = vshra.s32 %v1075_v45, 16  ;;  %v1109_v21 = vand.u32 65535, %v1107_v26 }
 0xa0f   : > { %v1112_v28 = vcvt.s32.f32 %v1110_v49  ;;  %v1080_v51 = vcvt.s32.f32 %v1078_v16  ;;  %v1111_v5 = vcvt.s32.f32 %v1109_v21 }
 0xa11   : > { %1113 = vmin.xlane.f32.xlu1 %v1112_v28  ;;  %1081 = vmin.xlane.f32.xlu2 %v1080_v51 }
 0xa2d   : > { %v4129_v4 = vpop.xlane.xlu0 %1064 }
 0xa35   : > { %v4160_v40 = vpop.xlane.xlu2 %1980 }
 0xa36   : > { %v4131_v10 = vpop.xlane.xlu1 %1978 }
 0xa37   : > { %v4133_v7 = vpop.xlane.xlu0 %1982 }
 0xa38   : > { %v1986_v24 = vmax.f32 %v4131_v10, %v4133_v7 }
 0xa3a   : > { %v4140_v35 = vsel %vm1068_vm5, %v1986_v24, %v4022_v63  ;;  %vm1992_vm1 = vcmp.eq.f32.partialorder %v4079_v27, %v1986_v24  ;;  %vm2024_vm2 = vcmp.eq.f32.partialorder %v4090_v13, %v1986_v24 }
 0xa3b   : > { %v1994_v25 = vsel %vm1992_vm1, %v3256_v42, 128 }
 0xa3c   : > { %v1997_v48 = vshra.s32 %v1994_v25, 16  ;;  %v1996_v53 = vand.u32 65535, %v1994_v25 }
 0xa3e   : > { %v4144_v55 = vpop.xlane.xlu1 %1060  ;;  %v1999_v1 = vcvt.s32.f32 %v1997_v48  ;;  %v1998_v0 = vcvt.s32.f32 %v1996_v53 }
 0xa3f   : > { %v1067_v59 = vmax.f32 %v4144_v55, %v4129_v4  ;;  %vm1072_vm4 = vcmp.ge.f32.partialorder %v4144_v55, %v4129_v4 }
 0xa40   : > { %2000 = vmin.xlane.f32.xlu0 %v1999_v1 }
 0xa41   : > { %v4153_v2 = vsel %vm1068_vm5, %v1067_v59, %v3999_v6  ;;  %vm1074_vm7 = vcmp.eq.f32.partialorder %v4099_v52, %v1067_v59  ;;  %vm1106_vm9 = vcmp.eq.f32.partialorder %v4066_v43, %v1067_v59  ;;  %v2026_v6 = vsel %vm2024_vm2, %v3256_v42, 128 }
 0xa42   : > { %v1108_v63 = vsel %vm1106_vm9, %v3256_v42, 128  ;;  %v1076_v30 = vsel %vm1074_vm7, %v3256_v42, 128  ;;  %v2029_v11 = vshra.s32 %v2026_v6, 16  ;;  %vm1147_vm9 = vmxor %vm1071_vm15, %vm2949_vm6 }
 0xa43   : > { %v1124_v54 = vshra.s32 %v1108_v63, 16  ;;  %v1092_v38 = vshra.s32 %v1076_v30, 16  ;;  %v1123_v33 = vand.u32 65535, %v1108_v63  ;;  %v1091_v44 = vand.u32 65535, %v1076_v30 }
 0xa44   : > { %v2031_v32 = vcvt.s32.f32 %v2029_v11 }
 0xa45   : > { %v1126_v8 = vcvt.s32.f32 %v1124_v54  ;;  %v1094_v56 = vcvt.s32.f32 %v1092_v38  ;;  %v1125_v39 = vcvt.s32.f32 %v1123_v33 }
 0xa46   : > { %v4162_v34 = vpop.xlane.xlu1 %1984 }
 0xa47   : > { %v1987_v19 = vmax.f32 %v4160_v40, %v4162_v34  ;;  %vm1991_vm10 = vcmp.ge.f32.partialorder %v4160_v40, %v4162_v34  ;;  %1127 = vmin.xlane.f32.xlu2 %v1126_v8 }
 0xa48   : > { %1095 = vmin.xlane.f32.xlu0 %v1094_v56 }
 0xa49   : > { %v4172_v62 = vsel %vm1068_vm5, %v1987_v19, %v4016_v20  ;;  %vm1993_vm11 = vcmp.eq.f32.partialorder %v4086_v36, %v1987_v19  ;;  %vm2025_vm8 = vcmp.eq.f32.partialorder %v4108_v58, %v1987_v19  ;;  %v1077_v20 = vand.u32 65535, %v1075_v45 }
 0xa4a   : > { %v2027_v9 = vsel %vm2025_vm8, %v3256_v42, 128  ;;  %v1995_v60 = vsel %vm1993_vm11, %v3256_v42, 128  ;;  %v1093_v45 = vcvt.s32.f32 %v1091_v44 }
 0xa4b   : > { %v2043_v37 = vshra.s32 %v2027_v9, 16  ;;  %v2011_v12 = vshra.s32 %v1995_v60, 16  ;;  %v1079_v18 = vcvt.s32.f32 %v1077_v20  ;;  %v2042_v24 = vand.u32 65535, %v2027_v9 }
 0xa4d   : > { %v2045_v17 = vcvt.s32.f32 %v2043_v37  ;;  %v2013_v14 = vcvt.s32.f32 %v2011_v12  ;;  %v2044_v30 = vcvt.s32.f32 %v2042_v24 }
 0xa4f   : > { %2032 = vmin.xlane.f32.xlu2 %v2031_v32  ;;  %2014 = vmin.xlane.f32.xlu1 %v2013_v14 }
 0xa50   : > { %2046 = vmin.xlane.f32.xlu0 %v2045_v17 }
 0xa84   : > { %v1082_v31 = vpop.xlane.xlu2 %1081  ;;  %v1114_v23 = vpop.xlane.xlu1 %1113 }
 0xa85   : > { %vm1083_vm12 = vcmp.eq.f32.partialorder %v1080_v51, %v1082_v31  ;;  %vm1115_vm13 = vcmp.eq.f32.partialorder %v1112_v28, %v1114_v23  ;;  %v2028_v28 = vand.u32 65535, %v2026_v6  ;;  %v2010_v51 = vand.u32 65535, %v1995_v60 }
 0xa86   : > { %v1084_v47 = vsel %vm1083_vm12, %v1079_v18, inf  ;;  %v1116_v61 = vsel %vm1115_vm13, %v1111_v5, inf  ;;  %v1120_v6 = vcvt.f32.s32 %v1114_v23  ;;  %vm1990_vm13 = vcmp.ge.f32.partialorder %v4131_v10, %v4133_v7 }
 0xa87   : > { %1085 = vmin.xlane.f32.xlu1 %v1084_v47  ;;  %1117 = vmin.xlane.f32.xlu0 %v1116_v61  ;;  %v2030_v59 = vcvt.s32.f32 %v2028_v28 }
 0xa88   : > { %v1121_v60 = vshll.u32 %v1120_v6, 16 }
 0xab3   : > { %v2001_v57 = vpop.xlane.xlu0 %2000 }
 0xab4   : > { %vm2002_vm0 = vcmp.eq.f32.partialorder %v1999_v1, %v2001_v57  ;;  %v2012_v1 = vcvt.s32.f32 %v2010_v51  ;;  %v2007_v21 = vcvt.f32.s32 %v2001_v57 }
 0xab5   : > { %v2003_v29 = vsel %vm2002_vm0, %v1998_v0, inf }
 0xab6   : > { %2004 = vmin.xlane.f32.xlu2 %v2003_v29  ;;  %v2008_v23 = vshll.u32 %v2007_v21, 16 }
 0xaba   : > { %v1128_v46 = vpop.xlane.xlu2 %1127 }
 0xabb   : > { %vm1129_vm5 = vcmp.eq.f32.partialorder %v1126_v8, %v1128_v46  ;;  %v1096_v26 = vpop.xlane.xlu0 %1095  ;;  %v1134_v5 = vcvt.f32.s32 %v1128_v46 }
 0xabc   : > { %v1130_v49 = vsel %vm1129_vm5, %v1125_v39, inf  ;;  %vm1097_vm14 = vcmp.eq.f32.partialorder %v1094_v56, %v1096_v26  ;;  %v1088_v56 = vcvt.f32.s32 %v1082_v31  ;;  %vm1148_vm5 = vmxor %vm1072_vm4, %vm2949_vm6 }
 0xabd   : > { %1131 = vmin.xlane.f32.xlu1 %v1130_v49  ;;  %v1098_v16 = vsel %vm1097_vm14, %v1093_v45, inf  ;;  %v1135_v50 = vshll.u32 %v1134_v5, 16 }
 0xabe   : > { %1099 = vmin.xlane.f32.xlu2 %v1098_v16  ;;  %v1089_v9 = vshll.u32 %v1088_v56, 16 }
 0xac2   : > { %v2033_v25 = vpop.xlane.xlu2 %2032  ;;  %v4178_v48 = vpop.xlane.xlu1 %2014 }
 0xac3   : > { %vm2034_vm3 = vcmp.eq.f32.partialorder %v2031_v32, %v2033_v25  ;;  %vm2016_vm1 = vcmp.eq.f32.partialorder %v2013_v14, %v4178_v48  ;;  %v4181_v63 = vpop.xlane.xlu0 %2046  ;;  %v2039_v33 = vcvt.f32.s32 %v2033_v25  ;;  %v2021_v44 = vcvt.f32.s32 %v4178_v48 }
 0xac4   : > { %v2035_v54 = vsel %vm2034_vm3, %v2030_v59, inf  ;;  %v2017_v38 = vsel %vm2016_vm1, %v2012_v1, inf  ;;  %vm2048_vm7 = vcmp.eq.f32.partialorder %v2045_v17, %v4181_v63 }
 0xac5   : > { %2036 = vmin.xlane.f32.xlu1 %v2035_v54  ;;  %2018 = vmin.xlane.f32.xlu0 %v2017_v38  ;;  %v2049_v8 = vsel %vm2048_vm7, %v2044_v30, inf  ;;  %v2022_v16 = vshll.u32 %v2021_v44, 16 }
 0xac6   : > { %2050 = vmin.xlane.f32.xlu2 %v2049_v8 }
 0xafa   : > { %v1118_v19 = vpop.xlane.xlu0 %1117  ;;  %v1086_v11 = vpop.xlane.xlu1 %1085 }
 0xafb   : > { %v1119_v37 = vcvt.f32.s32 %v1118_v19  ;;  %v1087_v12 = vcvt.f32.s32 %v1086_v11 }
 0xafd   : > { %v1122_v32 = vadd.s32 %v1121_v60, %v1119_v37  ;;  %v1090_v14 = vadd.s32 %v1089_v9, %v1087_v12 }
 0xaff   : > { %vm1149_vm2 = vcmp.eq.s32.totalorder %v3256_v42, %v1122_v32  ;;  %vm1137_vm11 = vcmp.eq.s32.totalorder %v3256_v42, %v1090_v14 }
 0xb00   : > { %vm1155_vm8 = vmand %vm1147_vm9, %vm1149_vm2 }
 0xb01   : > { %v4191_v17 = vsel %vm1155_vm8, -inf, %v4049_v22  ;;  %vm1143_vm12 = vmand %vm1071_vm15, %vm1137_vm11  ;;  %v1102_v22 = vcvt.f32.s32 %v1096_v26  ;;  %v2040_v26 = vshll.u32 %v2039_v33, 16 }
 0xb02   : > { %1163 = vmax.xlane.f32.xlu2 %v4191_v17  ;;  %v4198_v20 = vsel %vm1143_vm12, -inf, %v4056_v15  ;;  %vm2067_vm9 = vmxor %vm1991_vm10, %vm2949_vm6 }
 0xb03   : > { %1159 = vmax.xlane.f32.xlu0 %v4198_v20  ;;  %v1103_v57 = vshll.u32 %v1102_v22, 16 }
 0xb29   : > { %v2005_v31 = vpop.xlane.xlu2 %2004 }
 0xb2a   : > { %v2006_v18 = vcvt.f32.s32 %v2005_v31 }
 0xb2c   : > { %v2009_v47 = vadd.s32 %v2008_v23, %v2006_v18 }
 0xb2e   : > { %vm2056_vm0 = vcmp.eq.s32.totalorder %v3256_v42, %v2009_v47 }
 0xb2f   : > { %vm2062_vm15 = vmand %vm1990_vm13, %vm2056_vm0 }
 0xb30   : > { %v1132_v15 = vpop.xlane.xlu1 %1131  ;;  %v4208_v3 = vsel %vm2062_vm15, -inf, %v4079_v27  ;;  %v2053_v27 = vcvt.f32.s32 %v4181_v63 }
 0xb31   : > { %v1133_v61 = vcvt.f32.s32 %v1132_v15  ;;  %v1100_v53 = vpop.xlane.xlu2 %1099  ;;  %2078 = vmax.xlane.f32.xlu1 %v4208_v3 }
 0xb32   : > { %v1101_v0 = vcvt.f32.s32 %v1100_v53 }
 0xb33   : > { %v1136_v29 = vadd.s32 %v1135_v50, %v1133_v61 }
 0xb34   : > { %v1104_v46 = vadd.s32 %v1103_v57, %v1101_v0 }
 0xb35   : > { %vm1150_vm14 = vcmp.eq.s32.totalorder %v3256_v42, %v1136_v29 }
 0xb36   : > { %vm1156_vm3 = vmand %vm1148_vm5, %vm1150_vm14  ;;  %vm1138_vm1 = vcmp.eq.s32.totalorder %v3256_v42, %v1104_v46 }
 0xb37   : > { %v4220_v39 = vsel %vm1156_vm3, -inf, %v4066_v43  ;;  %vm1144_vm7 = vmand %vm1072_vm4, %vm1138_vm1  ;;  %v2054_v43 = vshll.u32 %v2053_v27, 16 }
 0xb38   : > { %v2019_v45 = vpop.xlane.xlu0 %2018  ;;  %1165 = vmax.xlane.f32.xlu0 %v4220_v39  ;;  %v2037_v49 = vpop.xlane.xlu1 %2036  ;;  %v4227_v28 = vsel %vm1144_vm7, -inf, %v4099_v52  ;;  %vm2066_vm4 = vmxor %vm1990_vm13, %vm2949_vm6 }
 0xb39   : > { %v2020_v51 = vcvt.f32.s32 %v2019_v45  ;;  %v2038_v24 = vcvt.f32.s32 %v2037_v49  ;;  %v2051_v25 = vpop.xlane.xlu2 %2050  ;;  %1161 = vmax.xlane.f32.xlu1 %v4227_v28 }
 0xb3a   : > { %v2052_v48 = vcvt.f32.s32 %v2051_v25 }
 0xb3b   : > { %v2023_v59 = vadd.s32 %v2022_v16, %v2020_v51  ;;  %v2041_v1 = vadd.s32 %v2040_v26, %v2038_v24 }
 0xb3c   : > { %v2055_v52 = vadd.s32 %v2054_v43, %v2052_v48 }
 0xb3d   : > { %vm2057_vm2 = vcmp.eq.s32.totalorder %v3256_v42, %v2023_v59  ;;  %vm2068_vm11 = vcmp.eq.s32.totalorder %v3256_v42, %v2041_v1 }
 0xb3e   : > { %vm2063_vm8 = vmand %vm1991_vm10, %vm2057_vm2  ;;  %vm2069_vm12 = vcmp.eq.s32.totalorder %v3256_v42, %v2055_v52  ;;  %vm1169_vm10 = vcmp.eq.s32.totalorder %v3256_v42, 7 }
 0xb3f   : > { %v4245_v4 = vsel %vm2063_vm8, -inf, %v4086_v36  ;;  %vm2074_vm13 = vmand %vm2066_vm4, %vm2068_vm11 }
 0xb40   : > { %vm2075_vm0 = vmand %vm2067_vm9, %vm2069_vm12  ;;  %2080 = vmax.xlane.f32.xlu2 %v4245_v4  ;;  %v4249_v10 = vsel %vm2074_vm13, -inf, %v4090_v13 }
 0xb41   : > { %v4252_v7 = vsel %vm2075_vm0, -inf, %v4108_v58  ;;  %2082 = vmax.xlane.f32.xlu0 %v4249_v10 }
 0xb42   : > { %2084 = vmax.xlane.f32.xlu1 %v4252_v7 }
 0xb75   : > { %v4256_v55 = vpop.xlane.xlu2 %1163 }
 0xb76   : > { %v4259_v36 = vpop.xlane.xlu0 %1159 }
 0xb77   : > { %v1167_v40 = vmax.f32 %v4259_v36, %v4256_v55  ;;  %vm1172_vm15 = vcmp.ge.f32.partialorder %v4259_v36, %v4256_v55 }
 0xb79   : > { %v4268_v13 = vsel %vm1169_vm10, %v1167_v40, %v4123_v41  ;;  %vm1174_vm5 = vcmp.eq.f32.partialorder %v4198_v20, %v1167_v40  ;;  %vm1206_vm14 = vcmp.eq.f32.partialorder %v4191_v17, %v1167_v40 }
 0xb7a   : > { %v1208_v58 = vsel %vm1206_vm14, %v3256_v42, 128  ;;  %v1176_v34 = vsel %vm1174_vm5, %v3256_v42, 128 }
 0xb7b   : > { %v1211_v63 = vshra.s32 %v1208_v58, 16  ;;  %v1179_v30 = vshra.s32 %v1176_v34, 16  ;;  %v1178_v44 = vand.u32 65535, %v1176_v34  ;;  %v1210_v46 = vand.u32 65535, %v1208_v58 }
 0xb7d   : > { %v1213_v54 = vcvt.s32.f32 %v1211_v63  ;;  %v1181_v38 = vcvt.s32.f32 %v1179_v30  ;;  %v1180_v45 = vcvt.s32.f32 %v1178_v44  ;;  %v1212_v49 = vcvt.s32.f32 %v1210_v46 }
 0xb7f   : > { %1214 = vmin.xlane.f32.xlu1 %v1213_v54  ;;  %1182 = vmin.xlane.f32.xlu2 %v1181_v38 }
 0xba4   : > { %v4274_v8 = vpop.xlane.xlu1 %2078 }
 0xbab   : > { %v4276_v56 = vpop.xlane.xlu0 %1165 }
 0xbac   : > { %v4278_v41 = vpop.xlane.xlu1 %1161 }
 0xbad   : > { %v1168_v6 = vmax.f32 %v4278_v41, %v4276_v56  ;;  %vm1173_vm3 = vcmp.ge.f32.partialorder %v4278_v41, %v4276_v56 }
 0xbaf   : > { %v4287_v19 = vsel %vm1169_vm10, %v1168_v6, %v4153_v2  ;;  %vm1207_vm1 = vcmp.eq.f32.partialorder %v4220_v39, %v1168_v6  ;;  %vm1175_vm11 = vcmp.eq.f32.partialorder %v4227_v28, %v1168_v6 }
 0xbb0   : > { %v1209_v11 = vsel %vm1207_vm1, %v3256_v42, 128  ;;  %v1177_v53 = vsel %vm1175_vm11, %v3256_v42, 128 }
 0xbb1   : > { %v1225_v9 = vshra.s32 %v1209_v11, 16  ;;  %v1224_v24 = vand.u32 65535, %v1209_v11 }
 0xbb3   : > { %v4291_v60 = vpop.xlane.xlu2 %2080  ;;  %v1227_v12 = vcvt.s32.f32 %v1225_v9  ;;  %v1226_v43 = vcvt.s32.f32 %v1224_v24  ;;  %v1192_v9 = vand.u32 65535, %v1177_v53 }
 0xbb4   : > { %v4293_v37 = vpop.xlane.xlu0 %2082 }
 0xbb5   : > { %v2086_v32 = vmax.f32 %v4274_v8, %v4293_v37  ;;  %v4297_v14 = vpop.xlane.xlu1 %2084  ;;  %1228 = vmin.xlane.f32.xlu2 %v1227_v12 }
 0xbb6   : > { %v2087_v21 = vmax.f32 %v4291_v60, %v4297_v14  ;;  %vm2091_vm7 = vcmp.ge.f32.partialorder %v4291_v60, %v4297_v14 }
 0xbb7   : > { %v4306_v2 = vsel %vm1169_vm10, %v2086_v32, %v4140_v35  ;;  %vm2092_vm4 = vcmp.eq.f32.partialorder %v4208_v3, %v2086_v32  ;;  %vm2124_vm9 = vcmp.eq.f32.partialorder %v4249_v10, %v2086_v32  ;;  %v1194_v32 = vcvt.s32.f32 %v1192_v9 }
 0xbb8   : > { %v4313_v31 = vsel %vm1169_vm10, %v2087_v21, %v4172_v62  ;;  %vm2093_vm2 = vcmp.eq.f32.partialorder %v4245_v4, %v2087_v21  ;;  %v2094_v23 = vsel %vm2092_vm4, %v3256_v42, 128  ;;  %v2126_v5 = vsel %vm2124_vm9, %v3256_v42, 128  ;;  %vm1248_vm9 = vmxor %vm1172_vm15, %vm2949_vm6 }
 0xbb9   : > { %v2097_v18 = vshra.s32 %v2094_v23, 16  ;;  %v2095_v35 = vsel %vm2093_vm2, %v3256_v42, 128  ;;  %v2129_v47 = vshra.s32 %v2126_v5, 16  ;;  %v1193_v62 = vshra.s32 %v1177_v53, 16 }
 0xbba   : > { %v2111_v22 = vshra.s32 %v2095_v35, 16  ;;  %vm2125_vm8 = vcmp.eq.f32.partialorder %v4252_v7, %v2087_v21  ;;  %v2096_v59 = vand.u32 65535, %v2094_v23  ;;  %v2128_v1 = vand.u32 65535, %v2126_v5 }
 0xbbb   : > { %v2099_v15 = vcvt.s32.f32 %v2097_v18  ;;  %v2131_v50 = vcvt.s32.f32 %v2129_v47  ;;  %v1195_v57 = vcvt.s32.f32 %v1193_v62  ;;  %v2127_v0 = vsel %vm2125_vm8, %v3256_v42, 128 }
 0xbbc   : > { %v2113_v61 = vcvt.s32.f32 %v2111_v22  ;;  %v2143_v29 = vshra.s32 %v2127_v0, 16  ;;  %v2110_v52 = vand.u32 65535, %v2095_v35  ;;  %v2098_v63 = vcvt.s32.f32 %v2096_v59 }
 0xbbd   : > { %2100 = vmin.xlane.f32.xlu0 %v2099_v15  ;;  %2132 = vmin.xlane.f32.xlu2 %v2131_v50  ;;  %v2130_v30 = vcvt.s32.f32 %v2128_v1  ;;  %v2142_v23 = vand.u32 65535, %v2127_v0 }
 0xbbe   : > { %2114 = vmin.xlane.f32.xlu1 %v2113_v61  ;;  %v2145_v33 = vcvt.s32.f32 %v2143_v29 }
 0xbbf   : > { %v2144_v5 = vcvt.s32.f32 %v2142_v23 }
 0xbc5   : > { %1196 = vmin.xlane.f32.xlu0 %v1195_v57 }
 0xbcd   : > { %2146 = vmin.xlane.f32.xlu0 %v2145_v33 }
 0xbf2   : > { %v1183_v27 = vpop.xlane.xlu2 %1182  ;;  %v1215_v26 = vpop.xlane.xlu1 %1214 }
 0xbf3   : > { %vm1184_vm12 = vcmp.eq.f32.partialorder %v1181_v38, %v1183_v27  ;;  %vm1216_vm13 = vcmp.eq.f32.partialorder %v1213_v54, %v1215_v26  ;;  %v2112_v54 = vcvt.s32.f32 %v2110_v52  ;;  %v1189_v47 = vcvt.f32.s32 %v1183_v27 }
 0xbf4   : > { %v1185_v16 = vsel %vm1184_vm12, %v1180_v45, inf  ;;  %v1217_v51 = vsel %vm1216_vm13, %v1212_v49, inf  ;;  %v1221_v22 = vcvt.f32.s32 %v1215_v26  ;;  %vm1249_vm13 = vmxor %vm1173_vm3, %vm2949_vm6 }
 0xbf5   : > { %1186 = vmin.xlane.f32.xlu1 %v1185_v16  ;;  %1218 = vmin.xlane.f32.xlu0 %v1217_v51 }
 0xbf6   : > { %v1222_v53 = vshll.u32 %v1221_v22, 16 }
 0xc28   : > { %v1229_v25 = vpop.xlane.xlu2 %1228 }
 0xc29   : > { %vm1230_vm0 = vcmp.eq.f32.partialorder %v1227_v12, %v1229_v25  ;;  %v1235_v46 = vcvt.f32.s32 %v1229_v25 }
 0xc2a   : > { %v1231_v48 = vsel %vm1230_vm0, %v1226_v43, inf }
 0xc2b   : > { %1232 = vmin.xlane.f32.xlu1 %v1231_v48  ;;  %v1236_v26 = vshll.u32 %v1235_v46, 16 }
 0xc30   : > { %v2101_v40 = vpop.xlane.xlu0 %2100  ;;  %v2133_v58 = vpop.xlane.xlu2 %2132 }
 0xc31   : > { %vm2102_vm10 = vcmp.eq.f32.partialorder %v2099_v15, %v2101_v40  ;;  %v4323_v34 = vpop.xlane.xlu1 %2114  ;;  %vm2134_vm5 = vcmp.eq.f32.partialorder %v2131_v50, %v2133_v58  ;;  %v2139_v55 = vcvt.f32.s32 %v2133_v58 }
 0xc32   : > { %vm2116_vm14 = vcmp.eq.f32.partialorder %v2113_v61, %v4323_v34  ;;  %v2103_v38 = vsel %vm2102_vm10, %v2098_v63, inf  ;;  %v2135_v6 = vsel %vm2134_vm5, %v2130_v30, inf  ;;  %v1190_v61 = vshll.u32 %v1189_v47, 16 }
 0xc33   : > { %v2117_v11 = vsel %vm2116_vm14, %v2112_v54, inf  ;;  %2104 = vmin.xlane.f32.xlu2 %v2103_v38  ;;  %2136 = vmin.xlane.f32.xlu1 %v2135_v6  ;;  %v2121_v36 = vcvt.f32.s32 %v4323_v34  ;;  %v2140_v25 = vshll.u32 %v2139_v55, 16  ;;  %vm2090_vm10 = vcmp.ge.f32.partialorder %v4274_v8, %v4293_v37 }
 0xc34   : > { %2118 = vmin.xlane.f32.xlu0 %v2117_v11  ;;  %vm2166_vm5 = vmxor %vm2090_vm10, %vm2949_vm6 }
 0xc35   : > { %v2122_v1 = vshll.u32 %v2121_v36, 16 }
 0xc38   : > { %v4326_v12 = vpop.xlane.xlu0 %1196 }
 0xc39   : > { %vm1198_vm1 = vcmp.eq.f32.partialorder %v1195_v57, %v4326_v12 }
 0xc3a   : > { %v1199_v21 = vsel %vm1198_vm1, %v1194_v32, inf }
 0xc3b   : > { %1200 = vmin.xlane.f32.xlu2 %v1199_v21 }
 0xc40   : > { %v4329_v18 = vpop.xlane.xlu0 %2146 }
 0xc41   : > { %vm2148_vm4 = vcmp.eq.f32.partialorder %v2145_v33, %v4329_v18  ;;  %v2153_v6 = vcvt.f32.s32 %v4329_v18 }
 0xc42   : > { %v2149_v35 = vsel %vm2148_vm4, %v2144_v5, inf }
 0xc43   : > { %2150 = vmin.xlane.f32.xlu2 %v2149_v35  ;;  %v2154_v9 = vshll.u32 %v2153_v6, 16 }
 0xc68   : > { %v1219_v15 = vpop.xlane.xlu0 %1218  ;;  %v1187_v50 = vpop.xlane.xlu1 %1186 }
 0xc69   : > { %v1220_v62 = vcvt.f32.s32 %v1219_v15  ;;  %v1188_v29 = vcvt.f32.s32 %v1187_v50 }
 0xc6b   : > { %v1223_v44 = vadd.s32 %v1222_v53, %v1220_v62  ;;  %v1191_v57 = vadd.s32 %v1190_v61, %v1188_v29 }
 0xc6d   : > { %vm1250_vm2 = vcmp.eq.s32.totalorder %v3256_v42, %v1223_v44  ;;  %vm1238_vm11 = vcmp.eq.s32.totalorder %v3256_v42, %v1191_v57 }
 0xc6e   : > { %vm1256_vm8 = vmand %vm1248_vm9, %vm1250_vm2 }
 0xc6f   : > { %v4339_v0 = vsel %vm1256_vm8, -inf, %v4191_v17  ;;  %vm1244_vm12 = vmand %vm1172_vm15, %vm1238_vm11  ;;  %v2107_v17 = vcvt.f32.s32 %v2101_v40 }
 0xc70   : > { %1264 = vmax.xlane.f32.xlu2 %v4339_v0  ;;  %v4346_v33 = vsel %vm1244_vm12, -inf, %v4198_v20 }
 0xc71   : > { %1260 = vmax.xlane.f32.xlu0 %v4346_v33  ;;  %v2108_v24 = vshll.u32 %v2107_v17, 16 }
 0xc9e   : > { %v1233_v27 = vpop.xlane.xlu1 %1232 }
 0xc9f   : > { %v1234_v45 = vcvt.f32.s32 %v1233_v27 }
 0xca1   : > { %v1237_v49 = vadd.s32 %v1236_v26, %v1234_v45 }
 0xca3   : > { %vm1251_vm15 = vcmp.eq.s32.totalorder %v3256_v42, %v1237_v49 }
 0xca4   : > { %vm1257_vm0 = vmand %vm1249_vm13, %vm1251_vm15 }
 0xca5   : > { %v4356_v20 = vsel %vm1257_vm0, -inf, %v4220_v39  ;;  %v1203_v39 = vcvt.f32.s32 %v4326_v12  ;;  %vm2167_vm13 = vmxor %vm2091_vm7, %vm2949_vm6 }
 0xca6   : > { %v2105_v16 = vpop.xlane.xlu2 %2104  ;;  %1266 = vmax.xlane.f32.xlu0 %v4356_v20  ;;  %v2137_v51 = vpop.xlane.xlu1 %2136 }
 0xca7   : > { %v2106_v43 = vcvt.f32.s32 %v2105_v16  ;;  %v2119_v48 = vpop.xlane.xlu0 %2118  ;;  %v2138_v59 = vcvt.f32.s32 %v2137_v51  ;;  %v1204_v30 = vshll.u32 %v1203_v39, 16 }
 0xca8   : > { %v2120_v52 = vcvt.f32.s32 %v2119_v48 }
 0xca9   : > { %v2109_v40 = vadd.s32 %v2108_v24, %v2106_v43  ;;  %v2141_v58 = vadd.s32 %v2140_v25, %v2138_v59 }
 0xcaa   : > { %v2123_v34 = vadd.s32 %v2122_v1, %v2120_v52 }
 0xcab   : > { %vm2156_vm14 = vcmp.eq.s32.totalorder %v3256_v42, %v2109_v40  ;;  %vm2168_vm1 = vcmp.eq.s32.totalorder %v3256_v42, %v2141_v58 }
 0xcac   : > { %vm2162_vm4 = vmand %vm2090_vm10, %vm2156_vm14  ;;  %vm2157_vm9 = vcmp.eq.s32.totalorder %v3256_v42, %v2123_v34 }
 0xcad   : > { %v4367_v63 = vsel %vm2162_vm4, -inf, %v4208_v3  ;;  %vm2163_vm2 = vmand %vm2091_vm7, %vm2157_vm9 }
 0xcae   : > { %v1201_v8 = vpop.xlane.xlu2 %1200  ;;  %2178 = vmax.xlane.f32.xlu1 %v4367_v63  ;;  %v4374_v37 = vsel %vm2163_vm2, -inf, %v4245_v4  ;;  %vm2174_vm11 = vmand %vm2166_vm5, %vm2168_vm1 }
 0xcaf   : > { %v1202_v54 = vcvt.f32.s32 %v1201_v8  ;;  %2180 = vmax.xlane.f32.xlu2 %v4374_v37  ;;  %v4378_v38 = vsel %vm2174_vm11, -inf, %v4249_v10 }
 0xcb0   : > { %2182 = vmax.xlane.f32.xlu0 %v4378_v38 }
 0xcb1   : > { %v1205_v3 = vadd.s32 %v1204_v30, %v1202_v54 }
 0xcb3   : > { %vm1239_vm8 = vcmp.eq.s32.totalorder %v3256_v42, %v1205_v3 }
 0xcb4   : > { %vm1245_vm12 = vmand %vm1173_vm3, %vm1239_vm8  ;;  %vm1270_vm3 = vcmp.eq.s32.totalorder %v3256_v42, 8 }
 0xcb5   : > { %v4387_v4 = vsel %vm1245_vm12, -inf, %v4227_v28 }
 0xcb6   : > { %v2151_v11 = vpop.xlane.xlu2 %2150  ;;  %1262 = vmax.xlane.f32.xlu1 %v4387_v4 }
 0xcb7   : > { %v2152_v10 = vcvt.f32.s32 %v2151_v11 }
 0xcb9   : > { %v2155_v12 = vadd.s32 %v2154_v9, %v2152_v10 }
 0xcbb   : > { %vm2169_vm15 = vcmp.eq.s32.totalorder %v3256_v42, %v2155_v12 }
 0xcbc   : > { %vm2175_vm0 = vmand %vm2167_vm13, %vm2169_vm15 }
 0xcbd   : > { %v4396_v56 = vsel %vm2175_vm0, -inf, %v4252_v7 }
 0xcbe   : > { %2184 = vmax.xlane.f32.xlu1 %v4396_v56 }
 0xce3   : > { %v4399_v28 = vpop.xlane.xlu2 %1264 }
 0xce4   : > { %v4402_v41 = vpop.xlane.xlu0 %1260 }
 0xce5   : > { %v1268_v32 = vmax.f32 %v4402_v41, %v4399_v28  ;;  %vm1273_vm7 = vcmp.ge.f32.partialorder %v4402_v41, %v4399_v28 }
 0xce7   : > { %v4411_v60 = vsel %vm1270_vm3, %v1268_v32, %v4268_v13  ;;  %vm1275_vm10 = vcmp.eq.f32.partialorder %v4346_v33, %v1268_v32  ;;  %vm1307_vm5 = vcmp.eq.f32.partialorder %v4339_v0, %v1268_v32 }
 0xce8   : > { %v1309_v7 = vsel %vm1307_vm5, %v3256_v42, 128  ;;  %v1277_v14 = vsel %vm1275_vm10, %v3256_v42, 128 }
 0xce9   : > { %v1312_v21 = vshra.s32 %v1309_v7, 16  ;;  %v1280_v23 = vshra.s32 %v1277_v14, 16  ;;  %v1311_v52 = vand.u32 65535, %v1309_v7 }
 0xceb   : > { %v1314_v18 = vcvt.s32.f32 %v1312_v21  ;;  %v1282_v5 = vcvt.s32.f32 %v1280_v23  ;;  %v1313_v39 = vcvt.s32.f32 %v1311_v52 }
 0xced   : > { %1315 = vmin.xlane.f32.xlu1 %v1314_v18  ;;  %1283 = vmin.xlane.f32.xlu2 %v1282_v5 }
 0xd19   : > { %v4417_v35 = vpop.xlane.xlu0 %1266 }
 0xd21   : > { %v4419_v47 = vpop.xlane.xlu1 %2178 }
 0xd22   : > { %v4448_v49 = vpop.xlane.xlu2 %2180 }
 0xd23   : > { %v4421_v13 = vpop.xlane.xlu0 %2182 }
 0xd24   : > { %v2186_v22 = vmax.f32 %v4419_v47, %v4421_v13 }
 0xd26   : > { %v4428_v15 = vsel %vm1270_vm3, %v2186_v22, %v4306_v2  ;;  %vm2192_vm14 = vcmp.eq.f32.partialorder %v4367_v63, %v2186_v22  ;;  %vm2224_vm2 = vcmp.eq.f32.partialorder %v4378_v38, %v2186_v22 }
 0xd27   : > { %v2194_v50 = vsel %vm2192_vm14, %v3256_v42, 128 }
 0xd28   : > { %v2197_v61 = vshra.s32 %v2194_v50, 16  ;;  %v2196_v54 = vand.u32 65535, %v2194_v50 }
 0xd29   : > { %v4432_v53 = vpop.xlane.xlu1 %1262 }
 0xd2a   : > { %v1269_v62 = vmax.f32 %v4432_v53, %v4417_v35  ;;  %vm1274_vm1 = vcmp.ge.f32.partialorder %v4432_v53, %v4417_v35  ;;  %v2199_v29 = vcvt.s32.f32 %v2197_v61  ;;  %v2198_v6 = vcvt.s32.f32 %v2196_v54 }
 0xd2c   : > { %v4441_v44 = vsel %vm1270_vm3, %v1269_v62, %v4287_v19  ;;  %vm1276_vm4 = vcmp.eq.f32.partialorder %v4387_v4, %v1269_v62  ;;  %vm1308_vm9 = vcmp.eq.f32.partialorder %v4356_v20, %v1269_v62  ;;  %2200 = vmin.xlane.f32.xlu0 %v2199_v29  ;;  %v2226_v19 = vsel %vm2224_vm2, %v3256_v42, 128 }
 0xd2d   : > { %v1310_v2 = vsel %vm1308_vm9, %v3256_v42, 128  ;;  %v1278_v57 = vsel %vm1276_vm4, %v3256_v42, 128  ;;  %v2229_v16 = vshra.s32 %v2226_v19, 16  ;;  %vm1349_vm9 = vmxor %vm1273_vm7, %vm2949_vm6 }
 0xd2e   : > { %v1326_v46 = vshra.s32 %v1310_v2, 16  ;;  %v1294_v27 = vshra.s32 %v1278_v57, 16  ;;  %v1325_v9 = vand.u32 65535, %v1310_v2  ;;  %v1293_v10 = vand.u32 65535, %v1278_v57 }
 0xd2f   : > { %v2231_v48 = vcvt.s32.f32 %v2229_v16 }
 0xd30   : > { %v1328_v26 = vcvt.s32.f32 %v1326_v46  ;;  %v1296_v45 = vcvt.s32.f32 %v1294_v27  ;;  %v1327_v32 = vcvt.s32.f32 %v1325_v9 }
 0xd31   : > { %v4450_v17 = vpop.xlane.xlu1 %2184 }
 0xd32   : > { %v2187_v55 = vmax.f32 %v4448_v49, %v4450_v17  ;;  %vm2191_vm11 = vcmp.ge.f32.partialorder %v4448_v49, %v4450_v17  ;;  %1329 = vmin.xlane.f32.xlu2 %v1328_v26 }
 0xd34   : > { %v4460_v36 = vsel %vm1270_vm3, %v2187_v55, %v4313_v31  ;;  %vm2193_vm8 = vcmp.eq.f32.partialorder %v4374_v37, %v2187_v55  ;;  %vm2225_vm12 = vcmp.eq.f32.partialorder %v4396_v56, %v2187_v55  ;;  %1297 = vmin.xlane.f32.xlu0 %v1296_v45  ;;  %v1279_v31 = vand.u32 65535, %v1277_v14 }
 0xd35   : > { %v2227_v51 = vsel %vm2225_vm12, %v3256_v42, 128  ;;  %v2195_v24 = vsel %vm2193_vm8, %v3256_v42, 128  ;;  %v1295_v14 = vcvt.s32.f32 %v1293_v10 }
 0xd36   : > { %v2243_v25 = vshra.s32 %v2227_v51, 16  ;;  %v2211_v43 = vshra.s32 %v2195_v24, 16  ;;  %v1281_v34 = vcvt.s32.f32 %v1279_v31  ;;  %v2242_v22 = vand.u32 65535, %v2227_v51 }
 0xd38   : > { %v2245_v59 = vcvt.s32.f32 %v2243_v25  ;;  %v2213_v1 = vcvt.s32.f32 %v2211_v43  ;;  %v2244_v57 = vcvt.s32.f32 %v2242_v22 }
 0xd3a   : > { %2232 = vmin.xlane.f32.xlu2 %v2231_v48  ;;  %2214 = vmin.xlane.f32.xlu1 %v2213_v1 }
 0xd3c   : > { %2246 = vmin.xlane.f32.xlu0 %v2245_v59 }
 0xd60   : > { %v1284_v40 = vpop.xlane.xlu2 %1283  ;;  %v1316_v58 = vpop.xlane.xlu1 %1315 }
 0xd61   : > { %vm1285_vm13 = vcmp.eq.f32.partialorder %v1282_v5, %v1284_v40  ;;  %vm1317_vm15 = vcmp.eq.f32.partialorder %v1314_v18, %v1316_v58  ;;  %v2228_v18 = vand.u32 65535, %v2226_v19  ;;  %v2210_v5 = vand.u32 65535, %v2195_v24 }
 0xd62   : > { %v1286_v8 = vsel %vm1285_vm13, %v1281_v34, inf  ;;  %v1318_v30 = vsel %vm1317_vm15, %v1313_v39, inf  ;;  %v1322_v19 = vcvt.f32.s32 %v1316_v58  ;;  %vm2190_vm15 = vcmp.ge.f32.partialorder %v4419_v47, %v4421_v13 }
 0xd63   : > { %1287 = vmin.xlane.f32.xlu1 %v1286_v8  ;;  %1319 = vmin.xlane.f32.xlu0 %v1318_v30  ;;  %v2230_v62 = vcvt.s32.f32 %v2228_v18 }
 0xd64   : > { %v1323_v24 = vshll.u32 %v1322_v19, 16 }
 0xd9f   : > { %v2201_v3 = vpop.xlane.xlu0 %2200 }
 0xda0   : > { %vm2202_vm0 = vcmp.eq.f32.partialorder %v2199_v29, %v2201_v3  ;;  %v2212_v29 = vcvt.s32.f32 %v2210_v5  ;;  %v2207_v52 = vcvt.f32.s32 %v2201_v3 }
 0xda1   : > { %v2203_v11 = vsel %vm2202_vm0, %v2198_v6, inf }
 0xda2   : > { %2204 = vmin.xlane.f32.xlu2 %v2203_v11  ;;  %v2208_v58 = vshll.u32 %v2207_v52, 16 }
 0xda5   : > { %v1330_v12 = vpop.xlane.xlu2 %1329 }
 0xda6   : > { %vm1331_vm3 = vcmp.eq.f32.partialorder %v1328_v26, %v1330_v12  ;;  %v1336_v39 = vcvt.f32.s32 %v1330_v12 }
 0xda7   : > { %v1298_v7 = vpop.xlane.xlu0 %1297  ;;  %v1332_v21 = vsel %vm1331_vm3, %v1327_v32, inf  ;;  %vm1350_vm3 = vmxor %vm1274_vm1, %vm2949_vm6 }
 0xda8   : > { %vm1299_vm10 = vcmp.eq.f32.partialorder %v1296_v45, %v1298_v7  ;;  %1333 = vmin.xlane.f32.xlu1 %v1332_v21  ;;  %v1290_v45 = vcvt.f32.s32 %v1284_v40  ;;  %v1304_v30 = vcvt.f32.s32 %v1298_v7  ;;  %v1337_v28 = vshll.u32 %v1336_v39, 16 }
 0xda9   : > { %v1300_v23 = vsel %vm1299_vm10, %v1295_v14, inf }
 0xdaa   : > { %1301 = vmin.xlane.f32.xlu2 %v1300_v23  ;;  %v1291_v51 = vshll.u32 %v1290_v45, 16  ;;  %v1305_v3 = vshll.u32 %v1304_v30, 16 }
 0xdad   : > { %v2233_v50 = vpop.xlane.xlu2 %2232  ;;  %v4466_v61 = vpop.xlane.xlu1 %2214 }
 0xdae   : > { %vm2234_vm5 = vcmp.eq.f32.partialorder %v2231_v48, %v2233_v50  ;;  %vm2216_vm14 = vcmp.eq.f32.partialorder %v2213_v1, %v4466_v61  ;;  %v2239_v9 = vcvt.f32.s32 %v2233_v50  ;;  %v2221_v10 = vcvt.f32.s32 %v4466_v61 }
 0xdaf   : > { %v4469_v2 = vpop.xlane.xlu0 %2246  ;;  %v2235_v46 = vsel %vm2234_vm5, %v2230_v62, inf  ;;  %v2217_v27 = vsel %vm2216_vm14, %v2212_v29, inf }
 0xdb0   : > { %vm2248_vm4 = vcmp.eq.f32.partialorder %v2245_v59, %v4469_v2  ;;  %2236 = vmin.xlane.f32.xlu1 %v2235_v46  ;;  %2218 = vmin.xlane.f32.xlu0 %v2217_v27  ;;  %v2240_v7 = vshll.u32 %v2239_v9, 16  ;;  %v2222_v23 = vshll.u32 %v2221_v10, 16 }
 0xdb1   : > { %v2249_v26 = vsel %vm2248_vm4, %v2244_v57, inf }
 0xdb2   : > { %2250 = vmin.xlane.f32.xlu2 %v2249_v26 }
 0xdd6   : > { %v1320_v55 = vpop.xlane.xlu0 %1319  ;;  %v1288_v16 = vpop.xlane.xlu1 %1287 }
 0xdd7   : > { %v1321_v25 = vcvt.f32.s32 %v1320_v55  ;;  %v1289_v43 = vcvt.f32.s32 %v1288_v16 }
 0xdd9   : > { %v1324_v48 = vadd.s32 %v1323_v24, %v1321_v25  ;;  %v1292_v1 = vadd.s32 %v1291_v51, %v1289_v43 }
 0xddb   : > { %vm1351_vm2 = vcmp.eq.s32.totalorder %v3256_v42, %v1324_v48  ;;  %vm1339_vm8 = vcmp.eq.s32.totalorder %v3256_v42, %v1292_v1 }
 0xddc   : > { %vm1357_vm12 = vmand %vm1349_vm9, %vm1351_vm2 }
 0xddd   : > { %v1359_v59 = vsel %vm1357_vm12, -inf, %v4339_v0  ;;  %vm1345_vm13 = vmand %vm1273_vm7, %vm1339_vm8 }
 0xdde   : > { %1365 = vmax.xlane.f32.xlu2 %v1359_v59  ;;  %v1347_v31 = vsel %vm1345_vm13, -inf, %v4346_v33  ;;  %vm2266_vm9 = vmxor %vm2190_vm15, %vm2949_vm6 }
 0xddf   : > { %1361 = vmax.xlane.f32.xlu0 %v1347_v31 }
 0xe15   : > { %v2205_v40 = vpop.xlane.xlu2 %2204 }
 0xe16   : > { %v2206_v34 = vcvt.f32.s32 %v2205_v40 }
 0xe18   : > { %v2209_v8 = vadd.s32 %v2208_v58, %v2206_v34 }
 0xe1a   : > { %vm2256_vm0 = vcmp.eq.s32.totalorder %v3256_v42, %v2209_v8 }
 0xe1b   : > { %vm2262_vm7 = vmand %vm2190_vm15, %vm2256_vm0  ;;  %v1334_v0 = vpop.xlane.xlu1 %1333 }
 0xe1c   : > { %v2264_v33 = vsel %vm2262_vm7, -inf, %v4367_v63  ;;  %v1335_v41 = vcvt.f32.s32 %v1334_v0  ;;  %v2253_v63 = vcvt.f32.s32 %v4469_v2 }
 0xe1d   : > { %v1302_v54 = vpop.xlane.xlu2 %1301  ;;  %2278 = vmax.xlane.f32.xlu1 %v2264_v33 }
 0xe1e   : > { %v1303_v6 = vcvt.f32.s32 %v1302_v54  ;;  %v1338_v11 = vadd.s32 %v1337_v28, %v1335_v41  ;;  %v2254_v61 = vshll.u32 %v2253_v63, 16 }
 0xe20   : > { %v1306_v12 = vadd.s32 %v1305_v3, %v1303_v6  ;;  %vm1352_vm10 = vcmp.eq.s32.totalorder %v3256_v42, %v1338_v11 }
 0xe21   : > { %vm1358_vm5 = vmand %vm1350_vm3, %vm1352_vm10 }
 0xe22   : > { %vm1340_vm14 = vcmp.eq.s32.totalorder %v3256_v42, %v1306_v12  ;;  %v1360_v32 = vsel %vm1358_vm5, -inf, %v4356_v20 }
 0xe23   : > { %vm1346_vm4 = vmand %vm1274_vm1, %vm1340_vm14  ;;  %v2219_v14 = vpop.xlane.xlu0 %2218  ;;  %1367 = vmax.xlane.f32.xlu0 %v1360_v32  ;;  %v2237_v21 = vpop.xlane.xlu1 %2236 }
 0xe24   : > { %v1348_v18 = vsel %vm1346_vm4, -inf, %v4387_v4  ;;  %v2220_v5 = vcvt.f32.s32 %v2219_v14  ;;  %v2238_v22 = vcvt.f32.s32 %v2237_v21  ;;  %vm2267_vm1 = vmxor %vm2191_vm11, %vm2949_vm6  ;;  %vm1371_vm6 = vcmp.eq.s32.totalorder %v3256_v42, 9 }
 0xe25   : > { %v2251_v50 = vpop.xlane.xlu2 %2250  ;;  %1363 = vmax.xlane.f32.xlu1 %v1348_v18 }
 0xe26   : > { %v2252_v62 = vcvt.f32.s32 %v2251_v50  ;;  %v2223_v29 = vadd.s32 %v2222_v23, %v2220_v5  ;;  %v2241_v2 = vadd.s32 %v2240_v7, %v2238_v22 }
 0xe28   : > { %v2255_v20 = vadd.s32 %v2254_v61, %v2252_v62  ;;  %vm2257_vm2 = vcmp.eq.s32.totalorder %v3256_v42, %v2223_v29  ;;  %vm2268_vm8 = vcmp.eq.s32.totalorder %v3256_v42, %v2241_v2 }
 0xe29   : > { %vm2263_vm12 = vmand %vm2191_vm11, %vm2257_vm2 }
 0xe2a   : > { %vm2269_vm13 = vcmp.eq.s32.totalorder %v3256_v42, %v2255_v20  ;;  %v2265_v4 = vsel %vm2263_vm12, -inf, %v4374_v37  ;;  %vm2274_vm0 = vmand %vm2266_vm9, %vm2268_vm8 }
 0xe2b   : > { %vm2275_vm15 = vmand %vm2267_vm1, %vm2269_vm13  ;;  %2280 = vmax.xlane.f32.xlu2 %v2265_v4  ;;  %v2276_v35 = vsel %vm2274_vm0, -inf, %v4378_v38 }
 0xe2c   : > { %v2277_v47 = vsel %vm2275_vm15, -inf, %v4396_v56  ;;  %2282 = vmax.xlane.f32.xlu0 %v2276_v35 }
 0xe2d   : > { %2284 = vmax.xlane.f32.xlu1 %v2277_v47 }
 0xe51   : > { %v1366_v13 = vpop.xlane.xlu2 %1365 }
 0xe52   : > { %v1362_v53 = vpop.xlane.xlu0 %1361 }
 0xe53   : > { %v1369_v57 = vmax.f32 %v1362_v53, %v1366_v13 }
 0xe55   : > { %v1372_v49 = vsel %vm1371_vm6, %v1369_v57, %v4411_v60 }
 0xe56   : > { %1374 = vst [vmem:[#allocation2] sm:$0xff] %v1372_v49 }
 0xe90   : > { %v2279_v37 = vpop.xlane.xlu1 %2278 }
 0xe96   : > { %v1368_v17 = vpop.xlane.xlu0 %1367 }
 0xe98   : > { %v1364_v46 = vpop.xlane.xlu1 %1363 }
 0xe99   : > { %v1370_v27 = vmax.f32 %v1364_v46, %v1368_v17 }
 0xe9b   : > { %v1373_v38 = vsel %vm1371_vm6, %v1370_v27, %v4441_v44 }
 0xe9c   : > { %1375 = vst [vmem:[#allocation2 + $0x8] sm:$0xff] %v1373_v38 }
 0xe9e   : > { %v2281_v56 = vpop.xlane.xlu2 %2280 }
 0xe9f   : > { %v2283_v26 = vpop.xlane.xlu0 %2282 }
 0xea0   : > { %v2286_v45 = vmax.f32 %v2279_v37, %v2283_v26  ;;  %v2285_v19 = vpop.xlane.xlu1 %2284  ;;  %2295 = sbr.rel (%p2522_p7) target bundleno = 3946 (0xf6a), region = 60 }
 0xea1   : > { %v2287_v55 = vmax.f32 %v2281_v56, %v2285_v19 }
 0xea2   : > { %v2288_v16 = vsel %vm1371_vm6, %v2286_v45, %v4428_v15 }
 0xea3   : > { %2290 = vst [vmem:[#allocation3 + $0x8] sm:$0xff] %v2288_v16  ;;  %v2289_v60 = vsel %vm1371_vm6, %v2287_v55, %v4460_v36 }
 0xea4   : > { %2291 = vst [vmem:[#allocation3] sm:$0xff] %v2289_v60 }
 0xea5   : > { %vm2296_vm11 = vcmp.lt.s32.totalorder %v3256_v42, 10  ;;  %v2297_v44 = vld [vmem:[#allocation2] sm:$0xff]  ;;  %v2298_v51 = vld [vmem:[#allocation2 + $0x8] sm:$0xff] }
 0xea6   : > { %vm2301_vm7 = vcmp.ne.f32.partialorder %v2297_v44, -inf  ;;  %vm2302_vm3 = vcmp.ne.f32.partialorder %v2298_v51, -inf }
 0xea7   : > { %vm2303_vm5 = vmand %vm2296_vm11, %vm2301_vm7 }
 0xea8   : > { %vm2304_vm4 = vmand %vm2296_vm11, %vm2302_vm3  ;;  %v2305_v15 = vsel %vm2303_vm5, %v2297_v44, 0.0 }
 0xea9   : > { %v2306_v36 = vsel %vm2304_vm4, %v2298_v51, 0.0 }
 0xeaa   : > { %v2299_v24 = vld [vmem:[#allocation3 + $0x8] sm:$0xff]  ;;  %v2307_v43 = vadd.f32 %v2306_v36, %v2305_v15 }
 0xeab   : > { %v2300_v25 = vld [vmem:[#allocation3] sm:$0xff]  ;;  %vm2317_vm10 = vcmp.ne.f32.partialorder %v2299_v24, -inf }
 0xeac   : > { %vm2318_vm14 = vcmp.ne.f32.partialorder %v2300_v25, -inf  ;;  %vm2319_vm9 = vmand %vm2296_vm11, %vm2317_vm10  ;;  %2308 = vadd.xlane.f32.xlu0 %v2307_v43 }
 0xead   : > { %vm2320_vm1 = vmand %vm2296_vm11, %vm2318_vm14  ;;  %v2321_v48 = vsel %vm2319_vm9, %v2299_v24, 0.0 }
 0xeae   : > { %v2322_v1 = vsel %vm2320_vm1, %v2300_v25, 0.0 }
 0xeaf   : > { %v2323_v59 = vadd.f32 %v2322_v1, %v2321_v48 }
 0xeb4   : > { %2324 = vadd.xlane.f32.xlu0 %v2323_v59 }
 0xf1f   : > { %v2309_v31 = vpop.xlane.xlu0 %2308 }
 0xf20   : > { %v2310_v52 = vrot.slane %v2309_v31, 4 }
 0xf22   : > { %v2311_v40 = vadd.f32 %v2310_v52, %v2309_v31 }
 0xf24   : > { %v2312_v58 = vrot.slane %v2311_v40, 2 }
 0xf26   : > { %v2313_v34 = vadd.f32 %v2312_v58, %v2311_v40 }
 0xf27   : > { %v2325_v39 = vpop.xlane.xlu0 %2324 }
 0xf28   : > { %v2326_v8 = vrot.slane %v2325_v39, 4  ;;  %v2314_v30 = vrot.slane %v2313_v34, 1 }
 0xf2a   : > { %v2327_v0 = vadd.f32 %v2326_v8, %v2325_v39  ;;  %v2315_v28 = vadd.f32 %v2314_v30, %v2313_v34 }
 0xf2c   : > { %v2328_v33 = vrot.slane %v2327_v0, 2  ;;  %2561 = vpush %v2315_v28 }
 0xf2e   : > { %v2329_v42 = vadd.f32 %v2328_v33, %v2327_v0 }
 0xf30   : > { %v2330_v41 = vrot.slane %v2329_v42, 1 }
 0xf32   : > { %v2331_v54 = vadd.f32 %v2330_v41, %v2329_v42 }
 0xf34   : > { %2563 = vpush %v2331_v54 }
 0xf5d   : > { %s2562_s30 = spop %2561 }
 0xf65   : > { %s2564_s27 = spop %2563 }
 0xf66   : > { %s2333_s1 = sadd.f32 %s2564_s27, %s2562_s30 }
 0xf68   : > { %v2334_v3 = vstv %s2333_s1 }
 0xf69   : > { %2336 = vst [vmem:[%s3204_s10] sm:$0xff] %v2334_v3 }
 0xf6a PF: > { %s4642_s4 = sld [smem:[#allocation21_spill]]  ;;  %s2350_s20 = sshll.u32 %s3204_s10, 4  ;;  %s2351_s20 = int_to_ptr.vmem [resolvable:$true] %s2350_s20 }
 0xf6b   : > { %s4644_s15 = sld [smem:[#allocation31_spill]]  ;;  %s2338_s28 = scalar_lea.sflag [#allocation6], %s3173_s24 }
 0xf70   : > { %s2524_s9 = sshll.u32 %s4642_s4, 3 }
 0xf71   : > { %s4645_s14 = smov %s4644_s15  ;;  %s2348_s18 = scalar_lea.hbm %s4644_s15, %s2524_s9 }
 0xf72   : > { %s2352_s5 = sshll.u32 %s2348_s18, 4  ;;  %s2828_s8 = scalar_lea.hbm %s4645_s14, 24  ;;  %s2353_s5 = int_to_ptr.hbm [resolvable:$true] %s2352_s5 }
 0xf73   : > { %s2822_s29 = sshra.s32 %s2353_s5, 4  ;;  %s2823_s29 = int_to_ptr.hbm [resolvable:$true] %s2822_s29 }
 0xf74   : > { %s2824_s6 = scalar_lea.hbm %s2823_s29, 8  ;;  %p2829_p5 = scmp.lt.s32.totalorder %s2823_s29, %s4645_s14 }
 0xf75   : > { %p2825_p12 = scmp.ne.s32.totalorder %s2823_s29, %s2824_s6  ;;  %p2830_p10 = scmp.lt.s32.totalorder %s2828_s8, %s2824_s6 }
 0xf77   : > { %p2826_p13 = pnand %p2825_p12, %p3098_p8  ;;  %p2831_p6 = por %p2830_p10, %p2829_p5 }
 0xf79   : > { %p2827_p0 = pneg %p2826_p13 }
 0xf7b   : > { %p2832_p1 = pnand %p2831_p6, %p2827_p0 }
 0xf7d   : > { %2835 = shalt.err (!%p2832_p1)
}
 0xf7e   : > { %2573 = dma.vmem_to_hbm [thread:$0]  (%p3098_p8), %s2351_s20, 128, %s2353_s5, %s2338_s28  }
 0xf7f PF: > { %s4646_s24 = sld [smem:[#allocation23_spill]] }
 0xf80   : > { %s4647_s10 = sld [smem:[#allocation18_spill]] }
 0xf85   : > { %p2593_p3 = scmp.ge.s32.totalorder %s4646_s24, 2 }
 0xf86   : > { %s2364_s30 = sand.u32 1, %s4647_s10  }
 0xf87   : > { %p2589_p9 = pnand %p2593_p3, %p3105_p2  ;;  %s2365_s27 = scalar_lea.sflag [#allocation6], %s2364_s30 }
 0xf89   : > { %p2590_p11 = pneg %p2589_p9 }
 0xf8b   : > { %2897 = dma.done.wait (%p2590_p11), %s2365_s27, 128  }
 0xf8c   : > { %2899 = vsyncadd (%p2590_p11), %s2365_s27, 4294967168  ;;  %s26_s25 = sadd.s32 1, %s4646_s24   ;;  %s4649_s1 = sld [smem:[#allocation26_spill]] }
 0xf8d   : > { %p23_p4 = scmp.ge.s32.totalorder %s26_s25, 11   ;;  %s4650_s4 = sld [smem:[#allocation19_spill]] }
 0xf8e   : > { %s4651_s20 = sld [smem:[#allocation27_spill]]  ;;  %s4655_s15 = smov %s2906_s16 }
 0xf8f   : > { %s4652_s22 = sld [smem:[#allocation22_spill]]  ;;  %s4656_s16 = smov %s2910_s17 }
 0xf90   : > { %s4653_s9 = sld [smem:[#allocation24_spill]]  ;;  %s4658_s18 = smov %s2918_s19 }
 0xf91   : > { %s4654_s24 = sld [smem:[#allocation25_spill]]  ;;  %s4660_s21 = smov %s2934_s23 }
 0xf92   : > { %s4657_s17 = smov %s4649_s1  ;;  %25 = sbr.rel (!%p23_p4) target bundleno = 16 (0x10), region = 126 }
 0xf93   : > { %s4659_s19 = smov %s4650_s4 }
 0xf96   : > { %s4661_s23 = smov %s4653_s9 }
 0xf97   :  { %2371 = vsyncpa [#allocation5], 1 }
 0xf98   :  { %2373 = vsyncpa [#allocation5 + $0x1], 1 }
 0xf99   :  { %2374 = vsyncpa [#allocation8], 1 }
 0xf9a   :  { %2376 = vsyncpa [#allocation8 + $0x1], 1 }
 0xf9b   :  { %2377 = vsyncpa [#allocation11], 1 }
 0xf9c   :  { %2379 = vsyncpa [#allocation11 + $0x1], 1 }
 0xf9d   :  { %2380 = vsyncpa [#allocation6], 1 }
 0xf9e   :  { %2382 = vsyncpa [#allocation6 + $0x1], 1 }

</bundles_post_ra>
